<compile_context>
chip_gen: v7x
topology: tpu7x:2x2x1
jax: 0.10.0
libtpu: 0.0.40
codegen_flags: <defaults>
</compile_context>

<pallas_src>
import functools

import jax
import jax.numpy as jnp
from jax.experimental import pallas as pl
from jax.experimental.pallas import tpu as pltpu

_BN_EPS = 1e-5
_L2_EPS = 1e-12   # F.normalize-style clamp on the norm


# ---------------------------------------------------------------------------
# Fused Pallas kernel: conv1 + BN + ReLU -> conv2 + BN + ReLU -> FC -> L2 norm
# ---------------------------------------------------------------------------
def _fused_forward_kernel(x_ref, w1_ref, p1_ref, g1_ref, b1_ref,
                          w2_ref, p2_ref, g2_ref, b2_ref, wfc_ref,
                          o_ref, y1_scr, y2_scr, *, dims):
    (N, H, C0, K, OH1, OW1, C1, OH2, OW2, C2, E, RP) = dims
    f32 = jnp.float32

    # Padding rows of the scratches must be zero so the full-scratch BN
    # reductions only see valid contributions.
    y1_scr[...] = jnp.zeros_like(y1_scr)
    y2_scr[...] = jnp.zeros_like(y2_scr)

    def conv_layer(src_ref, src_pitch, cin, w_ref, dst_scr, oh, ow, cout):
        # "valid" conv, stride 1, as K*K shifted-slab GEMMs per sample.
        # src layout: rows = n*src_pitch + h, lanes = w*cin + c
        # dst layout: rows = n*RP + oh,      lanes = ow*cout + c
        for n in range(N):
            acc = jnp.zeros((oh, ow * cout), f32)
            for i in range(K):
                for j in range(K):
                    slab = src_ref[n * src_pitch + i: n * src_pitch + i + oh,
                                   j * cin: j * cin + ow * cin]
                    acc = acc + jnp.dot(slab, w_ref[i * K + j],
                                        preferred_element_type=f32)
            dst_scr[n * RP: n * RP + oh, :] = acc

    def bn_relu_inplace(scr, p_ref, g_ref, b_ref, count):
        # Training-mode BatchNorm2d (biased variance) + ReLU, in-place.
        # One pass: sum / sum-of-squares, channel reduction via p_ref matmul,
        # fused scale/shift (gamma/beta are pre-tiled to the lane layout).
        y = scr[...]
        s = jnp.sum(y, axis=0, keepdims=True)
        ss = jnp.sum(y * y, axis=0, keepdims=True)
        inv_m = 1.0 / float(count)
        mean_t = jnp.dot(s, p_ref[...], preferred_element_type=f32) * inv_m
        ex2_t = jnp.dot(ss, p_ref[...], preferred_element_type=f32) * inv_m
        var_t = ex2_t - mean_t * mean_t
        scale_t = g_ref[...] * jax.lax.rsqrt(var_t + _BN_EPS)
        shift_t = b_ref[...] - mean_t * scale_t
        scr[...] = jnp.maximum(y * scale_t + shift_t, 0.0)

    # ---- conv block ----
    conv_layer(x_ref, H, C0, w1_ref, y1_scr, OH1, OW1, C1)
    bn_relu_inplace(y1_scr, p1_ref, g1_ref, b1_ref, N * OH1 * OW1)
    conv_layer(y1_scr, RP, C1, w2_ref, y2_scr, OH2, OW2, C2)
    bn_relu_inplace(y2_scr, p2_ref, g2_ref, b2_ref, N * OH2 * OW2)

    # ---- FC (NCHW flatten pre-folded into wfc) + L2 normalize, per sample ----
    for n in range(N):
        blk = y2_scr[n * RP: n * RP + OH2, :]            # [OH2, OW2*C2]
        emb = jnp.zeros((1, E), f32)
        for oh in range(OH2):
            emb = emb + jnp.dot(blk[oh: oh + 1, :], wfc_ref[oh],
                                preferred_element_type=f32)
        sq = jnp.sum(emb * emb, axis=-1, keepdims=True)
        inv = jax.lax.rsqrt(jnp.maximum(sq, _L2_EPS * _L2_EPS))
        o_ref[n: n + 1, :] = emb * inv


# ---------------------------------------------------------------------------
# One-time parameter preparation (PyTorch layout -> kernel operands)
# ---------------------------------------------------------------------------
def prepare_kernel_params(params, input_shape, kernel_size=3, stride=1):
    # TODO(synk): specialized to stride=1, square kernels, 'valid' padding,
    # exactly two conv layers (matches the config under test).
    assert stride == 1 and len(params["conv_layers"]) == 2
    c0, h, w = input_shape
    k = kernel_size
    w1 = params["conv_layers"][0]["w"]            # [C1, C0, K, K]
    w2 = params["conv_layers"][1]["w"]            # [C2, C1, K, K]
    c1, c2 = w1.shape[0], w2.shape[0]
    oh1, ow1 = h - k + 1, w - k + 1
    oh2, ow2 = oh1 - k + 1, ow1 - k + 1
    e = params["fc_w"].shape[0]

    def blockdiag(wconv, ow_out):
        # [Cout, Cin, K, K] -> [K*K, ow_out*Cin, ow_out*Cout] block-diagonal.
        eye = jnp.eye(ow_out, dtype=jnp.float32)
        mats = [jnp.kron(eye, jnp.transpose(wconv[:, :, i, j], (1, 0)))
                for i in range(k) for j in range(k)]
        return jnp.stack(mats, axis=0)

    def same_channel(ow_out, c):
        # P[a, b] = 1 iff lanes a, b hold the same channel (lane layout ow*c+ch).
        ch = jnp.arange(ow_out * c) % c
        return (ch[:, None] == ch[None, :]).astype(jnp.float32)

    def tile_lanes(v, ow_out):
        return jnp.tile(v.reshape(1, -1), (1, ow_out))

    # Fold the PyTorch NCHW flatten (index c*OH*OW + oh*OW + ow) into the FC
    # weight: wfc[oh, ow*C2 + c, e] = fc_w[e, c*OH2*OW2 + oh*OW2 + ow].
    wfc = params["fc_w"].reshape(e, c2, oh2, ow2)
    wfc = jnp.transpose(wfc, (2, 3, 1, 0)).reshape(oh2, ow2 * c2, e)

    l1, l2 = params["conv_layers"]
    return {
        "w1b": blockdiag(w1, ow1), "p1": same_channel(ow1, c1),
        "g1t": tile_lanes(l1["gamma"], ow1), "b1t": tile_lanes(l1["beta"], ow1),
        "w2b": blockdiag(w2, ow2), "p2": same_channel(ow2, c2),
        "g2t": tile_lanes(l2["gamma"], ow2), "b2t": tile_lanes(l2["beta"], ow2),
        "wfc": wfc,
    }


# ---------------------------------------------------------------------------
# Forward wrapper (single pallas_call; all static shape info derived here)
# ---------------------------------------------------------------------------
@jax.jit
def conv2d_embedding_forward(x_nchw, kp):
    """Forward pass of Conv2dEmbedding. x is NCHW (PyTorch convention)."""
    n, c0, h, w = x_nchw.shape
    w1b, w2b, wfc = kp["w1b"], kp["w2b"], kp["wfc"]
    k = int(round(w1b.shape[0] ** 0.5))
    oh1, ow1 = h - k + 1, w - k + 1
    oh2, ow2 = oh1 - k + 1, ow1 - k + 1
    c1 = w1b.shape[2] // ow1
    c2 = w2b.shape[2] // ow2
    e = wfc.shape[2]
    rp = ((h + 7) // 8) * 8                       # per-sample row pitch (8-aligned)

    # NCHW -> NHWC -> 2-D [N*H, W*C0]  (channels on the TPU lane dim).
    x2d = jnp.transpose(x_nchw, (0, 2, 3, 1)).reshape(n * h, w * c0)

    dims = (n, h, c0, k, oh1, ow1, c1, oh2, ow2, c2, e, rp)
    kernel = functools.partial(_fused_forward_kernel, dims=dims)

    return pl.pallas_call(
        kernel,
        out_shape=jax.ShapeDtypeStruct((n, e), jnp.float32),
        grid=(1,),
        in_specs=[
            pl.BlockSpec((n * h, w * c0), lambda i: (0, 0)),
            pl.BlockSpec(w1b.shape, lambda i: (0, 0, 0)),
            pl.BlockSpec(kp["p1"].shape, lambda i: (0, 0)),
            pl.BlockSpec(kp["g1t"].shape, lambda i: (0, 0)),
            pl.BlockSpec(kp["b1t"].shape, lambda i: (0, 0)),
            pl.BlockSpec(w2b.shape, lambda i: (0, 0, 0)),
            pl.BlockSpec(kp["p2"].shape, lambda i: (0, 0)),
            pl.BlockSpec(kp["g2t"].shape, lambda i: (0, 0)),
            pl.BlockSpec(kp["b2t"].shape, lambda i: (0, 0)),
            pl.BlockSpec(wfc.shape, lambda i: (0, 0, 0)),
        ],
        out_specs=pl.BlockSpec((n, e), lambda i: (0, 0)),
        scratch_shapes=[
            pltpu.VMEM((n * rp, ow1 * c1), jnp.float32),   # layer-1 activations
            pltpu.VMEM((n * rp, ow2 * c2), jnp.float32),   # layer-2 activations
        ],
        # TODO(synk): at larger batch/spatial sizes, add a batch/M grid axis
        # with dimension_semantics=("parallel", ...) to shard across v7x's two
        # TensorCores and tile M; at these toy shapes grid=(1,) is optimal.
        compiler_params=pltpu.CompilerParams(
            dimension_semantics=("arbitrary",)),
    )(x2d, w1b, kp["p1"], kp["g1t"], kp["b1t"],
      w2b, kp["p2"], kp["g2t"], kp["b2t"], wfc)


# ---------------------------------------------------------------------------
# Deterministic parameter construction (PyTorch layout) + pure-JAX reference
# ---------------------------------------------------------------------------
def make_params(key, in_chans, hw, out_chans_per_layer, kernel_size, stride,
                embedding_dim):
    h, w = hw
    conv_layers = []
    cin = in_chans
    for cout in out_chans_per_layer:
        key, k1, k2, k3 = jax.random.split(key, 4)
        conv_layers.append({
            # Conv bias omitted: it cancels exactly under the following
            # BatchNorm mean subtraction, so it never affects the output.
            "w": 0.1 * jax.random.normal(
                k1, (cout, cin, kernel_size, kernel_size), jnp.float32),
            "gamma": 1.0 + 0.1 * jax.random.normal(k2, (cout,), jnp.float32),
            "beta": 0.1 * jax.random.normal(k3, (cout,), jnp.float32),
        })
        h = (h - kernel_size) // stride + 1
        w = (w - kernel_size) // stride + 1
        cin = cout
    key, kf = jax.random.split(key)
    fc_w = 0.05 * jax.random.normal(kf, (embedding_dim, cin * h * w), jnp.float32)
    return {"conv_layers": conv_layers, "fc_w": fc_w}, key


def reference_forward(x_nchw, params):
    x = jnp.transpose(x_nchw, (0, 2, 3, 1))               # NHWC
    for layer in params["conv_layers"]:
        w = jnp.transpose(layer["w"], (2, 3, 1, 0))        # HWIO
        y = jax.lax.conv_general_dilated(
            x, w, window_strides=(1, 1), padding="VALID",
            dimension_numbers=("NHWC", "HWIO", "NHWC"),
            precision=jax.lax.Precision.HIGHEST)
        mean = jnp.mean(y, axis=(0, 1, 2))
        var = jnp.mean(jnp.square(y - mean), axis=(0, 1, 2))
        y = (y - mean) * jax.lax.rsqrt(var + _BN_EPS)
        x = jnp.maximum(y * layer["gamma"] + layer["beta"], 0.0)
    x_flat = jnp.transpose(x, (0, 3, 1, 2)).reshape(x.shape[0], -1)
    emb = x_flat @ params["fc_w"].T
    nrm = jnp.maximum(jnp.linalg.norm(emb, axis=-1, keepdims=True), _L2_EPS)
    return emb / nrm


if __name__ == "__main__":
    key = jax.random.PRNGKey(0)

    batch, in_chans, spatial = 2, 4, 16
    out_chans_per_layer = [8, 16]
    kernel_size, stride = 3, 1
    embedding_dim = 32

    params, key = make_params(key, in_chans, (spatial, spatial),
                              out_chans_per_layer, kernel_size, stride,
                              embedding_dim)
    kp = prepare_kernel_params(params, (in_chans, spatial, spatial),
                               kernel_size, stride)

    key, kx = jax.random.split(key)
    x = jax.random.normal(kx, (batch, in_chans, spatial, spatial), jnp.float32)

    emb = conv2d_embedding_forward(x, kp)
    jax.block_until_ready(emb)

    assert emb.shape == (batch, embedding_dim), emb.shape
    norms = jnp.linalg.norm(emb, axis=-1)
    assert jnp.allclose(norms, 1.0, atol=1e-4), norms

    ref = reference_forward(x, params)
    max_err = float(jnp.max(jnp.abs(emb - ref)))
    assert max_err < 1e-3, max_err

    print("KERNEL_OK")
</pallas_src>

<mosaic_0001>
module attributes {stable_mosaic.version = 11 : i64} {
  func.func @_fused_forward_kernel(%arg0: i32, %arg1: memref<32x64xf32, #tpu.memory_space<vmem>>, %arg2: memref<9x56x112xf32, #tpu.memory_space<vmem>>, %arg3: memref<112x112xf32, #tpu.memory_space<vmem>>, %arg4: memref<1x112xf32, #tpu.memory_space<vmem>>, %arg5: memref<1x112xf32, #tpu.memory_space<vmem>>, %arg6: memref<9x96x192xf32, #tpu.memory_space<vmem>>, %arg7: memref<192x192xf32, #tpu.memory_space<vmem>>, %arg8: memref<1x192xf32, #tpu.memory_space<vmem>>, %arg9: memref<1x192xf32, #tpu.memory_space<vmem>>, %arg10: memref<12x192x32xf32, #tpu.memory_space<vmem>>, %arg11: memref<2x32xf32, #tpu.memory_space<vmem>>, %arg12: memref<32x112xf32, #tpu.memory_space<vmem>>, %arg13: memref<32x192xf32, #tpu.memory_space<vmem>>) attributes {dimension_semantics = [#tpu.dimension_semantics<arbitrary>], iteration_bounds = array<i64: 1>, scalar_prefetch = 0 : i64, scratch_operands = 2 : i64, tpu.core_type = #tpu.core_type<tc>, window_params = [{pipeline_mode = #tpu.pipeline_mode<synchronous>, transform_indices = @transform_0, window_bounds = array<i64: 32, 64>}, {pipeline_mode = #tpu.pipeline_mode<synchronous>, transform_indices = @transform_1, window_bounds = array<i64: 9, 56, 112>}, {pipeline_mode = #tpu.pipeline_mode<synchronous>, transform_indices = @transform_2, window_bounds = array<i64: 112, 112>}, {pipeline_mode = #tpu.pipeline_mode<synchronous>, transform_indices = @transform_3, window_bounds = array<i64: 1, 112>}, {pipeline_mode = #tpu.pipeline_mode<synchronous>, transform_indices = @transform_4, window_bounds = array<i64: 1, 112>}, {pipeline_mode = #tpu.pipeline_mode<synchronous>, transform_indices = @transform_5, window_bounds = array<i64: 9, 96, 192>}, {pipeline_mode = #tpu.pipeline_mode<synchronous>, transform_indices = @transform_6, window_bounds = array<i64: 192, 192>}, {pipeline_mode = #tpu.pipeline_mode<synchronous>, transform_indices = @transform_7, window_bounds = array<i64: 1, 192>}, {pipeline_mode = #tpu.pipeline_mode<synchronous>, transform_indices = @transform_8, window_bounds = array<i64: 1, 192>}, {pipeline_mode = #tpu.pipeline_mode<synchronous>, transform_indices = @transform_9, window_bounds = array<i64: 12, 192, 32>}, {pipeline_mode = #tpu.pipeline_mode<synchronous>, transform_indices = @transform_10, window_bounds = array<i64: 2, 32>}]} {
    %cst = arith.constant 0.000000e+00 : f32
    %0 = vector.broadcast %cst : f32 to vector<32x112xf32>
    %c0 = arith.constant 0 : index
    %c0_0 = arith.constant 0 : index
    %1 = vector.load %arg12[%c0, %c0_0] : memref<32x112xf32, #tpu.memory_space<vmem>>, vector<32x112xf32>
    tpu.vector_store %arg12[%c0, %c0_0], %0 {strides = array<i32>} : memref<32x112xf32, #tpu.memory_space<vmem>>, vector<32x112xf32>,
    %cst_1 = arith.constant 0.000000e+00 : f32
    %2 = vector.broadcast %cst_1 : f32 to vector<32x192xf32>
    %c0_2 = arith.constant 0 : index
    %c0_3 = arith.constant 0 : index
    %3 = vector.load %arg13[%c0_2, %c0_3] : memref<32x192xf32, #tpu.memory_space<vmem>>, vector<32x192xf32>
    tpu.vector_store %arg13[%c0_2, %c0_3], %2 {strides = array<i32>} : memref<32x192xf32, #tpu.memory_space<vmem>>, vector<32x192xf32>,
    %cst_4 = arith.constant 0.000000e+00 : f32
    %4 = vector.broadcast %cst_4 : f32 to vector<14x112xf32>
    %c0_5 = arith.constant 0 : index
    %c0_6 = arith.constant 0 : index
    %5 = vector.load %arg1[%c0_5, %c0_6] : memref<32x64xf32, #tpu.memory_space<vmem>>, vector<14x56xf32>
    %c0_7 = arith.constant 0 : index
    %c0_8 = arith.constant 0 : index
    %c0_9 = arith.constant 0 : index
    %6 = vector.load %arg2[%c0_7, %c0_8, %c0_9] : memref<9x56x112xf32, #tpu.memory_space<vmem>>, vector<1x56x112xf32>
    %7 = vector.shape_cast %6 : vector<1x56x112xf32> to vector<56x112xf32>
    %cst_10 = arith.constant dense<0.000000e+00> : vector<14x112xf32>
    %8 = tpu.matmul %5, %7, %cst_10 {dimension_numbers = #tpu.dot_dimension_numbers<[1], [0], [0], [1], [0, 0, 1, 1], [], []>} : vector<14x56xf32>, vector<56x112xf32>, vector<14x112xf32> -> vector<14x112xf32>
    %9 = arith.addf %4, %8 : vector<14x112xf32>
    %c0_11 = arith.constant 0 : index
    %c4 = arith.constant 4 : index
    %10 = vector.load %arg1[%c0_11, %c4] : memref<32x64xf32, #tpu.memory_space<vmem>>, vector<14x56xf32>
    %c1 = arith.constant 1 : index
    %c0_12 = arith.constant 0 : index
    %c0_13 = arith.constant 0 : index
    %11 = vector.load %arg2[%c1, %c0_12, %c0_13] : memref<9x56x112xf32, #tpu.memory_space<vmem>>, vector<1x56x112xf32>
    %12 = vector.shape_cast %11 : vector<1x56x112xf32> to vector<56x112xf32>
    %cst_14 = arith.constant dense<0.000000e+00> : vector<14x112xf32>
    %13 = tpu.matmul %10, %12, %cst_14 {dimension_numbers = #tpu.dot_dimension_numbers<[1], [0], [0], [1], [0, 0, 1, 1], [], []>} : vector<14x56xf32>, vector<56x112xf32>, vector<14x112xf32> -> vector<14x112xf32>
    %14 = arith.addf %9, %13 : vector<14x112xf32>
    %c0_15 = arith.constant 0 : index
    %c8 = arith.constant 8 : index
    %15 = vector.load %arg1[%c0_15, %c8] : memref<32x64xf32, #tpu.memory_space<vmem>>, vector<14x56xf32>
    %c2 = arith.constant 2 : index
    %c0_16 = arith.constant 0 : index
    %c0_17 = arith.constant 0 : index
    %16 = vector.load %arg2[%c2, %c0_16, %c0_17] : memref<9x56x112xf32, #tpu.memory_space<vmem>>, vector<1x56x112xf32>
    %17 = vector.shape_cast %16 : vector<1x56x112xf32> to vector<56x112xf32>
    %cst_18 = arith.constant dense<0.000000e+00> : vector<14x112xf32>
    %18 = tpu.matmul %15, %17, %cst_18 {dimension_numbers = #tpu.dot_dimension_numbers<[1], [0], [0], [1], [0, 0, 1, 1], [], []>} : vector<14x56xf32>, vector<56x112xf32>, vector<14x112xf32> -> vector<14x112xf32>
    %19 = arith.addf %14, %18 : vector<14x112xf32>
    %c1_19 = arith.constant 1 : index
    %c0_20 = arith.constant 0 : index
    %20 = vector.load %arg1[%c1_19, %c0_20] : memref<32x64xf32, #tpu.memory_space<vmem>>, vector<14x56xf32>
    %c3 = arith.constant 3 : index
    %c0_21 = arith.constant 0 : index
    %c0_22 = arith.constant 0 : index
    %21 = vector.load %arg2[%c3, %c0_21, %c0_22] : memref<9x56x112xf32, #tpu.memory_space<vmem>>, vector<1x56x112xf32>
    %22 = vector.shape_cast %21 : vector<1x56x112xf32> to vector<56x112xf32>
    %cst_23 = arith.constant dense<0.000000e+00> : vector<14x112xf32>
    %23 = tpu.matmul %20, %22, %cst_23 {dimension_numbers = #tpu.dot_dimension_numbers<[1], [0], [0], [1], [0, 0, 1, 1], [], []>} : vector<14x56xf32>, vector<56x112xf32>, vector<14x112xf32> -> vector<14x112xf32>
    %24 = arith.addf %19, %23 : vector<14x112xf32>
    %c1_24 = arith.constant 1 : index
    %c4_25 = arith.constant 4 : index
    %25 = vector.load %arg1[%c1_24, %c4_25] : memref<32x64xf32, #tpu.memory_space<vmem>>, vector<14x56xf32>
    %c4_26 = arith.constant 4 : index
    %c0_27 = arith.constant 0 : index
    %c0_28 = arith.constant 0 : index
    %26 = vector.load %arg2[%c4_26, %c0_27, %c0_28] : memref<9x56x112xf32, #tpu.memory_space<vmem>>, vector<1x56x112xf32>
    %27 = vector.shape_cast %26 : vector<1x56x112xf32> to vector<56x112xf32>
    %cst_29 = arith.constant dense<0.000000e+00> : vector<14x112xf32>
    %28 = tpu.matmul %25, %27, %cst_29 {dimension_numbers = #tpu.dot_dimension_numbers<[1], [0], [0], [1], [0, 0, 1, 1], [], []>} : vector<14x56xf32>, vector<56x112xf32>, vector<14x112xf32> -> vector<14x112xf32>
    %29 = arith.addf %24, %28 : vector<14x112xf32>
    %c1_30 = arith.constant 1 : index
    %c8_31 = arith.constant 8 : index
    %30 = vector.load %arg1[%c1_30, %c8_31] : memref<32x64xf32, #tpu.memory_space<vmem>>, vector<14x56xf32>
    %c5 = arith.constant 5 : index
    %c0_32 = arith.constant 0 : index
    %c0_33 = arith.constant 0 : index
    %31 = vector.load %arg2[%c5, %c0_32, %c0_33] : memref<9x56x112xf32, #tpu.memory_space<vmem>>, vector<1x56x112xf32>
    %32 = vector.shape_cast %31 : vector<1x56x112xf32> to vector<56x112xf32>
    %cst_34 = arith.constant dense<0.000000e+00> : vector<14x112xf32>
    %33 = tpu.matmul %30, %32, %cst_34 {dimension_numbers = #tpu.dot_dimension_numbers<[1], [0], [0], [1], [0, 0, 1, 1], [], []>} : vector<14x56xf32>, vector<56x112xf32>, vector<14x112xf32> -> vector<14x112xf32>
    %34 = arith.addf %29, %33 : vector<14x112xf32>
    %c2_35 = arith.constant 2 : index
    %c0_36 = arith.constant 0 : index
    %35 = vector.load %arg1[%c2_35, %c0_36] : memref<32x64xf32, #tpu.memory_space<vmem>>, vector<14x56xf32>
    %c6 = arith.constant 6 : index
    %c0_37 = arith.constant 0 : index
    %c0_38 = arith.constant 0 : index
    %36 = vector.load %arg2[%c6, %c0_37, %c0_38] : memref<9x56x112xf32, #tpu.memory_space<vmem>>, vector<1x56x112xf32>
    %37 = vector.shape_cast %36 : vector<1x56x112xf32> to vector<56x112xf32>
    %cst_39 = arith.constant dense<0.000000e+00> : vector<14x112xf32>
    %38 = tpu.matmul %35, %37, %cst_39 {dimension_numbers = #tpu.dot_dimension_numbers<[1], [0], [0], [1], [0, 0, 1, 1], [], []>} : vector<14x56xf32>, vector<56x112xf32>, vector<14x112xf32> -> vector<14x112xf32>
    %39 = arith.addf %34, %38 : vector<14x112xf32>
    %c2_40 = arith.constant 2 : index
    %c4_41 = arith.constant 4 : index
    %40 = vector.load %arg1[%c2_40, %c4_41] : memref<32x64xf32, #tpu.memory_space<vmem>>, vector<14x56xf32>
    %c7 = arith.constant 7 : index
    %c0_42 = arith.constant 0 : index
    %c0_43 = arith.constant 0 : index
    %41 = vector.load %arg2[%c7, %c0_42, %c0_43] : memref<9x56x112xf32, #tpu.memory_space<vmem>>, vector<1x56x112xf32>
    %42 = vector.shape_cast %41 : vector<1x56x112xf32> to vector<56x112xf32>
    %cst_44 = arith.constant dense<0.000000e+00> : vector<14x112xf32>
    %43 = tpu.matmul %40, %42, %cst_44 {dimension_numbers = #tpu.dot_dimension_numbers<[1], [0], [0], [1], [0, 0, 1, 1], [], []>} : vector<14x56xf32>, vector<56x112xf32>, vector<14x112xf32> -> vector<14x112xf32>
    %44 = arith.addf %39, %43 : vector<14x112xf32>
    %c2_45 = arith.constant 2 : index
    %c8_46 = arith.constant 8 : index
    %45 = vector.load %arg1[%c2_45, %c8_46] : memref<32x64xf32, #tpu.memory_space<vmem>>, vector<14x56xf32>
    %c8_47 = arith.constant 8 : index
    %c0_48 = arith.constant 0 : index
    %c0_49 = arith.constant 0 : index
    %46 = vector.load %arg2[%c8_47, %c0_48, %c0_49] : memref<9x56x112xf32, #tpu.memory_space<vmem>>, vector<1x56x112xf32>
    %47 = vector.shape_cast %46 : vector<1x56x112xf32> to vector<56x112xf32>
    %cst_50 = arith.constant dense<0.000000e+00> : vector<14x112xf32>
    %48 = tpu.matmul %45, %47, %cst_50 {dimension_numbers = #tpu.dot_dimension_numbers<[1], [0], [0], [1], [0, 0, 1, 1], [], []>} : vector<14x56xf32>, vector<56x112xf32>, vector<14x112xf32> -> vector<14x112xf32>
    %49 = arith.addf %44, %48 : vector<14x112xf32>
    %c0_51 = arith.constant 0 : index
    %c0_52 = arith.constant 0 : index
    %50 = vector.load %arg12[%c0_51, %c0_52] : memref<32x112xf32, #tpu.memory_space<vmem>>, vector<14x112xf32>
    tpu.vector_store %arg12[%c0_51, %c0_52], %49 {strides = array<i32>} : memref<32x112xf32, #tpu.memory_space<vmem>>, vector<14x112xf32>,
    %cst_53 = arith.constant 0.000000e+00 : f32
    %51 = vector.broadcast %cst_53 : f32 to vector<14x112xf32>
    %c16 = arith.constant 16 : index
    %c0_54 = arith.constant 0 : index
    %52 = vector.load %arg1[%c16, %c0_54] : memref<32x64xf32, #tpu.memory_space<vmem>>, vector<14x56xf32>
    %c0_55 = arith.constant 0 : index
    %c0_56 = arith.constant 0 : index
    %c0_57 = arith.constant 0 : index
    %53 = vector.load %arg2[%c0_55, %c0_56, %c0_57] : memref<9x56x112xf32, #tpu.memory_space<vmem>>, vector<1x56x112xf32>
    %54 = vector.shape_cast %53 : vector<1x56x112xf32> to vector<56x112xf32>
    %cst_58 = arith.constant dense<0.000000e+00> : vector<14x112xf32>
    %55 = tpu.matmul %52, %54, %cst_58 {dimension_numbers = #tpu.dot_dimension_numbers<[1], [0], [0], [1], [0, 0, 1, 1], [], []>} : vector<14x56xf32>, vector<56x112xf32>, vector<14x112xf32> -> vector<14x112xf32>
    %56 = arith.addf %51, %55 : vector<14x112xf32>
    %c16_59 = arith.constant 16 : index
    %c4_60 = arith.constant 4 : index
    %57 = vector.load %arg1[%c16_59, %c4_60] : memref<32x64xf32, #tpu.memory_space<vmem>>, vector<14x56xf32>
    %c1_61 = arith.constant 1 : index
    %c0_62 = arith.constant 0 : index
    %c0_63 = arith.constant 0 : index
    %58 = vector.load %arg2[%c1_61, %c0_62, %c0_63] : memref<9x56x112xf32, #tpu.memory_space<vmem>>, vector<1x56x112xf32>
    %59 = vector.shape_cast %58 : vector<1x56x112xf32> to vector<56x112xf32>
    %cst_64 = arith.constant dense<0.000000e+00> : vector<14x112xf32>
    %60 = tpu.matmul %57, %59, %cst_64 {dimension_numbers = #tpu.dot_dimension_numbers<[1], [0], [0], [1], [0, 0, 1, 1], [], []>} : vector<14x56xf32>, vector<56x112xf32>, vector<14x112xf32> -> vector<14x112xf32>
    %61 = arith.addf %56, %60 : vector<14x112xf32>
    %c16_65 = arith.constant 16 : index
    %c8_66 = arith.constant 8 : index
    %62 = vector.load %arg1[%c16_65, %c8_66] : memref<32x64xf32, #tpu.memory_space<vmem>>, vector<14x56xf32>
    %c2_67 = arith.constant 2 : index
    %c0_68 = arith.constant 0 : index
    %c0_69 = arith.constant 0 : index
    %63 = vector.load %arg2[%c2_67, %c0_68, %c0_69] : memref<9x56x112xf32, #tpu.memory_space<vmem>>, vector<1x56x112xf32>
    %64 = vector.shape_cast %63 : vector<1x56x112xf32> to vector<56x112xf32>
    %cst_70 = arith.constant dense<0.000000e+00> : vector<14x112xf32>
    %65 = tpu.matmul %62, %64, %cst_70 {dimension_numbers = #tpu.dot_dimension_numbers<[1], [0], [0], [1], [0, 0, 1, 1], [], []>} : vector<14x56xf32>, vector<56x112xf32>, vector<14x112xf32> -> vector<14x112xf32>
    %66 = arith.addf %61, %65 : vector<14x112xf32>
    %c17 = arith.constant 17 : index
    %c0_71 = arith.constant 0 : index
    %67 = vector.load %arg1[%c17, %c0_71] : memref<32x64xf32, #tpu.memory_space<vmem>>, vector<14x56xf32>
    %c3_72 = arith.constant 3 : index
    %c0_73 = arith.constant 0 : index
    %c0_74 = arith.constant 0 : index
    %68 = vector.load %arg2[%c3_72, %c0_73, %c0_74] : memref<9x56x112xf32, #tpu.memory_space<vmem>>, vector<1x56x112xf32>
    %69 = vector.shape_cast %68 : vector<1x56x112xf32> to vector<56x112xf32>
    %cst_75 = arith.constant dense<0.000000e+00> : vector<14x112xf32>
    %70 = tpu.matmul %67, %69, %cst_75 {dimension_numbers = #tpu.dot_dimension_numbers<[1], [0], [0], [1], [0, 0, 1, 1], [], []>} : vector<14x56xf32>, vector<56x112xf32>, vector<14x112xf32> -> vector<14x112xf32>
    %71 = arith.addf %66, %70 : vector<14x112xf32>
    %c17_76 = arith.constant 17 : index
    %c4_77 = arith.constant 4 : index
    %72 = vector.load %arg1[%c17_76, %c4_77] : memref<32x64xf32, #tpu.memory_space<vmem>>, vector<14x56xf32>
    %c4_78 = arith.constant 4 : index
    %c0_79 = arith.constant 0 : index
    %c0_80 = arith.constant 0 : index
    %73 = vector.load %arg2[%c4_78, %c0_79, %c0_80] : memref<9x56x112xf32, #tpu.memory_space<vmem>>, vector<1x56x112xf32>
    %74 = vector.shape_cast %73 : vector<1x56x112xf32> to vector<56x112xf32>
    %cst_81 = arith.constant dense<0.000000e+00> : vector<14x112xf32>
    %75 = tpu.matmul %72, %74, %cst_81 {dimension_numbers = #tpu.dot_dimension_numbers<[1], [0], [0], [1], [0, 0, 1, 1], [], []>} : vector<14x56xf32>, vector<56x112xf32>, vector<14x112xf32> -> vector<14x112xf32>
    %76 = arith.addf %71, %75 : vector<14x112xf32>
    %c17_82 = arith.constant 17 : index
    %c8_83 = arith.constant 8 : index
    %77 = vector.load %arg1[%c17_82, %c8_83] : memref<32x64xf32, #tpu.memory_space<vmem>>, vector<14x56xf32>
    %c5_84 = arith.constant 5 : index
    %c0_85 = arith.constant 0 : index
    %c0_86 = arith.constant 0 : index
    %78 = vector.load %arg2[%c5_84, %c0_85, %c0_86] : memref<9x56x112xf32, #tpu.memory_space<vmem>>, vector<1x56x112xf32>
    %79 = vector.shape_cast %78 : vector<1x56x112xf32> to vector<56x112xf32>
    %cst_87 = arith.constant dense<0.000000e+00> : vector<14x112xf32>
    %80 = tpu.matmul %77, %79, %cst_87 {dimension_numbers = #tpu.dot_dimension_numbers<[1], [0], [0], [1], [0, 0, 1, 1], [], []>} : vector<14x56xf32>, vector<56x112xf32>, vector<14x112xf32> -> vector<14x112xf32>
    %81 = arith.addf %76, %80 : vector<14x112xf32>
    %c18 = arith.constant 18 : index
    %c0_88 = arith.constant 0 : index
    %82 = vector.load %arg1[%c18, %c0_88] : memref<32x64xf32, #tpu.memory_space<vmem>>, vector<14x56xf32>
    %c6_89 = arith.constant 6 : index
    %c0_90 = arith.constant 0 : index
    %c0_91 = arith.constant 0 : index
    %83 = vector.load %arg2[%c6_89, %c0_90, %c0_91] : memref<9x56x112xf32, #tpu.memory_space<vmem>>, vector<1x56x112xf32>
    %84 = vector.shape_cast %83 : vector<1x56x112xf32> to vector<56x112xf32>
    %cst_92 = arith.constant dense<0.000000e+00> : vector<14x112xf32>
    %85 = tpu.matmul %82, %84, %cst_92 {dimension_numbers = #tpu.dot_dimension_numbers<[1], [0], [0], [1], [0, 0, 1, 1], [], []>} : vector<14x56xf32>, vector<56x112xf32>, vector<14x112xf32> -> vector<14x112xf32>
    %86 = arith.addf %81, %85 : vector<14x112xf32>
    %c18_93 = arith.constant 18 : index
    %c4_94 = arith.constant 4 : index
    %87 = vector.load %arg1[%c18_93, %c4_94] : memref<32x64xf32, #tpu.memory_space<vmem>>, vector<14x56xf32>
    %c7_95 = arith.constant 7 : index
    %c0_96 = arith.constant 0 : index
    %c0_97 = arith.constant 0 : index
    %88 = vector.load %arg2[%c7_95, %c0_96, %c0_97] : memref<9x56x112xf32, #tpu.memory_space<vmem>>, vector<1x56x112xf32>
    %89 = vector.shape_cast %88 : vector<1x56x112xf32> to vector<56x112xf32>
    %cst_98 = arith.constant dense<0.000000e+00> : vector<14x112xf32>
    %90 = tpu.matmul %87, %89, %cst_98 {dimension_numbers = #tpu.dot_dimension_numbers<[1], [0], [0], [1], [0, 0, 1, 1], [], []>} : vector<14x56xf32>, vector<56x112xf32>, vector<14x112xf32> -> vector<14x112xf32>
    %91 = arith.addf %86, %90 : vector<14x112xf32>
    %c18_99 = arith.constant 18 : index
    %c8_100 = arith.constant 8 : index
    %92 = vector.load %arg1[%c18_99, %c8_100] : memref<32x64xf32, #tpu.memory_space<vmem>>, vector<14x56xf32>
    %c8_101 = arith.constant 8 : index
    %c0_102 = arith.constant 0 : index
    %c0_103 = arith.constant 0 : index
    %93 = vector.load %arg2[%c8_101, %c0_102, %c0_103] : memref<9x56x112xf32, #tpu.memory_space<vmem>>, vector<1x56x112xf32>
    %94 = vector.shape_cast %93 : vector<1x56x112xf32> to vector<56x112xf32>
    %cst_104 = arith.constant dense<0.000000e+00> : vector<14x112xf32>
    %95 = tpu.matmul %92, %94, %cst_104 {dimension_numbers = #tpu.dot_dimension_numbers<[1], [0], [0], [1], [0, 0, 1, 1], [], []>} : vector<14x56xf32>, vector<56x112xf32>, vector<14x112xf32> -> vector<14x112xf32>
    %96 = arith.addf %91, %95 : vector<14x112xf32>
    %c16_105 = arith.constant 16 : index
    %c0_106 = arith.constant 0 : index
    %97 = vector.load %arg12[%c16_105, %c0_106] : memref<32x112xf32, #tpu.memory_space<vmem>>, vector<14x112xf32>
    tpu.vector_store %arg12[%c16_105, %c0_106], %96 {strides = array<i32>} : memref<32x112xf32, #tpu.memory_space<vmem>>, vector<14x112xf32>,
    %c0_107 = arith.constant 0 : index
    %c0_108 = arith.constant 0 : index
    %98 = vector.load %arg12[%c0_107, %c0_108] : memref<32x112xf32, #tpu.memory_space<vmem>>, vector<32x112xf32>
    %cst_109 = arith.constant dense<0.000000e+00> : vector<112xf32>
    %99 = vector.multi_reduction <add>, %98, %cst_109 [0] : vector<32x112xf32> to vector<112xf32>
    %100 = vector.shape_cast %99 : vector<112xf32> to vector<1x112xf32>
    %101 = arith.mulf %98, %98 : vector<32x112xf32>
    %cst_110 = arith.constant dense<0.000000e+00> : vector<112xf32>
    %102 = vector.multi_reduction <add>, %101, %cst_110 [0] : vector<32x112xf32> to vector<112xf32>
    %103 = vector.shape_cast %102 : vector<112xf32> to vector<1x112xf32>
    %c0_111 = arith.constant 0 : index
    %c0_112 = arith.constant 0 : index
    %104 = vector.load %arg3[%c0_111, %c0_112] : memref<112x112xf32, #tpu.memory_space<vmem>>, vector<112x112xf32>
    %cst_113 = arith.constant dense<0.000000e+00> : vector<1x112xf32>
    %105 = tpu.matmul %100, %104, %cst_113 {dimension_numbers = #tpu.dot_dimension_numbers<[1], [0], [0], [1], [0, 0, 1, 1], [], []>} : vector<1x112xf32>, vector<112x112xf32>, vector<1x112xf32> -> vector<1x112xf32>
    %cst_114 = arith.constant 0.00255102036 : f32
    %106 = vector.broadcast %cst_114 : f32 to vector<1x112xf32>
    %107 = arith.mulf %105, %106 : vector<1x112xf32>
    %c0_115 = arith.constant 0 : index
    %c0_116 = arith.constant 0 : index
    %108 = vector.load %arg3[%c0_115, %c0_116] : memref<112x112xf32, #tpu.memory_space<vmem>>, vector<112x112xf32>
    %cst_117 = arith.constant dense<0.000000e+00> : vector<1x112xf32>
    %109 = tpu.matmul %103, %108, %cst_117 {dimension_numbers = #tpu.dot_dimension_numbers<[1], [0], [0], [1], [0, 0, 1, 1], [], []>} : vector<1x112xf32>, vector<112x112xf32>, vector<1x112xf32> -> vector<1x112xf32>
    %cst_118 = arith.constant 0.00255102036 : f32
    %110 = vector.broadcast %cst_118 : f32 to vector<1x112xf32>
    %111 = arith.mulf %109, %110 : vector<1x112xf32>
    %112 = arith.mulf %107, %107 : vector<1x112xf32>
    %113 = arith.subf %111, %112 : vector<1x112xf32>
    %c0_119 = arith.constant 0 : index
    %c0_120 = arith.constant 0 : index
    %114 = vector.load %arg4[%c0_119, %c0_120] : memref<1x112xf32, #tpu.memory_space<vmem>>, vector<1x112xf32>
    %cst_121 = arith.constant 9.99999974E-6 : f32
    %115 = vector.broadcast %cst_121 : f32 to vector<1x112xf32>
    %116 = arith.addf %113, %115 : vector<1x112xf32>
    %117 = math.rsqrt %116 : vector<1x112xf32>
    %118 = arith.mulf %114, %117 : vector<1x112xf32>
    %c0_122 = arith.constant 0 : index
    %c0_123 = arith.constant 0 : index
    %119 = vector.load %arg5[%c0_122, %c0_123] : memref<1x112xf32, #tpu.memory_space<vmem>>, vector<1x112xf32>
    %120 = arith.mulf %107, %118 : vector<1x112xf32>
    %121 = arith.subf %119, %120 : vector<1x112xf32>
    %122 = vector.broadcast %118 : vector<1x112xf32> to vector<32x112xf32>
    %123 = arith.mulf %98, %122 : vector<32x112xf32>
    %124 = vector.broadcast %121 : vector<1x112xf32> to vector<32x112xf32>
    %125 = arith.addf %123, %124 : vector<32x112xf32>
    %cst_124 = arith.constant 0.000000e+00 : f32
    %126 = vector.broadcast %cst_124 : f32 to vector<32x112xf32>
    %127 = arith.maximumf %125, %126 : vector<32x112xf32>
    %c0_125 = arith.constant 0 : index
    %c0_126 = arith.constant 0 : index
    %128 = vector.load %arg12[%c0_125, %c0_126] : memref<32x112xf32, #tpu.memory_space<vmem>>, vector<32x112xf32>
    tpu.vector_store %arg12[%c0_125, %c0_126], %127 {strides = array<i32>} : memref<32x112xf32, #tpu.memory_space<vmem>>, vector<32x112xf32>,
    %cst_127 = arith.constant 0.000000e+00 : f32
    %129 = vector.broadcast %cst_127 : f32 to vector<12x192xf32>
    %c0_128 = arith.constant 0 : index
    %c0_129 = arith.constant 0 : index
    %130 = vector.load %arg12[%c0_128, %c0_129] : memref<32x112xf32, #tpu.memory_space<vmem>>, vector<12x96xf32>
    %c0_130 = arith.constant 0 : index
    %c0_131 = arith.constant 0 : index
    %c0_132 = arith.constant 0 : index
    %131 = vector.load %arg6[%c0_130, %c0_131, %c0_132] : memref<9x96x192xf32, #tpu.memory_space<vmem>>, vector<1x96x192xf32>
    %132 = vector.shape_cast %131 : vector<1x96x192xf32> to vector<96x192xf32>
    %cst_133 = arith.constant dense<0.000000e+00> : vector<12x192xf32>
    %133 = tpu.matmul %130, %132, %cst_133 {dimension_numbers = #tpu.dot_dimension_numbers<[1], [0], [0], [1], [0, 0, 1, 1], [], []>} : vector<12x96xf32>, vector<96x192xf32>, vector<12x192xf32> -> vector<12x192xf32>
    %134 = arith.addf %129, %133 : vector<12x192xf32>
    %c0_134 = arith.constant 0 : index
    %c8_135 = arith.constant 8 : index
    %135 = vector.load %arg12[%c0_134, %c8_135] : memref<32x112xf32, #tpu.memory_space<vmem>>, vector<12x96xf32>
    %c1_136 = arith.constant 1 : index
    %c0_137 = arith.constant 0 : index
    %c0_138 = arith.constant 0 : index
    %136 = vector.load %arg6[%c1_136, %c0_137, %c0_138] : memref<9x96x192xf32, #tpu.memory_space<vmem>>, vector<1x96x192xf32>
    %137 = vector.shape_cast %136 : vector<1x96x192xf32> to vector<96x192xf32>
    %cst_139 = arith.constant dense<0.000000e+00> : vector<12x192xf32>
    %138 = tpu.matmul %135, %137, %cst_139 {dimension_numbers = #tpu.dot_dimension_numbers<[1], [0], [0], [1], [0, 0, 1, 1], [], []>} : vector<12x96xf32>, vector<96x192xf32>, vector<12x192xf32> -> vector<12x192xf32>
    %139 = arith.addf %134, %138 : vector<12x192xf32>
    %c0_140 = arith.constant 0 : index
    %c16_141 = arith.constant 16 : index
    %140 = vector.load %arg12[%c0_140, %c16_141] : memref<32x112xf32, #tpu.memory_space<vmem>>, vector<12x96xf32>
    %c2_142 = arith.constant 2 : index
    %c0_143 = arith.constant 0 : index
    %c0_144 = arith.constant 0 : index
    %141 = vector.load %arg6[%c2_142, %c0_143, %c0_144] : memref<9x96x192xf32, #tpu.memory_space<vmem>>, vector<1x96x192xf32>
    %142 = vector.shape_cast %141 : vector<1x96x192xf32> to vector<96x192xf32>
    %cst_145 = arith.constant dense<0.000000e+00> : vector<12x192xf32>
    %143 = tpu.matmul %140, %142, %cst_145 {dimension_numbers = #tpu.dot_dimension_numbers<[1], [0], [0], [1], [0, 0, 1, 1], [], []>} : vector<12x96xf32>, vector<96x192xf32>, vector<12x192xf32> -> vector<12x192xf32>
    %144 = arith.addf %139, %143 : vector<12x192xf32>
    %c1_146 = arith.constant 1 : index
    %c0_147 = arith.constant 0 : index
    %145 = vector.load %arg12[%c1_146, %c0_147] : memref<32x112xf32, #tpu.memory_space<vmem>>, vector<12x96xf32>
    %c3_148 = arith.constant 3 : index
    %c0_149 = arith.constant 0 : index
    %c0_150 = arith.constant 0 : index
    %146 = vector.load %arg6[%c3_148, %c0_149, %c0_150] : memref<9x96x192xf32, #tpu.memory_space<vmem>>, vector<1x96x192xf32>
    %147 = vector.shape_cast %146 : vector<1x96x192xf32> to vector<96x192xf32>
    %cst_151 = arith.constant dense<0.000000e+00> : vector<12x192xf32>
    %148 = tpu.matmul %145, %147, %cst_151 {dimension_numbers = #tpu.dot_dimension_numbers<[1], [0], [0], [1], [0, 0, 1, 1], [], []>} : vector<12x96xf32>, vector<96x192xf32>, vector<12x192xf32> -> vector<12x192xf32>
    %149 = arith.addf %144, %148 : vector<12x192xf32>
    %c1_152 = arith.constant 1 : index
    %c8_153 = arith.constant 8 : index
    %150 = vector.load %arg12[%c1_152, %c8_153] : memref<32x112xf32, #tpu.memory_space<vmem>>, vector<12x96xf32>
    %c4_154 = arith.constant 4 : index
    %c0_155 = arith.constant 0 : index
    %c0_156 = arith.constant 0 : index
    %151 = vector.load %arg6[%c4_154, %c0_155, %c0_156] : memref<9x96x192xf32, #tpu.memory_space<vmem>>, vector<1x96x192xf32>
    %152 = vector.shape_cast %151 : vector<1x96x192xf32> to vector<96x192xf32>
    %cst_157 = arith.constant dense<0.000000e+00> : vector<12x192xf32>
    %153 = tpu.matmul %150, %152, %cst_157 {dimension_numbers = #tpu.dot_dimension_numbers<[1], [0], [0], [1], [0, 0, 1, 1], [], []>} : vector<12x96xf32>, vector<96x192xf32>, vector<12x192xf32> -> vector<12x192xf32>
    %154 = arith.addf %149, %153 : vector<12x192xf32>
    %c1_158 = arith.constant 1 : index
    %c16_159 = arith.constant 16 : index
    %155 = vector.load %arg12[%c1_158, %c16_159] : memref<32x112xf32, #tpu.memory_space<vmem>>, vector<12x96xf32>
    %c5_160 = arith.constant 5 : index
    %c0_161 = arith.constant 0 : index
    %c0_162 = arith.constant 0 : index
    %156 = vector.load %arg6[%c5_160, %c0_161, %c0_162] : memref<9x96x192xf32, #tpu.memory_space<vmem>>, vector<1x96x192xf32>
    %157 = vector.shape_cast %156 : vector<1x96x192xf32> to vector<96x192xf32>
    %cst_163 = arith.constant dense<0.000000e+00> : vector<12x192xf32>
    %158 = tpu.matmul %155, %157, %cst_163 {dimension_numbers = #tpu.dot_dimension_numbers<[1], [0], [0], [1], [0, 0, 1, 1], [], []>} : vector<12x96xf32>, vector<96x192xf32>, vector<12x192xf32> -> vector<12x192xf32>
    %159 = arith.addf %154, %158 : vector<12x192xf32>
    %c2_164 = arith.constant 2 : index
    %c0_165 = arith.constant 0 : index
    %160 = vector.load %arg12[%c2_164, %c0_165] : memref<32x112xf32, #tpu.memory_space<vmem>>, vector<12x96xf32>
    %c6_166 = arith.constant 6 : index
    %c0_167 = arith.constant 0 : index
    %c0_168 = arith.constant 0 : index
    %161 = vector.load %arg6[%c6_166, %c0_167, %c0_168] : memref<9x96x192xf32, #tpu.memory_space<vmem>>, vector<1x96x192xf32>
    %162 = vector.shape_cast %161 : vector<1x96x192xf32> to vector<96x192xf32>
    %cst_169 = arith.constant dense<0.000000e+00> : vector<12x192xf32>
    %163 = tpu.matmul %160, %162, %cst_169 {dimension_numbers = #tpu.dot_dimension_numbers<[1], [0], [0], [1], [0, 0, 1, 1], [], []>} : vector<12x96xf32>, vector<96x192xf32>, vector<12x192xf32> -> vector<12x192xf32>
    %164 = arith.addf %159, %163 : vector<12x192xf32>
    %c2_170 = arith.constant 2 : index
    %c8_171 = arith.constant 8 : index
    %165 = vector.load %arg12[%c2_170, %c8_171] : memref<32x112xf32, #tpu.memory_space<vmem>>, vector<12x96xf32>
    %c7_172 = arith.constant 7 : index
    %c0_173 = arith.constant 0 : index
    %c0_174 = arith.constant 0 : index
    %166 = vector.load %arg6[%c7_172, %c0_173, %c0_174] : memref<9x96x192xf32, #tpu.memory_space<vmem>>, vector<1x96x192xf32>
    %167 = vector.shape_cast %166 : vector<1x96x192xf32> to vector<96x192xf32>
    %cst_175 = arith.constant dense<0.000000e+00> : vector<12x192xf32>
    %168 = tpu.matmul %165, %167, %cst_175 {dimension_numbers = #tpu.dot_dimension_numbers<[1], [0], [0], [1], [0, 0, 1, 1], [], []>} : vector<12x96xf32>, vector<96x192xf32>, vector<12x192xf32> -> vector<12x192xf32>
    %169 = arith.addf %164, %168 : vector<12x192xf32>
    %c2_176 = arith.constant 2 : index
    %c16_177 = arith.constant 16 : index
    %170 = vector.load %arg12[%c2_176, %c16_177] : memref<32x112xf32, #tpu.memory_space<vmem>>, vector<12x96xf32>
    %c8_178 = arith.constant 8 : index
    %c0_179 = arith.constant 0 : index
    %c0_180 = arith.constant 0 : index
    %171 = vector.load %arg6[%c8_178, %c0_179, %c0_180] : memref<9x96x192xf32, #tpu.memory_space<vmem>>, vector<1x96x192xf32>
    %172 = vector.shape_cast %171 : vector<1x96x192xf32> to vector<96x192xf32>
    %cst_181 = arith.constant dense<0.000000e+00> : vector<12x192xf32>
    %173 = tpu.matmul %170, %172, %cst_181 {dimension_numbers = #tpu.dot_dimension_numbers<[1], [0], [0], [1], [0, 0, 1, 1], [], []>} : vector<12x96xf32>, vector<96x192xf32>, vector<12x192xf32> -> vector<12x192xf32>
    %174 = arith.addf %169, %173 : vector<12x192xf32>
    %c0_182 = arith.constant 0 : index
    %c0_183 = arith.constant 0 : index
    %175 = vector.load %arg13[%c0_182, %c0_183] : memref<32x192xf32, #tpu.memory_space<vmem>>, vector<12x192xf32>
    tpu.vector_store %arg13[%c0_182, %c0_183], %174 {strides = array<i32>} : memref<32x192xf32, #tpu.memory_space<vmem>>, vector<12x192xf32>,
    %cst_184 = arith.constant 0.000000e+00 : f32
    %176 = vector.broadcast %cst_184 : f32 to vector<12x192xf32>
    %c16_185 = arith.constant 16 : index
    %c0_186 = arith.constant 0 : index
    %177 = vector.load %arg12[%c16_185, %c0_186] : memref<32x112xf32, #tpu.memory_space<vmem>>, vector<12x96xf32>
    %c0_187 = arith.constant 0 : index
    %c0_188 = arith.constant 0 : index
    %c0_189 = arith.constant 0 : index
    %178 = vector.load %arg6[%c0_187, %c0_188, %c0_189] : memref<9x96x192xf32, #tpu.memory_space<vmem>>, vector<1x96x192xf32>
    %179 = vector.shape_cast %178 : vector<1x96x192xf32> to vector<96x192xf32>
    %cst_190 = arith.constant dense<0.000000e+00> : vector<12x192xf32>
    %180 = tpu.matmul %177, %179, %cst_190 {dimension_numbers = #tpu.dot_dimension_numbers<[1], [0], [0], [1], [0, 0, 1, 1], [], []>} : vector<12x96xf32>, vector<96x192xf32>, vector<12x192xf32> -> vector<12x192xf32>
    %181 = arith.addf %176, %180 : vector<12x192xf32>
    %c16_191 = arith.constant 16 : index
    %c8_192 = arith.constant 8 : index
    %182 = vector.load %arg12[%c16_191, %c8_192] : memref<32x112xf32, #tpu.memory_space<vmem>>, vector<12x96xf32>
    %c1_193 = arith.constant 1 : index
    %c0_194 = arith.constant 0 : index
    %c0_195 = arith.constant 0 : index
    %183 = vector.load %arg6[%c1_193, %c0_194, %c0_195] : memref<9x96x192xf32, #tpu.memory_space<vmem>>, vector<1x96x192xf32>
    %184 = vector.shape_cast %183 : vector<1x96x192xf32> to vector<96x192xf32>
    %cst_196 = arith.constant dense<0.000000e+00> : vector<12x192xf32>
    %185 = tpu.matmul %182, %184, %cst_196 {dimension_numbers = #tpu.dot_dimension_numbers<[1], [0], [0], [1], [0, 0, 1, 1], [], []>} : vector<12x96xf32>, vector<96x192xf32>, vector<12x192xf32> -> vector<12x192xf32>
    %186 = arith.addf %181, %185 : vector<12x192xf32>
    %c16_197 = arith.constant 16 : index
    %c16_198 = arith.constant 16 : index
    %187 = vector.load %arg12[%c16_197, %c16_198] : memref<32x112xf32, #tpu.memory_space<vmem>>, vector<12x96xf32>
    %c2_199 = arith.constant 2 : index
    %c0_200 = arith.constant 0 : index
    %c0_201 = arith.constant 0 : index
    %188 = vector.load %arg6[%c2_199, %c0_200, %c0_201] : memref<9x96x192xf32, #tpu.memory_space<vmem>>, vector<1x96x192xf32>
    %189 = vector.shape_cast %188 : vector<1x96x192xf32> to vector<96x192xf32>
    %cst_202 = arith.constant dense<0.000000e+00> : vector<12x192xf32>
    %190 = tpu.matmul %187, %189, %cst_202 {dimension_numbers = #tpu.dot_dimension_numbers<[1], [0], [0], [1], [0, 0, 1, 1], [], []>} : vector<12x96xf32>, vector<96x192xf32>, vector<12x192xf32> -> vector<12x192xf32>
    %191 = arith.addf %186, %190 : vector<12x192xf32>
    %c17_203 = arith.constant 17 : index
    %c0_204 = arith.constant 0 : index
    %192 = vector.load %arg12[%c17_203, %c0_204] : memref<32x112xf32, #tpu.memory_space<vmem>>, vector<12x96xf32>
    %c3_205 = arith.constant 3 : index
    %c0_206 = arith.constant 0 : index
    %c0_207 = arith.constant 0 : index
    %193 = vector.load %arg6[%c3_205, %c0_206, %c0_207] : memref<9x96x192xf32, #tpu.memory_space<vmem>>, vector<1x96x192xf32>
    %194 = vector.shape_cast %193 : vector<1x96x192xf32> to vector<96x192xf32>
    %cst_208 = arith.constant dense<0.000000e+00> : vector<12x192xf32>
    %195 = tpu.matmul %192, %194, %cst_208 {dimension_numbers = #tpu.dot_dimension_numbers<[1], [0], [0], [1], [0, 0, 1, 1], [], []>} : vector<12x96xf32>, vector<96x192xf32>, vector<12x192xf32> -> vector<12x192xf32>
    %196 = arith.addf %191, %195 : vector<12x192xf32>
    %c17_209 = arith.constant 17 : index
    %c8_210 = arith.constant 8 : index
    %197 = vector.load %arg12[%c17_209, %c8_210] : memref<32x112xf32, #tpu.memory_space<vmem>>, vector<12x96xf32>
    %c4_211 = arith.constant 4 : index
    %c0_212 = arith.constant 0 : index
    %c0_213 = arith.constant 0 : index
    %198 = vector.load %arg6[%c4_211, %c0_212, %c0_213] : memref<9x96x192xf32, #tpu.memory_space<vmem>>, vector<1x96x192xf32>
    %199 = vector.shape_cast %198 : vector<1x96x192xf32> to vector<96x192xf32>
    %cst_214 = arith.constant dense<0.000000e+00> : vector<12x192xf32>
    %200 = tpu.matmul %197, %199, %cst_214 {dimension_numbers = #tpu.dot_dimension_numbers<[1], [0], [0], [1], [0, 0, 1, 1], [], []>} : vector<12x96xf32>, vector<96x192xf32>, vector<12x192xf32> -> vector<12x192xf32>
    %201 = arith.addf %196, %200 : vector<12x192xf32>
    %c17_215 = arith.constant 17 : index
    %c16_216 = arith.constant 16 : index
    %202 = vector.load %arg12[%c17_215, %c16_216] : memref<32x112xf32, #tpu.memory_space<vmem>>, vector<12x96xf32>
    %c5_217 = arith.constant 5 : index
    %c0_218 = arith.constant 0 : index
    %c0_219 = arith.constant 0 : index
    %203 = vector.load %arg6[%c5_217, %c0_218, %c0_219] : memref<9x96x192xf32, #tpu.memory_space<vmem>>, vector<1x96x192xf32>
    %204 = vector.shape_cast %203 : vector<1x96x192xf32> to vector<96x192xf32>
    %cst_220 = arith.constant dense<0.000000e+00> : vector<12x192xf32>
    %205 = tpu.matmul %202, %204, %cst_220 {dimension_numbers = #tpu.dot_dimension_numbers<[1], [0], [0], [1], [0, 0, 1, 1], [], []>} : vector<12x96xf32>, vector<96x192xf32>, vector<12x192xf32> -> vector<12x192xf32>
    %206 = arith.addf %201, %205 : vector<12x192xf32>
    %c18_221 = arith.constant 18 : index
    %c0_222 = arith.constant 0 : index
    %207 = vector.load %arg12[%c18_221, %c0_222] : memref<32x112xf32, #tpu.memory_space<vmem>>, vector<12x96xf32>
    %c6_223 = arith.constant 6 : index
    %c0_224 = arith.constant 0 : index
    %c0_225 = arith.constant 0 : index
    %208 = vector.load %arg6[%c6_223, %c0_224, %c0_225] : memref<9x96x192xf32, #tpu.memory_space<vmem>>, vector<1x96x192xf32>
    %209 = vector.shape_cast %208 : vector<1x96x192xf32> to vector<96x192xf32>
    %cst_226 = arith.constant dense<0.000000e+00> : vector<12x192xf32>
    %210 = tpu.matmul %207, %209, %cst_226 {dimension_numbers = #tpu.dot_dimension_numbers<[1], [0], [0], [1], [0, 0, 1, 1], [], []>} : vector<12x96xf32>, vector<96x192xf32>, vector<12x192xf32> -> vector<12x192xf32>
    %211 = arith.addf %206, %210 : vector<12x192xf32>
    %c18_227 = arith.constant 18 : index
    %c8_228 = arith.constant 8 : index
    %212 = vector.load %arg12[%c18_227, %c8_228] : memref<32x112xf32, #tpu.memory_space<vmem>>, vector<12x96xf32>
    %c7_229 = arith.constant 7 : index
    %c0_230 = arith.constant 0 : index
    %c0_231 = arith.constant 0 : index
    %213 = vector.load %arg6[%c7_229, %c0_230, %c0_231] : memref<9x96x192xf32, #tpu.memory_space<vmem>>, vector<1x96x192xf32>
    %214 = vector.shape_cast %213 : vector<1x96x192xf32> to vector<96x192xf32>
    %cst_232 = arith.constant dense<0.000000e+00> : vector<12x192xf32>
    %215 = tpu.matmul %212, %214, %cst_232 {dimension_numbers = #tpu.dot_dimension_numbers<[1], [0], [0], [1], [0, 0, 1, 1], [], []>} : vector<12x96xf32>, vector<96x192xf32>, vector<12x192xf32> -> vector<12x192xf32>
    %216 = arith.addf %211, %215 : vector<12x192xf32>
    %c18_233 = arith.constant 18 : index
    %c16_234 = arith.constant 16 : index
    %217 = vector.load %arg12[%c18_233, %c16_234] : memref<32x112xf32, #tpu.memory_space<vmem>>, vector<12x96xf32>
    %c8_235 = arith.constant 8 : index
    %c0_236 = arith.constant 0 : index
    %c0_237 = arith.constant 0 : index
    %218 = vector.load %arg6[%c8_235, %c0_236, %c0_237] : memref<9x96x192xf32, #tpu.memory_space<vmem>>, vector<1x96x192xf32>
    %219 = vector.shape_cast %218 : vector<1x96x192xf32> to vector<96x192xf32>
    %cst_238 = arith.constant dense<0.000000e+00> : vector<12x192xf32>
    %220 = tpu.matmul %217, %219, %cst_238 {dimension_numbers = #tpu.dot_dimension_numbers<[1], [0], [0], [1], [0, 0, 1, 1], [], []>} : vector<12x96xf32>, vector<96x192xf32>, vector<12x192xf32> -> vector<12x192xf32>
    %221 = arith.addf %216, %220 : vector<12x192xf32>
    %c16_239 = arith.constant 16 : index
    %c0_240 = arith.constant 0 : index
    %222 = vector.load %arg13[%c16_239, %c0_240] : memref<32x192xf32, #tpu.memory_space<vmem>>, vector<12x192xf32>
    tpu.vector_store %arg13[%c16_239, %c0_240], %221 {strides = array<i32>} : memref<32x192xf32, #tpu.memory_space<vmem>>, vector<12x192xf32>,
    %c0_241 = arith.constant 0 : index
    %c0_242 = arith.constant 0 : index
    %223 = vector.load %arg13[%c0_241, %c0_242] : memref<32x192xf32, #tpu.memory_space<vmem>>, vector<32x192xf32>
    %cst_243 = arith.constant dense<0.000000e+00> : vector<192xf32>
    %224 = vector.multi_reduction <add>, %223, %cst_243 [0] : vector<32x192xf32> to vector<192xf32>
    %225 = vector.shape_cast %224 : vector<192xf32> to vector<1x192xf32>
    %226 = arith.mulf %223, %223 : vector<32x192xf32>
    %cst_244 = arith.constant dense<0.000000e+00> : vector<192xf32>
    %227 = vector.multi_reduction <add>, %226, %cst_244 [0] : vector<32x192xf32> to vector<192xf32>
    %228 = vector.shape_cast %227 : vector<192xf32> to vector<1x192xf32>
    %c0_245 = arith.constant 0 : index
    %c0_246 = arith.constant 0 : index
    %229 = vector.load %arg7[%c0_245, %c0_246] : memref<192x192xf32, #tpu.memory_space<vmem>>, vector<192x192xf32>
    %cst_247 = arith.constant dense<0.000000e+00> : vector<1x192xf32>
    %230 = tpu.matmul %225, %229, %cst_247 {dimension_numbers = #tpu.dot_dimension_numbers<[1], [0], [0], [1], [0, 0, 1, 1], [], []>} : vector<1x192xf32>, vector<192x192xf32>, vector<1x192xf32> -> vector<1x192xf32>
    %cst_248 = arith.constant 0.00347222225 : f32
    %231 = vector.broadcast %cst_248 : f32 to vector<1x192xf32>
    %232 = arith.mulf %230, %231 : vector<1x192xf32>
    %c0_249 = arith.constant 0 : index
    %c0_250 = arith.constant 0 : index
    %233 = vector.load %arg7[%c0_249, %c0_250] : memref<192x192xf32, #tpu.memory_space<vmem>>, vector<192x192xf32>
    %cst_251 = arith.constant dense<0.000000e+00> : vector<1x192xf32>
    %234 = tpu.matmul %228, %233, %cst_251 {dimension_numbers = #tpu.dot_dimension_numbers<[1], [0], [0], [1], [0, 0, 1, 1], [], []>} : vector<1x192xf32>, vector<192x192xf32>, vector<1x192xf32> -> vector<1x192xf32>
    %cst_252 = arith.constant 0.00347222225 : f32
    %235 = vector.broadcast %cst_252 : f32 to vector<1x192xf32>
    %236 = arith.mulf %234, %235 : vector<1x192xf32>
    %237 = arith.mulf %232, %232 : vector<1x192xf32>
    %238 = arith.subf %236, %237 : vector<1x192xf32>
    %c0_253 = arith.constant 0 : index
    %c0_254 = arith.constant 0 : index
    %239 = vector.load %arg8[%c0_253, %c0_254] : memref<1x192xf32, #tpu.memory_space<vmem>>, vector<1x192xf32>
    %cst_255 = arith.constant 9.99999974E-6 : f32
    %240 = vector.broadcast %cst_255 : f32 to vector<1x192xf32>
    %241 = arith.addf %238, %240 : vector<1x192xf32>
    %242 = math.rsqrt %241 : vector<1x192xf32>
    %243 = arith.mulf %239, %242 : vector<1x192xf32>
    %c0_256 = arith.constant 0 : index
    %c0_257 = arith.constant 0 : index
    %244 = vector.load %arg9[%c0_256, %c0_257] : memref<1x192xf32, #tpu.memory_space<vmem>>, vector<1x192xf32>
    %245 = arith.mulf %232, %243 : vector<1x192xf32>
    %246 = arith.subf %244, %245 : vector<1x192xf32>
    %247 = vector.broadcast %243 : vector<1x192xf32> to vector<32x192xf32>
    %248 = arith.mulf %223, %247 : vector<32x192xf32>
    %249 = vector.broadcast %246 : vector<1x192xf32> to vector<32x192xf32>
    %250 = arith.addf %248, %249 : vector<32x192xf32>
    %cst_258 = arith.constant 0.000000e+00 : f32
    %251 = vector.broadcast %cst_258 : f32 to vector<32x192xf32>
    %252 = arith.maximumf %250, %251 : vector<32x192xf32>
    %c0_259 = arith.constant 0 : index
    %c0_260 = arith.constant 0 : index
    %253 = vector.load %arg13[%c0_259, %c0_260] : memref<32x192xf32, #tpu.memory_space<vmem>>, vector<32x192xf32>
    tpu.vector_store %arg13[%c0_259, %c0_260], %252 {strides = array<i32>} : memref<32x192xf32, #tpu.memory_space<vmem>>, vector<32x192xf32>,
    %c0_261 = arith.constant 0 : index
    %c0_262 = arith.constant 0 : index
    %254 = vector.load %arg13[%c0_261, %c0_262] : memref<32x192xf32, #tpu.memory_space<vmem>>, vector<12x192xf32>
    %cst_263 = arith.constant 0.000000e+00 : f32
    %255 = vector.broadcast %cst_263 : f32 to vector<1x32xf32>
    %256 = vector.extract_strided_slice %254 {offsets = [0, 0], sizes = [1, 192], strides = [1, 1]} : vector<12x192xf32> to vector<1x192xf32>
    %c0_264 = arith.constant 0 : index
    %c0_265 = arith.constant 0 : index
    %c0_266 = arith.constant 0 : index
    %257 = vector.load %arg10[%c0_264, %c0_265, %c0_266] : memref<12x192x32xf32, #tpu.memory_space<vmem>>, vector<1x192x32xf32>
    %258 = vector.shape_cast %257 : vector<1x192x32xf32> to vector<192x32xf32>
    %cst_267 = arith.constant dense<0.000000e+00> : vector<1x32xf32>
    %259 = tpu.matmul %256, %258, %cst_267 {dimension_numbers = #tpu.dot_dimension_numbers<[1], [0], [0], [1], [0, 0, 1, 1], [], []>} : vector<1x192xf32>, vector<192x32xf32>, vector<1x32xf32> -> vector<1x32xf32>
    %260 = arith.addf %255, %259 : vector<1x32xf32>
    %261 = vector.extract_strided_slice %254 {offsets = [1, 0], sizes = [1, 192], strides = [1, 1]} : vector<12x192xf32> to vector<1x192xf32>
    %c1_268 = arith.constant 1 : index
    %c0_269 = arith.constant 0 : index
    %c0_270 = arith.constant 0 : index
    %262 = vector.load %arg10[%c1_268, %c0_269, %c0_270] : memref<12x192x32xf32, #tpu.memory_space<vmem>>, vector<1x192x32xf32>
    %263 = vector.shape_cast %262 : vector<1x192x32xf32> to vector<192x32xf32>
    %cst_271 = arith.constant dense<0.000000e+00> : vector<1x32xf32>
    %264 = tpu.matmul %261, %263, %cst_271 {dimension_numbers = #tpu.dot_dimension_numbers<[1], [0], [0], [1], [0, 0, 1, 1], [], []>} : vector<1x192xf32>, vector<192x32xf32>, vector<1x32xf32> -> vector<1x32xf32>
    %265 = arith.addf %260, %264 : vector<1x32xf32>
    %266 = vector.extract_strided_slice %254 {offsets = [2, 0], sizes = [1, 192], strides = [1, 1]} : vector<12x192xf32> to vector<1x192xf32>
    %c2_272 = arith.constant 2 : index
    %c0_273 = arith.constant 0 : index
    %c0_274 = arith.constant 0 : index
    %267 = vector.load %arg10[%c2_272, %c0_273, %c0_274] : memref<12x192x32xf32, #tpu.memory_space<vmem>>, vector<1x192x32xf32>
    %268 = vector.shape_cast %267 : vector<1x192x32xf32> to vector<192x32xf32>
    %cst_275 = arith.constant dense<0.000000e+00> : vector<1x32xf32>
    %269 = tpu.matmul %266, %268, %cst_275 {dimension_numbers = #tpu.dot_dimension_numbers<[1], [0], [0], [1], [0, 0, 1, 1], [], []>} : vector<1x192xf32>, vector<192x32xf32>, vector<1x32xf32> -> vector<1x32xf32>
    %270 = arith.addf %265, %269 : vector<1x32xf32>
    %271 = vector.extract_strided_slice %254 {offsets = [3, 0], sizes = [1, 192], strides = [1, 1]} : vector<12x192xf32> to vector<1x192xf32>
    %c3_276 = arith.constant 3 : index
    %c0_277 = arith.constant 0 : index
    %c0_278 = arith.constant 0 : index
    %272 = vector.load %arg10[%c3_276, %c0_277, %c0_278] : memref<12x192x32xf32, #tpu.memory_space<vmem>>, vector<1x192x32xf32>
    %273 = vector.shape_cast %272 : vector<1x192x32xf32> to vector<192x32xf32>
    %cst_279 = arith.constant dense<0.000000e+00> : vector<1x32xf32>
    %274 = tpu.matmul %271, %273, %cst_279 {dimension_numbers = #tpu.dot_dimension_numbers<[1], [0], [0], [1], [0, 0, 1, 1], [], []>} : vector<1x192xf32>, vector<192x32xf32>, vector<1x32xf32> -> vector<1x32xf32>
    %275 = arith.addf %270, %274 : vector<1x32xf32>
    %276 = vector.extract_strided_slice %254 {offsets = [4, 0], sizes = [1, 192], strides = [1, 1]} : vector<12x192xf32> to vector<1x192xf32>
    %c4_280 = arith.constant 4 : index
    %c0_281 = arith.constant 0 : index
    %c0_282 = arith.constant 0 : index
    %277 = vector.load %arg10[%c4_280, %c0_281, %c0_282] : memref<12x192x32xf32, #tpu.memory_space<vmem>>, vector<1x192x32xf32>
    %278 = vector.shape_cast %277 : vector<1x192x32xf32> to vector<192x32xf32>
    %cst_283 = arith.constant dense<0.000000e+00> : vector<1x32xf32>
    %279 = tpu.matmul %276, %278, %cst_283 {dimension_numbers = #tpu.dot_dimension_numbers<[1], [0], [0], [1], [0, 0, 1, 1], [], []>} : vector<1x192xf32>, vector<192x32xf32>, vector<1x32xf32> -> vector<1x32xf32>
    %280 = arith.addf %275, %279 : vector<1x32xf32>
    %281 = vector.extract_strided_slice %254 {offsets = [5, 0], sizes = [1, 192], strides = [1, 1]} : vector<12x192xf32> to vector<1x192xf32>
    %c5_284 = arith.constant 5 : index
    %c0_285 = arith.constant 0 : index
    %c0_286 = arith.constant 0 : index
    %282 = vector.load %arg10[%c5_284, %c0_285, %c0_286] : memref<12x192x32xf32, #tpu.memory_space<vmem>>, vector<1x192x32xf32>
    %283 = vector.shape_cast %282 : vector<1x192x32xf32> to vector<192x32xf32>
    %cst_287 = arith.constant dense<0.000000e+00> : vector<1x32xf32>
    %284 = tpu.matmul %281, %283, %cst_287 {dimension_numbers = #tpu.dot_dimension_numbers<[1], [0], [0], [1], [0, 0, 1, 1], [], []>} : vector<1x192xf32>, vector<192x32xf32>, vector<1x32xf32> -> vector<1x32xf32>
    %285 = arith.addf %280, %284 : vector<1x32xf32>
    %286 = vector.extract_strided_slice %254 {offsets = [6, 0], sizes = [1, 192], strides = [1, 1]} : vector<12x192xf32> to vector<1x192xf32>
    %c6_288 = arith.constant 6 : index
    %c0_289 = arith.constant 0 : index
    %c0_290 = arith.constant 0 : index
    %287 = vector.load %arg10[%c6_288, %c0_289, %c0_290] : memref<12x192x32xf32, #tpu.memory_space<vmem>>, vector<1x192x32xf32>
    %288 = vector.shape_cast %287 : vector<1x192x32xf32> to vector<192x32xf32>
    %cst_291 = arith.constant dense<0.000000e+00> : vector<1x32xf32>
    %289 = tpu.matmul %286, %288, %cst_291 {dimension_numbers = #tpu.dot_dimension_numbers<[1], [0], [0], [1], [0, 0, 1, 1], [], []>} : vector<1x192xf32>, vector<192x32xf32>, vector<1x32xf32> -> vector<1x32xf32>
    %290 = arith.addf %285, %289 : vector<1x32xf32>
    %291 = vector.extract_strided_slice %254 {offsets = [7, 0], sizes = [1, 192], strides = [1, 1]} : vector<12x192xf32> to vector<1x192xf32>
    %c7_292 = arith.constant 7 : index
    %c0_293 = arith.constant 0 : index
    %c0_294 = arith.constant 0 : index
    %292 = vector.load %arg10[%c7_292, %c0_293, %c0_294] : memref<12x192x32xf32, #tpu.memory_space<vmem>>, vector<1x192x32xf32>
    %293 = vector.shape_cast %292 : vector<1x192x32xf32> to vector<192x32xf32>
    %cst_295 = arith.constant dense<0.000000e+00> : vector<1x32xf32>
    %294 = tpu.matmul %291, %293, %cst_295 {dimension_numbers = #tpu.dot_dimension_numbers<[1], [0], [0], [1], [0, 0, 1, 1], [], []>} : vector<1x192xf32>, vector<192x32xf32>, vector<1x32xf32> -> vector<1x32xf32>
    %295 = arith.addf %290, %294 : vector<1x32xf32>
    %296 = vector.extract_strided_slice %254 {offsets = [8, 0], sizes = [1, 192], strides = [1, 1]} : vector<12x192xf32> to vector<1x192xf32>
    %c8_296 = arith.constant 8 : index
    %c0_297 = arith.constant 0 : index
    %c0_298 = arith.constant 0 : index
    %297 = vector.load %arg10[%c8_296, %c0_297, %c0_298] : memref<12x192x32xf32, #tpu.memory_space<vmem>>, vector<1x192x32xf32>
    %298 = vector.shape_cast %297 : vector<1x192x32xf32> to vector<192x32xf32>
    %cst_299 = arith.constant dense<0.000000e+00> : vector<1x32xf32>
    %299 = tpu.matmul %296, %298, %cst_299 {dimension_numbers = #tpu.dot_dimension_numbers<[1], [0], [0], [1], [0, 0, 1, 1], [], []>} : vector<1x192xf32>, vector<192x32xf32>, vector<1x32xf32> -> vector<1x32xf32>
    %300 = arith.addf %295, %299 : vector<1x32xf32>
    %301 = vector.extract_strided_slice %254 {offsets = [9, 0], sizes = [1, 192], strides = [1, 1]} : vector<12x192xf32> to vector<1x192xf32>
    %c9 = arith.constant 9 : index
    %c0_300 = arith.constant 0 : index
    %c0_301 = arith.constant 0 : index
    %302 = vector.load %arg10[%c9, %c0_300, %c0_301] : memref<12x192x32xf32, #tpu.memory_space<vmem>>, vector<1x192x32xf32>
    %303 = vector.shape_cast %302 : vector<1x192x32xf32> to vector<192x32xf32>
    %cst_302 = arith.constant dense<0.000000e+00> : vector<1x32xf32>
    %304 = tpu.matmul %301, %303, %cst_302 {dimension_numbers = #tpu.dot_dimension_numbers<[1], [0], [0], [1], [0, 0, 1, 1], [], []>} : vector<1x192xf32>, vector<192x32xf32>, vector<1x32xf32> -> vector<1x32xf32>
    %305 = arith.addf %300, %304 : vector<1x32xf32>
    %306 = vector.extract_strided_slice %254 {offsets = [10, 0], sizes = [1, 192], strides = [1, 1]} : vector<12x192xf32> to vector<1x192xf32>
    %c10 = arith.constant 10 : index
    %c0_303 = arith.constant 0 : index
    %c0_304 = arith.constant 0 : index
    %307 = vector.load %arg10[%c10, %c0_303, %c0_304] : memref<12x192x32xf32, #tpu.memory_space<vmem>>, vector<1x192x32xf32>
    %308 = vector.shape_cast %307 : vector<1x192x32xf32> to vector<192x32xf32>
    %cst_305 = arith.constant dense<0.000000e+00> : vector<1x32xf32>
    %309 = tpu.matmul %306, %308, %cst_305 {dimension_numbers = #tpu.dot_dimension_numbers<[1], [0], [0], [1], [0, 0, 1, 1], [], []>} : vector<1x192xf32>, vector<192x32xf32>, vector<1x32xf32> -> vector<1x32xf32>
    %310 = arith.addf %305, %309 : vector<1x32xf32>
    %311 = vector.extract_strided_slice %254 {offsets = [11, 0], sizes = [1, 192], strides = [1, 1]} : vector<12x192xf32> to vector<1x192xf32>
    %c11 = arith.constant 11 : index
    %c0_306 = arith.constant 0 : index
    %c0_307 = arith.constant 0 : index
    %312 = vector.load %arg10[%c11, %c0_306, %c0_307] : memref<12x192x32xf32, #tpu.memory_space<vmem>>, vector<1x192x32xf32>
    %313 = vector.shape_cast %312 : vector<1x192x32xf32> to vector<192x32xf32>
    %cst_308 = arith.constant dense<0.000000e+00> : vector<1x32xf32>
    %314 = tpu.matmul %311, %313, %cst_308 {dimension_numbers = #tpu.dot_dimension_numbers<[1], [0], [0], [1], [0, 0, 1, 1], [], []>} : vector<1x192xf32>, vector<192x32xf32>, vector<1x32xf32> -> vector<1x32xf32>
    %315 = arith.addf %310, %314 : vector<1x32xf32>
    %316 = arith.mulf %315, %315 : vector<1x32xf32>
    %cst_309 = arith.constant dense<0.000000e+00> : vector<1xf32>
    %317 = vector.multi_reduction <add>, %316, %cst_309 [1] : vector<1x32xf32> to vector<1xf32>
    %318 = vector.shape_cast %317 : vector<1xf32> to vector<1x1xf32>
    %cst_310 = arith.constant 1.000000e-24 : f32
    %319 = vector.broadcast %cst_310 : f32 to vector<1x1xf32>
    %320 = arith.maximumf %318, %319 : vector<1x1xf32>
    %321 = math.rsqrt %320 : vector<1x1xf32>
    %322 = vector.broadcast %321 : vector<1x1xf32> to vector<1x32xf32>
    %323 = arith.mulf %315, %322 : vector<1x32xf32>
    %c0_311 = arith.constant 0 : index
    %c0_312 = arith.constant 0 : index
    %324 = vector.load %arg11[%c0_311, %c0_312] : memref<2x32xf32, #tpu.memory_space<vmem>>, vector<1x32xf32>
    tpu.vector_store %arg11[%c0_311, %c0_312], %323 {strides = array<i32>} : memref<2x32xf32, #tpu.memory_space<vmem>>, vector<1x32xf32>,
    %c16_313 = arith.constant 16 : index
    %c0_314 = arith.constant 0 : index
    %325 = vector.load %arg13[%c16_313, %c0_314] : memref<32x192xf32, #tpu.memory_space<vmem>>, vector<12x192xf32>
    %cst_315 = arith.constant 0.000000e+00 : f32
    %326 = vector.broadcast %cst_315 : f32 to vector<1x32xf32>
    %327 = vector.extract_strided_slice %325 {offsets = [0, 0], sizes = [1, 192], strides = [1, 1]} : vector<12x192xf32> to vector<1x192xf32>
    %c0_316 = arith.constant 0 : index
    %c0_317 = arith.constant 0 : index
    %c0_318 = arith.constant 0 : index
    %328 = vector.load %arg10[%c0_316, %c0_317, %c0_318] : memref<12x192x32xf32, #tpu.memory_space<vmem>>, vector<1x192x32xf32>
    %329 = vector.shape_cast %328 : vector<1x192x32xf32> to vector<192x32xf32>
    %cst_319 = arith.constant dense<0.000000e+00> : vector<1x32xf32>
    %330 = tpu.matmul %327, %329, %cst_319 {dimension_numbers = #tpu.dot_dimension_numbers<[1], [0], [0], [1], [0, 0, 1, 1], [], []>} : vector<1x192xf32>, vector<192x32xf32>, vector<1x32xf32> -> vector<1x32xf32>
    %331 = arith.addf %326, %330 : vector<1x32xf32>
    %332 = vector.extract_strided_slice %325 {offsets = [1, 0], sizes = [1, 192], strides = [1, 1]} : vector<12x192xf32> to vector<1x192xf32>
    %c1_320 = arith.constant 1 : index
    %c0_321 = arith.constant 0 : index
    %c0_322 = arith.constant 0 : index
    %333 = vector.load %arg10[%c1_320, %c0_321, %c0_322] : memref<12x192x32xf32, #tpu.memory_space<vmem>>, vector<1x192x32xf32>
    %334 = vector.shape_cast %333 : vector<1x192x32xf32> to vector<192x32xf32>
    %cst_323 = arith.constant dense<0.000000e+00> : vector<1x32xf32>
    %335 = tpu.matmul %332, %334, %cst_323 {dimension_numbers = #tpu.dot_dimension_numbers<[1], [0], [0], [1], [0, 0, 1, 1], [], []>} : vector<1x192xf32>, vector<192x32xf32>, vector<1x32xf32> -> vector<1x32xf32>
    %336 = arith.addf %331, %335 : vector<1x32xf32>
    %337 = vector.extract_strided_slice %325 {offsets = [2, 0], sizes = [1, 192], strides = [1, 1]} : vector<12x192xf32> to vector<1x192xf32>
    %c2_324 = arith.constant 2 : index
    %c0_325 = arith.constant 0 : index
    %c0_326 = arith.constant 0 : index
    %338 = vector.load %arg10[%c2_324, %c0_325, %c0_326] : memref<12x192x32xf32, #tpu.memory_space<vmem>>, vector<1x192x32xf32>
    %339 = vector.shape_cast %338 : vector<1x192x32xf32> to vector<192x32xf32>
    %cst_327 = arith.constant dense<0.000000e+00> : vector<1x32xf32>
    %340 = tpu.matmul %337, %339, %cst_327 {dimension_numbers = #tpu.dot_dimension_numbers<[1], [0], [0], [1], [0, 0, 1, 1], [], []>} : vector<1x192xf32>, vector<192x32xf32>, vector<1x32xf32> -> vector<1x32xf32>
    %341 = arith.addf %336, %340 : vector<1x32xf32>
    %342 = vector.extract_strided_slice %325 {offsets = [3, 0], sizes = [1, 192], strides = [1, 1]} : vector<12x192xf32> to vector<1x192xf32>
    %c3_328 = arith.constant 3 : index
    %c0_329 = arith.constant 0 : index
    %c0_330 = arith.constant 0 : index
    %343 = vector.load %arg10[%c3_328, %c0_329, %c0_330] : memref<12x192x32xf32, #tpu.memory_space<vmem>>, vector<1x192x32xf32>
    %344 = vector.shape_cast %343 : vector<1x192x32xf32> to vector<192x32xf32>
    %cst_331 = arith.constant dense<0.000000e+00> : vector<1x32xf32>
    %345 = tpu.matmul %342, %344, %cst_331 {dimension_numbers = #tpu.dot_dimension_numbers<[1], [0], [0], [1], [0, 0, 1, 1], [], []>} : vector<1x192xf32>, vector<192x32xf32>, vector<1x32xf32> -> vector<1x32xf32>
    %346 = arith.addf %341, %345 : vector<1x32xf32>
    %347 = vector.extract_strided_slice %325 {offsets = [4, 0], sizes = [1, 192], strides = [1, 1]} : vector<12x192xf32> to vector<1x192xf32>
    %c4_332 = arith.constant 4 : index
    %c0_333 = arith.constant 0 : index
    %c0_334 = arith.constant 0 : index
    %348 = vector.load %arg10[%c4_332, %c0_333, %c0_334] : memref<12x192x32xf32, #tpu.memory_space<vmem>>, vector<1x192x32xf32>
    %349 = vector.shape_cast %348 : vector<1x192x32xf32> to vector<192x32xf32>
    %cst_335 = arith.constant dense<0.000000e+00> : vector<1x32xf32>
    %350 = tpu.matmul %347, %349, %cst_335 {dimension_numbers = #tpu.dot_dimension_numbers<[1], [0], [0], [1], [0, 0, 1, 1], [], []>} : vector<1x192xf32>, vector<192x32xf32>, vector<1x32xf32> -> vector<1x32xf32>
    %351 = arith.addf %346, %350 : vector<1x32xf32>
    %352 = vector.extract_strided_slice %325 {offsets = [5, 0], sizes = [1, 192], strides = [1, 1]} : vector<12x192xf32> to vector<1x192xf32>
    %c5_336 = arith.constant 5 : index
    %c0_337 = arith.constant 0 : index
    %c0_338 = arith.constant 0 : index
    %353 = vector.load %arg10[%c5_336, %c0_337, %c0_338] : memref<12x192x32xf32, #tpu.memory_space<vmem>>, vector<1x192x32xf32>
    %354 = vector.shape_cast %353 : vector<1x192x32xf32> to vector<192x32xf32>
    %cst_339 = arith.constant dense<0.000000e+00> : vector<1x32xf32>
    %355 = tpu.matmul %352, %354, %cst_339 {dimension_numbers = #tpu.dot_dimension_numbers<[1], [0], [0], [1], [0, 0, 1, 1], [], []>} : vector<1x192xf32>, vector<192x32xf32>, vector<1x32xf32> -> vector<1x32xf32>
    %356 = arith.addf %351, %355 : vector<1x32xf32>
    %357 = vector.extract_strided_slice %325 {offsets = [6, 0], sizes = [1, 192], strides = [1, 1]} : vector<12x192xf32> to vector<1x192xf32>
    %c6_340 = arith.constant 6 : index
    %c0_341 = arith.constant 0 : index
    %c0_342 = arith.constant 0 : index
    %358 = vector.load %arg10[%c6_340, %c0_341, %c0_342] : memref<12x192x32xf32, #tpu.memory_space<vmem>>, vector<1x192x32xf32>
    %359 = vector.shape_cast %358 : vector<1x192x32xf32> to vector<192x32xf32>
    %cst_343 = arith.constant dense<0.000000e+00> : vector<1x32xf32>
    %360 = tpu.matmul %357, %359, %cst_343 {dimension_numbers = #tpu.dot_dimension_numbers<[1], [0], [0], [1], [0, 0, 1, 1], [], []>} : vector<1x192xf32>, vector<192x32xf32>, vector<1x32xf32> -> vector<1x32xf32>
    %361 = arith.addf %356, %360 : vector<1x32xf32>
    %362 = vector.extract_strided_slice %325 {offsets = [7, 0], sizes = [1, 192], strides = [1, 1]} : vector<12x192xf32> to vector<1x192xf32>
    %c7_344 = arith.constant 7 : index
    %c0_345 = arith.constant 0 : index
    %c0_346 = arith.constant 0 : index
    %363 = vector.load %arg10[%c7_344, %c0_345, %c0_346] : memref<12x192x32xf32, #tpu.memory_space<vmem>>, vector<1x192x32xf32>
    %364 = vector.shape_cast %363 : vector<1x192x32xf32> to vector<192x32xf32>
    %cst_347 = arith.constant dense<0.000000e+00> : vector<1x32xf32>
    %365 = tpu.matmul %362, %364, %cst_347 {dimension_numbers = #tpu.dot_dimension_numbers<[1], [0], [0], [1], [0, 0, 1, 1], [], []>} : vector<1x192xf32>, vector<192x32xf32>, vector<1x32xf32> -> vector<1x32xf32>
    %366 = arith.addf %361, %365 : vector<1x32xf32>
    %367 = vector.extract_strided_slice %325 {offsets = [8, 0], sizes = [1, 192], strides = [1, 1]} : vector<12x192xf32> to vector<1x192xf32>
    %c8_348 = arith.constant 8 : index
    %c0_349 = arith.constant 0 : index
    %c0_350 = arith.constant 0 : index
    %368 = vector.load %arg10[%c8_348, %c0_349, %c0_350] : memref<12x192x32xf32, #tpu.memory_space<vmem>>, vector<1x192x32xf32>
    %369 = vector.shape_cast %368 : vector<1x192x32xf32> to vector<192x32xf32>
    %cst_351 = arith.constant dense<0.000000e+00> : vector<1x32xf32>
    %370 = tpu.matmul %367, %369, %cst_351 {dimension_numbers = #tpu.dot_dimension_numbers<[1], [0], [0], [1], [0, 0, 1, 1], [], []>} : vector<1x192xf32>, vector<192x32xf32>, vector<1x32xf32> -> vector<1x32xf32>
    %371 = arith.addf %366, %370 : vector<1x32xf32>
    %372 = vector.extract_strided_slice %325 {offsets = [9, 0], sizes = [1, 192], strides = [1, 1]} : vector<12x192xf32> to vector<1x192xf32>
    %c9_352 = arith.constant 9 : index
    %c0_353 = arith.constant 0 : index
    %c0_354 = arith.constant 0 : index
    %373 = vector.load %arg10[%c9_352, %c0_353, %c0_354] : memref<12x192x32xf32, #tpu.memory_space<vmem>>, vector<1x192x32xf32>
    %374 = vector.shape_cast %373 : vector<1x192x32xf32> to vector<192x32xf32>
    %cst_355 = arith.constant dense<0.000000e+00> : vector<1x32xf32>
    %375 = tpu.matmul %372, %374, %cst_355 {dimension_numbers = #tpu.dot_dimension_numbers<[1], [0], [0], [1], [0, 0, 1, 1], [], []>} : vector<1x192xf32>, vector<192x32xf32>, vector<1x32xf32> -> vector<1x32xf32>
    %376 = arith.addf %371, %375 : vector<1x32xf32>
    %377 = vector.extract_strided_slice %325 {offsets = [10, 0], sizes = [1, 192], strides = [1, 1]} : vector<12x192xf32> to vector<1x192xf32>
    %c10_356 = arith.constant 10 : index
    %c0_357 = arith.constant 0 : index
    %c0_358 = arith.constant 0 : index
    %378 = vector.load %arg10[%c10_356, %c0_357, %c0_358] : memref<12x192x32xf32, #tpu.memory_space<vmem>>, vector<1x192x32xf32>
    %379 = vector.shape_cast %378 : vector<1x192x32xf32> to vector<192x32xf32>
    %cst_359 = arith.constant dense<0.000000e+00> : vector<1x32xf32>
    %380 = tpu.matmul %377, %379, %cst_359 {dimension_numbers = #tpu.dot_dimension_numbers<[1], [0], [0], [1], [0, 0, 1, 1], [], []>} : vector<1x192xf32>, vector<192x32xf32>, vector<1x32xf32> -> vector<1x32xf32>
    %381 = arith.addf %376, %380 : vector<1x32xf32>
    %382 = vector.extract_strided_slice %325 {offsets = [11, 0], sizes = [1, 192], strides = [1, 1]} : vector<12x192xf32> to vector<1x192xf32>
    %c11_360 = arith.constant 11 : index
    %c0_361 = arith.constant 0 : index
    %c0_362 = arith.constant 0 : index
    %383 = vector.load %arg10[%c11_360, %c0_361, %c0_362] : memref<12x192x32xf32, #tpu.memory_space<vmem>>, vector<1x192x32xf32>
    %384 = vector.shape_cast %383 : vector<1x192x32xf32> to vector<192x32xf32>
    %cst_363 = arith.constant dense<0.000000e+00> : vector<1x32xf32>
    %385 = tpu.matmul %382, %384, %cst_363 {dimension_numbers = #tpu.dot_dimension_numbers<[1], [0], [0], [1], [0, 0, 1, 1], [], []>} : vector<1x192xf32>, vector<192x32xf32>, vector<1x32xf32> -> vector<1x32xf32>
    %386 = arith.addf %381, %385 : vector<1x32xf32>
    %387 = arith.mulf %386, %386 : vector<1x32xf32>
    %cst_364 = arith.constant dense<0.000000e+00> : vector<1xf32>
    %388 = vector.multi_reduction <add>, %387, %cst_364 [1] : vector<1x32xf32> to vector<1xf32>
    %389 = vector.shape_cast %388 : vector<1xf32> to vector<1x1xf32>
    %cst_365 = arith.constant 1.000000e-24 : f32
    %390 = vector.broadcast %cst_365 : f32 to vector<1x1xf32>
    %391 = arith.maximumf %389, %390 : vector<1x1xf32>
    %392 = math.rsqrt %391 : vector<1x1xf32>
    %393 = vector.broadcast %392 : vector<1x1xf32> to vector<1x32xf32>
    %394 = arith.mulf %386, %393 : vector<1x32xf32>
    %c1_366 = arith.constant 1 : index
    %c0_367 = arith.constant 0 : index
    %395 = vector.load %arg11[%c1_366, %c0_367] : memref<2x32xf32, #tpu.memory_space<vmem>>, vector<1x32xf32>
    tpu.vector_store %arg11[%c1_366, %c0_367], %394 {strides = array<i32>} : memref<2x32xf32, #tpu.memory_space<vmem>>, vector<1x32xf32>,
    return
  }
  func.func @transform_0(%arg0: i32) -> (i32, i32) {
    %c0_i32 = arith.constant 0 : i32
    %c0_i32_0 = arith.constant 0 : i32
    %c0_i32_1 = arith.constant 0 : i32
    return %c0_i32, %c0_i32_0 : i32, i32
  }
  func.func @transform_1(%arg0: i32) -> (i32, i32, i32) {
    %c0_i32 = arith.constant 0 : i32
    %c0_i32_0 = arith.constant 0 : i32
    %c0_i32_1 = arith.constant 0 : i32
    %c0_i32_2 = arith.constant 0 : i32
    return %c0_i32, %c0_i32_0, %c0_i32_1 : i32, i32, i32
  }
  func.func @transform_2(%arg0: i32) -> (i32, i32) {
    %c0_i32 = arith.constant 0 : i32
    %c0_i32_0 = arith.constant 0 : i32
    %c0_i32_1 = arith.constant 0 : i32
    return %c0_i32, %c0_i32_0 : i32, i32
  }
  func.func @transform_3(%arg0: i32) -> (i32, i32) {
    %c0_i32 = arith.constant 0 : i32
    %c0_i32_0 = arith.constant 0 : i32
    %c0_i32_1 = arith.constant 0 : i32
    return %c0_i32, %c0_i32_0 : i32, i32
  }
  func.func @transform_4(%arg0: i32) -> (i32, i32) {
    %c0_i32 = arith.constant 0 : i32
    %c0_i32_0 = arith.constant 0 : i32
    %c0_i32_1 = arith.constant 0 : i32
    return %c0_i32, %c0_i32_0 : i32, i32
  }
  func.func @transform_5(%arg0: i32) -> (i32, i32, i32) {
    %c0_i32 = arith.constant 0 : i32
    %c0_i32_0 = arith.constant 0 : i32
    %c0_i32_1 = arith.constant 0 : i32
    %c0_i32_2 = arith.constant 0 : i32
    return %c0_i32, %c0_i32_0, %c0_i32_1 : i32, i32, i32
  }
  func.func @transform_6(%arg0: i32) -> (i32, i32) {
    %c0_i32 = arith.constant 0 : i32
    %c0_i32_0 = arith.constant 0 : i32
    %c0_i32_1 = arith.constant 0 : i32
    return %c0_i32, %c0_i32_0 : i32, i32
  }
  func.func @transform_7(%arg0: i32) -> (i32, i32) {
    %c0_i32 = arith.constant 0 : i32
    %c0_i32_0 = arith.constant 0 : i32
    %c0_i32_1 = arith.constant 0 : i32
    return %c0_i32, %c0_i32_0 : i32, i32
  }
  func.func @transform_8(%arg0: i32) -> (i32, i32) {
    %c0_i32 = arith.constant 0 : i32
    %c0_i32_0 = arith.constant 0 : i32
    %c0_i32_1 = arith.constant 0 : i32
    return %c0_i32, %c0_i32_0 : i32, i32
  }
  func.func @transform_9(%arg0: i32) -> (i32, i32, i32) {
    %c0_i32 = arith.constant 0 : i32
    %c0_i32_0 = arith.constant 0 : i32
    %c0_i32_1 = arith.constant 0 : i32
    %c0_i32_2 = arith.constant 0 : i32
    return %c0_i32, %c0_i32_0, %c0_i32_1 : i32, i32, i32
  }
  func.func @transform_10(%arg0: i32) -> (i32, i32) {
    %c0_i32 = arith.constant 0 : i32
    %c0_i32_0 = arith.constant 0 : i32
    %c0_i32_1 = arith.constant 0 : i32
    return %c0_i32, %c0_i32_0 : i32, i32
  }
}

</mosaic_0001>

<bundles_post_ra>
// kernel: conv2d_embedding_forward.1
= control target key start
LH: loop header
LB: loop body
LE: loop exit
PB: predicated region body
PF: predicated region fallthrough
CT: control target
= control target key end

     0   :  { %s10309_s17 = smov 124   ;;  %s10310_s14 = smov 120   ;;  %s13120_s0 = inlined_call_operand.vmem [shape: f32[32,64], index: 0, kind: input, shape index: {}]   ;;  %s13121_s1 = inlined_call_operand.vmem [shape: f32[9,56,112], index: 1, kind: input, shape index: {}]   ;;  %s13122_s2 = inlined_call_operand.vmem [shape: f32[112,112], index: 2, kind: input, shape index: {}]   ;;  %s13123_s3 = inlined_call_operand.vmem [shape: f32[1,112], index: 3, kind: input, shape index: {}]   ;;  %s13124_s4 = inlined_call_operand.vmem [shape: f32[1,112], index: 4, kind: input, shape index: {}]   ;;  %s13125_s5 = inlined_call_operand.vmem [shape: f32[9,96,192], index: 5, kind: input, shape index: {}]   ;;  %s13126_s6 = inlined_call_operand.vmem [shape: f32[192,192], index: 6, kind: input, shape index: {}]   ;;  %s13127_s7 = inlined_call_operand.vmem [shape: f32[1,192], index: 7, kind: input, shape index: {}]   ;;  %s13128_s8 = inlined_call_operand.vmem [shape: f32[1,192], index: 8, kind: input, shape index: {}]   ;;  %s13129_s9 = inlined_call_operand.vmem [shape: f32[12,192,32], index: 9, kind: input, shape index: {}]   ;;  %s13130_s10 = inlined_call_operand.hbm [shape: f32[2,32], index: 10, kind: output, shape index: {}]  }
   0x1   :  { %v10375_v0 = vld [vmem:[%s13120_s0 + $0x10] sm:$0xff]  ;;  %v10380_v1 = vld [vmem:[%s13120_s0] sm:$0xff]  ;;  %v10389_v2 = vld [vmem:[%s13120_s0 + $0x18] sm:$0x3f] }
   0x2   :  { %904 = vrot.lane.b32.xlu1 %v10375_v0, %s10309_s17  ;;  %69 = vrot.lane.b32.xlu0 %v10380_v1, %s10309_s17  ;;  %v10394_v3 = vld [vmem:[%s13120_s0 + $0x8] sm:$0x3f]  ;;  %v6787_v4 = vld [vmem:[%s13121_s1 + $0x38] sm:$0xff] }
   0x3   :  { %v6788_v5 = vld [vmem:[%s13121_s1 + $0x40] sm:$0xff]  ;;  %v6789_v7 = vld [vmem:[%s13121_s1 + $0x48] sm:$0xff]  ;;  %v6790_v8 = vld [vmem:[%s13121_s1 + $0x50] sm:$0xff] }
   0x4   :  { %v8471_v6 = vpack.c.bf16 %v6788_v5, %v6787_v4  ;;  %v8475_v9 = vpack.c.bf16 %v6790_v8, %v6789_v7  ;;  %v6791_v10 = vld [vmem:[%s13121_s1 + $0x58] sm:$0xff]  ;;  %v6792_v11 = vld [vmem:[%s13121_s1 + $0x60] sm:$0xff] }
   0x5   :  { %v8479_v12 = vpack.c.bf16 %v6792_v11, %v6791_v10 }
   0x6   :  { %906 = vrot.lane.b32.xlu1 %v10389_v2, %s10309_s17  ;;  %71 = vrot.lane.b32.xlu0 %v10394_v3, %s10309_s17 }
   0x7   :  { %8472 = vmatprep.subr.bf16.mxu0 %v8471_v6  ;;  %8580 = vmatprep.subr.bf16.mxu1 %v8471_v6 }
   0x8   :  { %8474 = vmatpush3.bf16.msra.mxu0 %v8471_v6  ;;  %8582 = vmatpush3.bf16.msra.mxu1 %v8471_v6 }
   0x9   :  { %8476 = vmatprep.subr.bf16.mxu0 %v8475_v9  ;;  %8584 = vmatprep.subr.bf16.mxu1 %v8475_v9 }
   0xa   :  { %240 = vrot.lane.b32.xlu0 %v10380_v1, %s10310_s14  ;;  %242 = vrot.lane.b32.xlu1 %v10394_v3, %s10310_s14 }
   0xb   :  { %15 = vsyncpa [#allocation5], 0  ;;  %v10429_v13 = vld [vmem:[%s13120_s0 + $0x1] sm:$0xff]  ;;  %v10434_v14 = vld [vmem:[%s13120_s0 + $0x9] sm:$0x3f]  ;;  %vm36_vm0 = vcmask 916480  }
   0xc   :  { %8478 = vmatpush3.bf16.msra.mxu0 %v8475_v9  ;;  %8586 = vmatpush3.bf16.msra.mxu1 %v8475_v9  ;;  %v6793_v15 = vld [vmem:[%s13121_s1 + $0x68] sm:$0xff]  ;;  %v888_v16 = vld [vmem:[%s13121_s1] sm:$0xff]  ;;  %v10452_v18 = vld [vmem:[%s13120_s0 + $0x11] sm:$0xff]  ;;  %v10311_v25 = vmov 0.0   ;;  %vm73_vm1 = vcmask 457728   ;;  %vm10313_vm2 = vmmov 0  }
   0xd   :  { %8480 = vmatprep.subr.bf16.mxu0 %v8479_v12  ;;  %8588 = vmatprep.subr.bf16.mxu1 %v8479_v12  ;;  %v889_v17 = vld [vmem:[%s13121_s1 + $0x8] sm:$0xff]  ;;  %v10457_v19 = vld [vmem:[%s13120_s0 + $0x19] sm:$0x3f]  ;;  %38 = vst.msk [vmem:[#allocation2 + $0x8] sm:$0xff] %vm36_vm0, %v10311_v25  ;;  %37 = vst.msk [vmem:[#allocation2] sm:$0xff] %vm36_vm0, %v10311_v25  ;;  %vm884_vm3 = vcmask 914432  }
   0xe   :  { %1073 = vrot.lane.b32.xlu0 %v10375_v0, %s10310_s14  ;;  %1075 = vrot.lane.b32.xlu1 %v10389_v2, %s10310_s14  ;;  %v8591_v20 = vpack.c.bf16 %v889_v17, %v888_v16  ;;  %v10474_v21 = vld [vmem:[%s13120_s0 + $0x2] sm:$0xff]  ;;  %v10479_v22 = vld [vmem:[%s13120_s0 + $0xa] sm:$0x3f]  ;;  %39 = vst.msk [vmem:[#allocation2 + $0x10] sm:$0xff] %vm36_vm0, %v10311_v25  ;;  %40 = vst.msk [vmem:[#allocation2 + $0x18] sm:$0xff] %vm36_vm0, %v10311_v25  ;;  %vm2002_vm4 = vcmask 785408  }
   0xf   :  { %v10488_v23 = vld [vmem:[%s13120_s0 + $0x12] sm:$0xff]  ;;  %v10493_v24 = vld [vmem:[%s13120_s0 + $0x1a] sm:$0x3f]  ;;  %44 = vst [vmem:[#allocation3 + $0x10] sm:$0xff] %v10311_v25  ;;  %48 = vst [vmem:[#allocation3 + $0x30] sm:$0xff] %v10311_v25  ;;  %vm42_vm5 = vcmask 523264  }
  0x10   :  { %8482 = vmatpush3.bf16.msra.mxu0 %v8479_v12  ;;  %8590 = vmatpush3.bf16.msra.mxu1 %v8479_v12  ;;  %v54_v28 = vld [vmem:[%s13121_s1 + $0x10] sm:$0xff]  ;;  %v55_v29 = vld [vmem:[%s13121_s1 + $0x18] sm:$0xff]  ;;  %v56_v33 = vld [vmem:[%s13121_s1 + $0x20] sm:$0xff]  ;;  %vm2966_vm6 = vcmask 519168   ;;  %vm5557_vm7 = vcmask 253952  }
  0x11   :  { %8115 = vmatprep.subr.mxu0 %v6793_v15  ;;  %8268 = vmatprep.subr.mxu1 %v6793_v15  ;;  %v8487_v30 = vpack.c.bf16 %v55_v29, %v54_v28  ;;  %v57_v34 = vld [vmem:[%s13121_s1 + $0x28] sm:$0xff]  ;;  %v58_v36 = vld [vmem:[%s13121_s1 + $0x30] sm:$0xff]  ;;  %v6799_v38 = vld [vmem:[%s13121_s1 + $0x78] sm:$0xff] }
  0x12   :  { %426 = vrot.lane.b32.xlu0 %v10429_v13, %s10309_s17  ;;  %428 = vrot.lane.b32.xlu1 %v10434_v14, %s10309_s17  ;;  %v8491_v35 = vpack.c.bf16 %v57_v34, %v56_v33  ;;  %v6798_v37 = vld [vmem:[%s13121_s1 + $0x70] sm:$0xff]  ;;  %v6800_v41 = vld [vmem:[%s13121_s1 + $0x80] sm:$0xff] }
  0x13   :  { %v8495_v40 = vpack.c.bf16 %v6799_v38, %v6798_v37  ;;  %v6801_v42 = vld [vmem:[%s13121_s1 + $0x88] sm:$0xff]  ;;  %v6802_v44 = vld [vmem:[%s13121_s1 + $0x90] sm:$0xff]  ;;  %v6803_v45 = vld [vmem:[%s13121_s1 + $0x98] sm:$0xff] }
  0x14   :  { %8116 = vmatpush3.msra.mxu0 %v6793_v15  ;;  %8269 = vmatpush3.msra.mxu1 %v6793_v15  ;;  %v8499_v43 = vpack.c.bf16 %v6801_v42, %v6800_v41  ;;  %v8503_v47 = vpack.c.bf16 %v6803_v45, %v6802_v44  ;;  %v6804_v49 = vld [vmem:[%s13121_s1 + $0xa0] sm:$0xff]  ;;  %v6881_v50 = vld [vmem:[%s13121_s1 + $0xa8] sm:$0xff]  ;;  %v6882_v51 = vld [vmem:[%s13121_s1 + $0xb0] sm:$0xff] }
  0x15   :  { %8592 = vmatprep.subr.bf16.mxu1 %v8591_v20  ;;  %8484 = vmatprep.subr.bf16.mxu0 %v8591_v20  ;;  %v8615_v52 = vpack.c.bf16 %v6882_v51, %v6881_v50  ;;  %v6809_v53 = vld [vmem:[%s13121_s1 + $0xb8] sm:$0xff]  ;;  %v6810_v54 = vld [vmem:[%s13121_s1 + $0xc0] sm:$0xff]  ;;  %v6811_v57 = vld [vmem:[%s13121_s1 + $0xc8] sm:$0xff] }
  0x16   :  { %1257 = vrot.lane.b32.xlu0 %v10452_v18, %s10309_s17  ;;  %1259 = vrot.lane.b32.xlu1 %v10457_v19, %s10309_s17  ;;  %v8511_v56 = vpack.c.bf16 %v6810_v54, %v6809_v53  ;;  %v6812_v58 = vld [vmem:[%s13121_s1 + $0xd0] sm:$0xff]  ;;  %v6813_v60 = vld [vmem:[%s13121_s1 + $0xd8] sm:$0xff] }
  0x17   :  { %v8515_v59 = vpack.c.bf16 %v6812_v58, %v6811_v57  ;;  %v6816_v61 = vld [vmem:[%s13121_s1 + $0xe0] sm:$0xff]  ;;  %v6817_v62 = vld [vmem:[%s13121_s1 + $0xe8] sm:$0xff]  ;;  %v6822_v9 = vld [vmem:[%s13121_s1 + $0x110] sm:$0xff] }
  0x18   :  { %v6820_v4 = vld [vmem:[%s13121_s1 + $0x100] sm:$0xff]  ;;  %v6821_v5 = vld [vmem:[%s13121_s1 + $0x108] sm:$0xff]  ;;  %v6825_v10 = vld [vmem:[%s13121_s1 + $0x118] sm:$0xff] }
  0x19   :  { %v8527_v7 = vpack.c.bf16 %v6821_v5, %v6820_v4  ;;  %v6826_v11 = vld [vmem:[%s13121_s1 + $0x120] sm:$0xff]  ;;  %v6827_v12 = vld [vmem:[%s13121_s1 + $0x128] sm:$0xff]  ;;  %v6834_v29 = vld [vmem:[%s13121_s1 + $0x150] sm:$0xff] }
  0x1a   :  { %519 = vrot.lane.b32.xlu0 %v10429_v13, %s10310_s14  ;;  %521 = vrot.lane.b32.xlu1 %v10434_v14, %s10310_s14  ;;  %v8531_v15 = vpack.c.bf16 %v6826_v11, %v6825_v10  ;;  %v6831_v28 = vld [vmem:[%s13121_s1 + $0x148] sm:$0xff]  ;;  %v6839_v37 = vld [vmem:[%s13121_s1 + $0x178] sm:$0xff] }
  0x1b   :  { %v6837_v33 = vld [vmem:[%s13121_s1 + $0x168] sm:$0xff]  ;;  %v6844_v41 = vld [vmem:[%s13121_s1 + $0x190] sm:$0xff]  ;;  %v6846_v42 = vld [vmem:[%s13121_s1 + $0x1a0] sm:$0xff] }
  0x1c   :  { %v6847_v45 = vld [vmem:[%s13121_s1 + $0x1a8] sm:$0xff]  ;;  %v6855_v53 = vld [vmem:[%s13121_s1 + $0x1d8] sm:$0xff]  ;;  %v6856_v57 = vld [vmem:[%s13121_s1 + $0x1e0] sm:$0xff] }
  0x1d   :  { %v6853_v50 = vld [vmem:[%s13121_s1 + $0x1c8] sm:$0xff]  ;;  %v1748_v4 = vld [vmem:[%s13122_s2 + $0x10] sm:$0xff]  ;;  %v1749_v5 = vld [vmem:[%s13122_s2 + $0x18] sm:$0xff] }
  0x1e   :  { %1349 = vrot.lane.b32.xlu0 %v10452_v18, %s10310_s14  ;;  %1351 = vrot.lane.b32.xlu1 %v10457_v19, %s10310_s14  ;;  %v6857_v58 = vld [vmem:[%s13121_s1 + $0x1e8] sm:$0xff]  ;;  %v1752_v10 = vld [vmem:[%s13122_s2 + $0x30] sm:$0xff] }
  0x1f   :  { %v1753_v11 = vld [vmem:[%s13122_s2 + $0x38] sm:$0xff] }
  0x22   :  { %705 = vrot.lane.b32.xlu0 %v10474_v21, %s10309_s17  ;;  %707 = vrot.lane.b32.xlu1 %v10479_v22, %s10309_s17 }
  0x26   :  { %1533 = vrot.lane.b32.xlu0 %v10488_v23, %s10309_s17  ;;  %1535 = vrot.lane.b32.xlu1 %v10493_v24, %s10309_s17 }
  0x2a   :  { %798 = vrot.lane.b32.xlu0 %v10474_v21, %s10310_s14  ;;  %800 = vrot.lane.b32.xlu1 %v10479_v22, %s10310_s14 }
  0x2e   :  { %1625 = vrot.lane.b32.xlu0 %v10488_v23, %s10310_s14  ;;  %1627 = vrot.lane.b32.xlu1 %v10493_v24, %s10310_s14 }
  0x74   :  { %v905_v26 = vpop.permute.xlu1 %904  ;;  %v70_v27 = vpop.permute.xlu0 %69 }
  0x75   :  { %8117 = vmatprep.mubr.msk.f32.mxu0 %vm73_vm1, %v70_v27  ;;  %8270 = vmatprep.mubr.msk.f32.mxu1 %vm73_vm1, %v905_v26 }
  0x78   :  { %v907_v31 = vpop.permute.xlu1 %906  ;;  %v72_v32 = vpop.permute.xlu0 %71 }
  0x79   :  { %8118 = vmatmul.mubr.msk.f32.vlgmr.msra.gmra.mrb[0].mxu0 %vm73_vm1, %v72_v32  ;;  %8271 = vmatmul.mubr.msk.f32.vlgmr.msra.gmra.mrb[0].mxu1 %vm73_vm1, %v907_v31  ;;  %v6836_v32 = vld [vmem:[%s13121_s1 + $0x160] sm:$0xff] }
  0x7a   :  { %8486 = vmatpush3.bf16.msra.mxu0 %v8591_v20  ;;  %8594 = vmatpush3.bf16.msra.mxu1 %v8591_v20 }
  0x7b   :  { %8488 = vmatprep.subr.bf16.mxu0 %v8487_v30  ;;  %8596 = vmatprep.subr.bf16.mxu1 %v8487_v30 }
  0x7c   :  { %8134 = vmatprep.mubr.msk.f32.mxu0 %vm73_vm1, %v10380_v1  ;;  %8287 = vmatprep.mubr.msk.f32.mxu1 %vm73_vm1, %v10375_v0  ;;  %v241_v39 = vpop.permute.xlu0 %240  ;;  %v243_v48 = vpop.permute.xlu1 %242  ;;  %v8519_v0 = vpack.c.bf16 %v6817_v62, %v6816_v61  ;;  %v6818_v1 = vld [vmem:[%s13121_s1 + $0xf0] sm:$0xff] }
  0x7d   :  { %v6858_v62 = vld [vmem:[%s13121_s1 + $0x1f0] sm:$0xff] }
  0x7e   :  { %8490 = vmatpush3.bf16.msra.mxu0 %v8487_v30  ;;  %8598 = vmatpush3.bf16.msra.mxu1 %v8487_v30  ;;  %v6835_v30 = vld [vmem:[%s13121_s1 + $0x158] sm:$0xff] }
  0x7f   :  { %8492 = vmatprep.subr.bf16.mxu0 %v8491_v35  ;;  %8600 = vmatprep.subr.bf16.mxu1 %v8491_v35  ;;  %v8543_v31 = vpack.c.bf16 %v6835_v30, %v6834_v29 }
  0x80   :  { %v1074_v46 = vpop.permute.xlu0 %1073  ;;  %v1076_v55 = vpop.permute.xlu1 %1075 }
  0x82   :  { %8494 = vmatpush3.bf16.msra.mxu0 %v8491_v35  ;;  %8602 = vmatpush3.bf16.msra.mxu1 %v8491_v35  ;;  %v8547_v35 = vpack.c.bf16 %v6837_v33, %v6836_v32 }
  0x83   :  { %8132 = vmatprep.subr.mxu0 %v58_v36  ;;  %8285 = vmatprep.subr.mxu1 %v58_v36 }
  0x84   :  { %v427_v63 = vpop.permute.xlu0 %426  ;;  %v429_v8 = vpop.permute.xlu1 %428 }
  0x86   :  { %8133 = vmatpush3.msra.mxu0 %v58_v36  ;;  %8286 = vmatpush3.msra.mxu1 %v58_v36  ;;  %v6838_v36 = vld [vmem:[%s13121_s1 + $0x170] sm:$0xff] }
  0x87   :  { %8496 = vmatprep.subr.bf16.mxu0 %v8495_v40  ;;  %8604 = vmatprep.subr.bf16.mxu1 %v8495_v40  ;;  %v8551_v38 = vpack.c.bf16 %v6839_v37, %v6838_v36 }
  0x88   :  { %8135 = vmatmul.mubr.msk.f32.vlgmr.msra.gmra.mrb[0].mxu0 %vm73_vm1, %v10394_v3  ;;  %8288 = vmatmul.mubr.msk.f32.vlgmr.msra.gmra.mrb[0].mxu1 %vm73_vm1, %v10389_v2  ;;  %v6819_v2 = vld [vmem:[%s13121_s1 + $0xf8] sm:$0xff]  ;;  %v1258_v6 = vpop.permute.xlu0 %1257  ;;  %v1260_v17 = vpop.permute.xlu1 %1259 }
  0x89   :  { %8498 = vmatpush3.bf16.msra.mxu0 %v8495_v40  ;;  %8606 = vmatpush3.bf16.msra.mxu1 %v8495_v40  ;;  %v8523_v3 = vpack.c.bf16 %v6819_v2, %v6818_v1  ;;  %v6843_v40 = vld [vmem:[%s13121_s1 + $0x188] sm:$0xff] }
  0x8a   :  { %8500 = vmatprep.subr.bf16.mxu0 %v8499_v43  ;;  %8608 = vmatprep.subr.bf16.mxu1 %v8499_v43  ;;  %v1747_v1 = vld [vmem:[%s13122_s2 + $0x8] sm:$0xff] }
  0x8b   :  { %8151 = vmatprep.mubr.msk.f32.mxu0 %vm73_vm1, %v241_v39  ;;  %8304 = vmatprep.mubr.msk.f32.mxu1 %vm73_vm1, %v1074_v46  ;;  %v6840_v39 = vld [vmem:[%s13121_s1 + $0x180] sm:$0xff]  ;;  %v6848_v46 = vld [vmem:[%s13121_s1 + $0x1b0] sm:$0xff] }
  0x8c   :  { %v522_v27 = vpop.permute.xlu1 %521 }
  0x8d   :  { %8502 = vmatpush3.bf16.msra.mxu0 %v8499_v43  ;;  %8610 = vmatpush3.bf16.msra.mxu1 %v8499_v43 }
  0x8e   :  { %8504 = vmatprep.subr.bf16.mxu0 %v8503_v47  ;;  %8612 = vmatprep.subr.bf16.mxu1 %v8503_v47 }
  0x90   :  { %v1352_v34 = vpop.permute.xlu1 %1351 }
  0x91   :  { %8506 = vmatpush3.bf16.msra.mxu0 %v8503_v47  ;;  %8614 = vmatpush3.bf16.msra.mxu1 %v8503_v47  ;;  %v8563_v47 = vpack.c.bf16 %v6848_v46, %v6847_v45 }
  0x92   :  { %8149 = vmatprep.subr.mxu0 %v6804_v49  ;;  %8302 = vmatprep.subr.mxu1 %v6804_v49 }
  0x95   :  { %8150 = vmatpush3.msra.mxu0 %v6804_v49  ;;  %8303 = vmatpush3.msra.mxu1 %v6804_v49  ;;  %v708_v49 = vpop.permute.xlu1 %707 }
  0x96   :  { %8616 = vmatprep.subr.bf16.mxu1 %v8615_v52  ;;  %8152 = vmatmul.mubr.msk.f32.vlgmr.msra.gmra.mrb[0].mxu0 %vm73_vm1, %v243_v48 }
  0x97   :  { %8508 = vmatprep.subr.bf16.mxu0 %v8615_v52  ;;  %8305 = vmatmul.mubr.msk.f32.vlgmr.msra.gmra.mrb[0].mxu1 %vm73_vm1, %v1076_v55 }
  0x98   :  { %8510 = vmatpush3.bf16.msra.mxu0 %v8615_v52  ;;  %8618 = vmatpush3.bf16.msra.mxu1 %v8615_v52  ;;  %v6854_v52 = vld [vmem:[%s13121_s1 + $0x1d0] sm:$0xff] }
  0x99   :  { %8512 = vmatprep.subr.bf16.mxu0 %v8511_v56  ;;  %8620 = vmatprep.subr.bf16.mxu1 %v8511_v56  ;;  %v1536_v55 = vpop.permute.xlu1 %1535 }
  0x9a   :  { %8168 = vmatprep.mubr.msk.f32.mxu0 %vm73_vm1, %v10429_v13  ;;  %8321 = vmatprep.mubr.msk.f32.mxu1 %vm73_vm1, %v10452_v18  ;;  %v6828_v13 = vld [vmem:[%s13121_s1 + $0x130] sm:$0xff]  ;;  %v6829_v18 = vld [vmem:[%s13121_s1 + $0x138] sm:$0xff] }
  0x9b   :  { %v8535_v16 = vpack.c.bf16 %v6828_v13, %v6827_v12  ;;  %v8697_v12 = vpack.c.bf16 %v1753_v11, %v1752_v10  ;;  %v1754_v13 = vld [vmem:[%s13122_s2 + $0x40] sm:$0xff] }
  0x9c   :  { %8514 = vmatpush3.bf16.msra.mxu0 %v8511_v56  ;;  %8622 = vmatpush3.bf16.msra.mxu1 %v8511_v56  ;;  %v8571_v56 = vpack.c.bf16 %v6855_v53, %v6854_v52 }
  0x9d   :  { %8516 = vmatprep.subr.bf16.mxu0 %v8515_v59  ;;  %8624 = vmatprep.subr.bf16.mxu1 %v8515_v59  ;;  %v801_v61 = vpop.permute.xlu1 %800 }
  0xa0   :  { %8518 = vmatpush3.bf16.msra.mxu0 %v8515_v59  ;;  %8626 = vmatpush3.bf16.msra.mxu1 %v8515_v59  ;;  %v8575_v59 = vpack.c.bf16 %v6857_v58, %v6856_v57 }
  0xa1   :  { %8166 = vmatprep.subr.mxu0 %v6813_v60  ;;  %8319 = vmatprep.subr.mxu1 %v6813_v60 }
  0xa4   :  { %8167 = vmatpush3.msra.mxu0 %v6813_v60  ;;  %8320 = vmatpush3.msra.mxu1 %v6813_v60 }
  0xa5   :  { %8520 = vmatprep.subr.bf16.mxu0 %v8519_v0  ;;  %8628 = vmatprep.subr.bf16.mxu1 %v8519_v0 }
  0xa6   :  { %8169 = vmatmul.mubr.msk.f32.vlgmr.msra.gmra.mrb[0].mxu0 %vm73_vm1, %v10434_v14  ;;  %8322 = vmatmul.mubr.msk.f32.vlgmr.msra.gmra.mrb[0].mxu1 %vm73_vm1, %v10457_v19  ;;  %v520_v14 = vpop.permute.xlu0 %519  ;;  %v6830_v19 = vld [vmem:[%s13121_s1 + $0x140] sm:$0xff] }
  0xa7   :  { %8522 = vmatpush3.bf16.msra.mxu0 %v8519_v0  ;;  %8630 = vmatpush3.bf16.msra.mxu1 %v8519_v0  ;;  %v8539_v26 = vpack.c.bf16 %v6830_v19, %v6829_v18  ;;  %v1746_v0 = vld [vmem:[%s13122_s2] sm:$0xff] }
  0xa8   :  { %8524 = vmatprep.subr.bf16.mxu0 %v8523_v3  ;;  %8632 = vmatprep.subr.bf16.mxu1 %v8523_v3  ;;  %v8688_v2 = vpack.c.bf16 %v1747_v1, %v1746_v0  ;;  %v1758_v19 = vld [vmem:[%s13122_s2 + $0x60] sm:$0xff]  ;;  %v6939_v1 = vld [vmem:[%s13125_s5 + $0xd0] sm:$0xff] }
  0xa9   :  { %8185 = vmatprep.mubr.msk.f32.mxu0 %vm73_vm1, %v427_v63  ;;  %8338 = vmatprep.mubr.msk.f32.mxu1 %vm73_vm1, %v1258_v6  ;;  %v1628_v63 = vpop.permute.xlu1 %1627  ;;  %v8691_v6 = vpack.c.bf16 %v1749_v5, %v1748_v4 }
  0xaa   :  { %v1350_v20 = vpop.permute.xlu0 %1349 }
  0xab   :  { %8526 = vmatpush3.bf16.msra.mxu0 %v8523_v3  ;;  %8634 = vmatpush3.bf16.msra.mxu1 %v8523_v3  ;;  %v10312_v3 = vmov 0.0|0.0  }
  0xac   :  { %8528 = vmatprep.subr.bf16.mxu0 %v8527_v7  ;;  %8636 = vmatprep.subr.bf16.mxu1 %v8527_v7 }
  0xae   :  { %v706_v43 = vpop.permute.xlu0 %705 }
  0xaf   :  { %8530 = vmatpush3.bf16.msra.mxu0 %v8527_v7  ;;  %8638 = vmatpush3.bf16.msra.mxu1 %v8527_v7  ;;  %v1750_v7 = vld [vmem:[%s13122_s2 + $0x20] sm:$0xff] }
  0xb0   :  { %8183 = vmatprep.subr.mxu0 %v6822_v9  ;;  %8336 = vmatprep.subr.mxu1 %v6822_v9 }
  0xb2   :  { %v1534_v48 = vpop.permute.xlu0 %1533 }
  0xb3   :  { %8184 = vmatpush3.msra.mxu0 %v6822_v9  ;;  %8337 = vmatpush3.msra.mxu1 %v6822_v9 }
  0xb4   :  { %8186 = vmatmul.mubr.msk.f32.vlgmr.msra.gmra.mrb[0].mxu0 %vm73_vm1, %v429_v8  ;;  %8532 = vmatprep.subr.bf16.mxu0 %v8531_v15  ;;  %v1751_v8 = vld [vmem:[%s13122_s2 + $0x28] sm:$0xff] }
  0xb5   :  { %8640 = vmatprep.subr.bf16.mxu1 %v8531_v15  ;;  %8534 = vmatpush3.bf16.msra.mxu0 %v8531_v15  ;;  %v8694_v9 = vpack.c.bf16 %v1751_v8, %v1750_v7  ;;  %v6943_v7 = vld [vmem:[%s13125_s5 + $0xf0] sm:$0xff]  ;;  %v6946_v8 = vld [vmem:[%s13125_s5 + $0x108] sm:$0xff] }
  0xb6   :  { %8339 = vmatmul.mubr.msk.f32.vlgmr.msra.gmra.mrb[0].mxu1 %vm73_vm1, %v1260_v17  ;;  %8536 = vmatprep.subr.bf16.mxu0 %v8535_v16  ;;  %v799_v54 = vpop.permute.xlu0 %798  ;;  %v1757_v17 = vld [vmem:[%s13122_s2 + $0x58] sm:$0xff] }
  0xb7   :  { %8642 = vmatpush3.bf16.msra.mxu1 %v8531_v15  ;;  %8202 = vmatprep.mubr.msk.f32.mxu0 %vm73_vm1, %v520_v14  ;;  %v1755_v14 = vld [vmem:[%s13122_s2 + $0x48] sm:$0xff] }
  0xb8   :  { %8644 = vmatprep.subr.bf16.mxu1 %v8535_v16  ;;  %8355 = vmatprep.mubr.msk.f32.mxu1 %vm73_vm1, %v1350_v20  ;;  %v8700_v15 = vpack.c.bf16 %v1755_v14, %v1754_v13  ;;  %v1759_v20 = vld [vmem:[%s13122_s2 + $0x68] sm:$0xff]  ;;  %v6947_v13 = vld [vmem:[%s13125_s5 + $0x110] sm:$0xff] }
  0xb9   :  { %8538 = vmatpush3.bf16.msra.mxu0 %v8535_v16  ;;  %v6950_v14 = vld [vmem:[%s13125_s5 + $0x128] sm:$0xff] }
  0xba   :  { %8540 = vmatprep.subr.bf16.mxu0 %v8539_v26  ;;  %v1626_v60 = vpop.permute.xlu0 %1625 }
  0xbb   :  { %8646 = vmatpush3.bf16.msra.mxu1 %v8535_v16  ;;  %v1756_v16 = vld [vmem:[%s13122_s2 + $0x50] sm:$0xff] }
  0xbc   :  { %8648 = vmatprep.subr.bf16.mxu1 %v8539_v26  ;;  %v8703_v18 = vpack.c.bf16 %v1757_v17, %v1756_v16 }
  0xbd   :  { %8542 = vmatpush3.bf16.msra.mxu0 %v8539_v26 }
  0xbe   :  { %8200 = vmatprep.subr.mxu0 %v6831_v28 }
  0xbf   :  { %8650 = vmatpush3.bf16.msra.mxu1 %v8539_v26  ;;  %v8706_v26 = vpack.c.bf16 %v1759_v20, %v1758_v19  ;;  %v6951_v19 = vld [vmem:[%s13125_s5 + $0x130] sm:$0xff]  ;;  %v6954_v20 = vld [vmem:[%s13125_s5 + $0x148] sm:$0xff] }
  0xc0   :  { %8353 = vmatprep.subr.mxu1 %v6831_v28 }
  0xc1   :  { %8201 = vmatpush3.msra.mxu0 %v6831_v28 }
  0xc2   :  { %8203 = vmatmul.mubr.msk.f32.vlgmr.msra.gmra.mrb[0].mxu0 %vm73_vm1, %v522_v27  ;;  %8544 = vmatprep.subr.bf16.mxu0 %v8543_v31 }
  0xc3   :  { %8354 = vmatpush3.msra.mxu1 %v6831_v28  ;;  %8546 = vmatpush3.bf16.msra.mxu0 %v8543_v31 }
  0xc4   :  { %8652 = vmatprep.subr.bf16.mxu1 %v8543_v31  ;;  %8356 = vmatmul.mubr.msk.f32.vlgmr.msra.gmra.mrb[0].mxu1 %vm73_vm1, %v1352_v34 }
  0xc5   :  { %8654 = vmatpush3.bf16.msra.mxu1 %v8543_v31  ;;  %8548 = vmatprep.subr.bf16.mxu0 %v8547_v35 }
  0xc6   :  { %8656 = vmatprep.subr.bf16.mxu1 %v8547_v35  ;;  %8219 = vmatprep.mubr.msk.f32.mxu0 %vm73_vm1, %v10474_v21  ;;  %v8555_v21 = vpack.c.bf16 %v6844_v41, %v6843_v40 }
  0xc7   :  { %8550 = vmatpush3.bf16.msra.mxu0 %v8547_v35  ;;  %8372 = vmatprep.mubr.msk.f32.mxu1 %vm73_vm1, %v10488_v23  ;;  %v6845_v23 = vld [vmem:[%s13121_s1 + $0x198] sm:$0xff] }
  0xc8   :  { %8552 = vmatprep.subr.bf16.mxu0 %v8551_v38  ;;  %v8559_v44 = vpack.c.bf16 %v6846_v42, %v6845_v23 }
  0xc9   :  { %8658 = vmatpush3.bf16.msra.mxu1 %v8547_v35 }
  0xca   :  { %8660 = vmatprep.subr.bf16.mxu1 %v8551_v38 }
  0xcb   :  { %8554 = vmatpush3.bf16.msra.mxu0 %v8551_v38 }
  0xcc   :  { %8217 = vmatprep.subr.mxu0 %v6840_v39 }
  0xcd   :  { %8662 = vmatpush3.bf16.msra.mxu1 %v8551_v38 }
  0xce   :  { %8370 = vmatprep.subr.mxu1 %v6840_v39 }
  0xcf   :  { %8218 = vmatpush3.msra.mxu0 %v6840_v39 }
  0xd0   :  { %8556 = vmatprep.subr.bf16.mxu0 %v8555_v21  ;;  %8220 = vmatmul.mubr.msk.f32.vlgmr.msra.gmra.mrb[0].mxu0 %vm73_vm1, %v10479_v22  ;;  %v6849_v22 = vld [vmem:[%s13121_s1 + $0x1b8] sm:$0xff] }
  0xd1   :  { %8371 = vmatpush3.msra.mxu1 %v6840_v39  ;;  %8558 = vmatpush3.bf16.msra.mxu0 %v8555_v21 }
  0xd2   :  { %8664 = vmatprep.subr.bf16.mxu1 %v8555_v21  ;;  %8373 = vmatmul.mubr.msk.f32.vlgmr.msra.gmra.mrb[0].mxu1 %vm73_vm1, %v10493_v24  ;;  %v6852_v24 = vld [vmem:[%s13121_s1 + $0x1c0] sm:$0xff] }
  0xd3   :  { %8666 = vmatpush3.bf16.msra.mxu1 %v8555_v21  ;;  %8560 = vmatprep.subr.bf16.mxu0 %v8559_v44  ;;  %v8567_v51 = vpack.c.bf16 %v6853_v50, %v6852_v24 }
  0xd4   :  { %8668 = vmatprep.subr.bf16.mxu1 %v8559_v44  ;;  %8236 = vmatprep.mubr.msk.f32.mxu0 %vm73_vm1, %v706_v43 }
  0xd5   :  { %8562 = vmatpush3.bf16.msra.mxu0 %v8559_v44  ;;  %8389 = vmatprep.mubr.msk.f32.mxu1 %vm73_vm1, %v1534_v48 }
  0xd6   :  { %8564 = vmatprep.subr.bf16.mxu0 %v8563_v47 }
  0xd7   :  { %8670 = vmatpush3.bf16.msra.mxu1 %v8559_v44 }
  0xd8   :  { %8672 = vmatprep.subr.bf16.mxu1 %v8563_v47 }
  0xd9   :  { %8566 = vmatpush3.bf16.msra.mxu0 %v8563_v47 }
  0xda   :  { %8234 = vmatprep.subr.mxu0 %v6849_v22 }
  0xdb   :  { %8674 = vmatpush3.bf16.msra.mxu1 %v8563_v47 }
  0xdc   :  { %8387 = vmatprep.subr.mxu1 %v6849_v22 }
  0xdd   :  { %8235 = vmatpush3.msra.mxu0 %v6849_v22 }
  0xde   :  { %8237 = vmatmul.mubr.msk.f32.vlgmr.msra.gmra.mrb[0].mxu0 %vm73_vm1, %v708_v49  ;;  %8568 = vmatprep.subr.bf16.mxu0 %v8567_v51 }
  0xdf   :  { %8388 = vmatpush3.msra.mxu1 %v6849_v22  ;;  %8570 = vmatpush3.bf16.msra.mxu0 %v8567_v51 }
  0xe0   :  { %8676 = vmatprep.subr.bf16.mxu1 %v8567_v51  ;;  %8390 = vmatmul.mubr.msk.f32.vlgmr.msra.gmra.mrb[0].mxu1 %vm73_vm1, %v1536_v55 }
  0xe1   :  { %8678 = vmatpush3.bf16.msra.mxu1 %v8567_v51  ;;  %8572 = vmatprep.subr.bf16.mxu0 %v8571_v56 }
  0xe2   :  { %8680 = vmatprep.subr.bf16.mxu1 %v8571_v56  ;;  %8253 = vmatprep.mubr.msk.f32.mxu0 %vm73_vm1, %v799_v54 }
  0xe3   :  { %8574 = vmatpush3.bf16.msra.mxu0 %v8571_v56  ;;  %8406 = vmatprep.mubr.msk.f32.mxu1 %vm73_vm1, %v1626_v60 }
  0xe4   :  { %8576 = vmatprep.subr.bf16.mxu0 %v8575_v59 }
  0xe5   :  { %8682 = vmatpush3.bf16.msra.mxu1 %v8571_v56 }
  0xe6   :  { %8684 = vmatprep.subr.bf16.mxu1 %v8575_v59 }
  0xe7   :  { %8578 = vmatpush3.bf16.msra.mxu0 %v8575_v59 }
  0xe8   :  { %8251 = vmatprep.subr.mxu0 %v6858_v62 }
  0xe9   :  { %8686 = vmatpush3.bf16.msra.mxu1 %v8575_v59 }
  0xea   :  { %8404 = vmatprep.subr.mxu1 %v6858_v62 }
  0xeb   :  { %8252 = vmatpush3.msra.mxu0 %v6858_v62 }
  0xec   :  { %8254 = vmatmul.mubr.msk.f32.vlgmr.msra.gmra.mrb[0].mxu0 %vm73_vm1, %v801_v61  ;;  %8687 = vmatprep.subr.bf16.mxu0 %v10312_v3  ;;  %v6938_v61 = vld [vmem:[%s13125_s5 + $0xc8] sm:$0xff] }
  0xed   :  { %8405 = vmatpush3.msra.mxu1 %v6858_v62  ;;  %8689 = vmatpush3.bf16.msra.mxu0 %v8688_v2  ;;  %v6940_v62 = vld [vmem:[%s13125_s5 + $0xd8] sm:$0xff] }
  0xee   :  { %8407 = vmatmul.mubr.msk.f32.vlgmr.msra.gmra.mrb[0].mxu1 %vm73_vm1, %v1628_v63  ;;  %8708 = vmatprep.subr.bf16.mxu1 %v10312_v3  ;;  %v6937_v63 = vld [vmem:[%s13125_s5 + $0xc0] sm:$0xff]  ;;  %v8729_v0 = vpack.c.bf16 %v6940_v62, %v6938_v61 }
  0xef   :  { %8710 = vmatpush3.bf16.msra.mxu1 %v8688_v2  ;;  %8690 = vmatprep.subr.bf16.mxu0 %v10312_v3  ;;  %v6944_v2 = vld [vmem:[%s13125_s5 + $0xf8] sm:$0xff]  ;;  %v8731_v4 = vpack.c.bf16 %v6939_v1, %v6937_v63 }
  0xf0   :  { %8711 = vmatprep.subr.bf16.mxu1 %v10312_v3  ;;  %8437 = vmatprep.mubr.msk.f32.mxu0 %vm10313_vm2, %v10311_v25 }
  0xf1   :  { %8468 = vmatprep.mubr.msk.f32.mxu1 %vm10313_vm2, %v10311_v25  ;;  %8692 = vmatpush3.bf16.msra.mxu0 %v8691_v6 }
  0xf2   :  { %8693 = vmatprep.subr.bf16.mxu0 %v10312_v3 }
  0xf3   :  { %8713 = vmatpush3.bf16.msra.mxu1 %v8691_v6  ;;  %v6941_v6 = vld [vmem:[%s13125_s5 + $0xe0] sm:$0xff] }
  0xf4   :  { %8714 = vmatprep.subr.bf16.mxu1 %v10312_v3  ;;  %v8735_v10 = vpack.c.bf16 %v6943_v7, %v6941_v6 }
  0xf5   :  { %8695 = vmatpush3.bf16.msra.mxu0 %v8694_v9 }
  0xf6   :  { %8696 = vmatprep.subr.bf16.mxu0 %v10312_v3 }
  0xf7   :  { %8716 = vmatpush3.bf16.msra.mxu1 %v8694_v9  ;;  %v6948_v9 = vld [vmem:[%s13125_s5 + $0x118] sm:$0xff] }
  0xf8   :  { %8717 = vmatprep.subr.bf16.mxu1 %v10312_v3  ;;  %v8737_v11 = vpack.c.bf16 %v6948_v9, %v6946_v8 }
  0xf9   :  { %8698 = vmatpush3.bf16.msra.mxu0 %v8697_v12 }
  0xfa   :  { %8699 = vmatprep.subr.bf16.mxu0 %v10312_v3 }
  0xfb   :  { %8719 = vmatpush3.bf16.msra.mxu1 %v8697_v12  ;;  %v6945_v12 = vld [vmem:[%s13125_s5 + $0x100] sm:$0xff] }
  0xfc   :  { %8720 = vmatprep.subr.bf16.mxu1 %v10312_v3  ;;  %v8739_v16 = vpack.c.bf16 %v6947_v13, %v6945_v12 }
  0xfd   :  { %8701 = vmatpush3.bf16.msra.mxu0 %v8700_v15 }
  0xfe   :  { %8702 = vmatprep.subr.bf16.mxu0 %v10312_v3 }
  0xff   :  { %8722 = vmatpush3.bf16.msra.mxu1 %v8700_v15  ;;  %v6952_v15 = vld [vmem:[%s13125_s5 + $0x138] sm:$0xff] }
 0x100   :  { %8723 = vmatprep.subr.bf16.mxu1 %v10312_v3  ;;  %v8741_v17 = vpack.c.bf16 %v6952_v15, %v6950_v14 }
 0x101   :  { %8704 = vmatpush3.bf16.msra.mxu0 %v8703_v18 }
 0x102   :  { %8705 = vmatprep.subr.bf16.mxu0 %v10312_v3 }
 0x103   :  { %8725 = vmatpush3.bf16.msra.mxu1 %v8703_v18  ;;  %v6949_v18 = vld [vmem:[%s13125_s5 + $0x120] sm:$0xff] }
 0x104   :  { %8726 = vmatprep.subr.bf16.mxu1 %v10312_v3 }
 0x105   :  { %8707 = vmatpush3.bf16.msra.mxu0 %v8706_v26 }
 0x106   :  { %8730 = vmatprep.subr.bf16.mxu0 %v8729_v0 }
 0x107   :  { %8728 = vmatpush3.bf16.msra.mxu1 %v8706_v26  ;;  %v6956_v26 = vld [vmem:[%s13125_s5 + $0x158] sm:$0xff] }
 0x108   :  { %8946 = vmatprep.subr.bf16.mxu1 %v8729_v0 }
 0x1bf   :  { %v8255_v27 = vpop.f32.mrb[0].mxu0 }
 0x1c0   :  { %885 = vst.msk [vmem:[#allocation2 + $0x8] sm:$0x3f] %vm884_vm3, %v8255_v27  ;;  %v872_v28 = vpop.f32.mrb[1].mxu0  ;;  %v8743_v27 = vpack.c.bf16 %v6951_v19, %v6949_v18  ;;  %v1949_v18 = vld [vmem:[%s13125_s5 + $0x10] sm:$0xff]  ;;  %v2975_v19 = vld [vmem:[%s13125_s5 + $0x28] sm:$0xff] }
 0x1c1   :  { %v8408_v29 = vpop.f32.mrb[0].mxu1  ;;  %883 = vst.msk [vmem:[#allocation2] sm:$0xff] %vm36_vm0, %v872_v28  ;;  %v8745_v28 = vpack.c.bf16 %v6956_v26, %v6954_v20  ;;  %v2977_v20 = vld [vmem:[%s13125_s5 + $0x38] sm:$0xff] }
 0x1c2   :  { %1711 = vst.msk [vmem:[#allocation2 + $0x18] sm:$0x3f] %vm884_vm3, %v8408_v29  ;;  %v1699_v30 = vpop.f32.mrb[1].mxu1  ;;  %v6953_v29 = vld [vmem:[%s13125_s5 + $0x140] sm:$0xff] }
 0x1c3   :  { %1710 = vst.msk [vmem:[#allocation2 + $0x10] sm:$0xff] %vm36_vm0, %v1699_v30  ;;  %v6955_v30 = vld [vmem:[%s13125_s5 + $0x150] sm:$0xff] }
 0x1c7   :  { %v10787_v31 = vld [vmem:[#allocation2 + $0x8] sm:$0xff] }
 0x1c8   :  { %v10789_v32 = vld [vmem:[#allocation2] sm:$0xff]  ;;  %v1717_v33 = vsel %vm36_vm0, %v10787_v31, 0.0  ;;  %v1730_v34 = vmul.f32 %v10787_v31, %v10787_v31 }
 0x1c9   :  { %v10795_v35 = vld [vmem:[#allocation2 + $0x18] sm:$0xff]  ;;  %v1716_v36 = vsel %vm36_vm0, %v10789_v32, 0.0  ;;  %v1729_v37 = vmul.f32 %v10789_v32, %v10789_v32 }
 0x1ca   :  { %v10801_v38 = vld [vmem:[#allocation2 + $0x10] sm:$0xff]  ;;  %v1718_v39 = vadd.f32 %v1717_v33, %v1716_v36  ;;  %v1734_v40 = vsel %vm36_vm0, %v1730_v34, 0.0  ;;  %v1732_v23 = vmul.f32 %v10795_v35, %v10795_v35  ;;  %v1721_v45 = vsel %vm36_vm0, %v10795_v35, 0.0  ;;  %v6958_v33 = vld [vmem:[%s13125_s5 + $0x168] sm:$0xff]  ;;  %v6960_v34 = vld [vmem:[%s13125_s5 + $0x178] sm:$0xff] }
 0x1cb   :  { %v1719_v41 = vsel %vm36_vm0, %v10801_v38, 0.0  ;;  %v1731_v21 = vmul.f32 %v10801_v38, %v10801_v38  ;;  %v1733_v42 = vsel %vm36_vm0, %v1729_v37, 0.0  ;;  %v8747_v36 = vpack.c.bf16 %v6955_v30, %v6953_v29  ;;  %v1953_v29 = vld [vmem:[%s13125_s5 + $0x30] sm:$0xff] }
 0x1cc   :  { %v1720_v43 = vadd.f32 %v1719_v41, %v1718_v39  ;;  %v1735_v44 = vadd.f32 %v1734_v40, %v1733_v42  ;;  %v1738_v49 = vsel %vm36_vm0, %v1732_v23, 0.0  ;;  %v8749_v37 = vpack.c.bf16 %v6960_v34, %v6958_v33  ;;  %v6957_v39 = vld [vmem:[%s13125_s5 + $0x160] sm:$0xff]  ;;  %v6959_v40 = vld [vmem:[%s13125_s5 + $0x170] sm:$0xff]  ;;  %v1948_v41 = vld [vmem:[%s13125_s5 + $0x8] sm:$0xff] }
 0x1cd   :  { %v1736_v46 = vsel %vm36_vm0, %v1731_v21, 0.0  ;;  %v1950_v21 = vld [vmem:[%s13125_s5 + $0x18] sm:$0xff]  ;;  %v8751_v23 = vpack.c.bf16 %v6959_v40, %v6957_v39  ;;  %v2979_v34 = vld [vmem:[%s13125_s5 + $0x48] sm:$0xff]  ;;  %v11004_v39 = vld [vmem:[#allocation3 + $0x10] sm:$0xff] }
 0x1ce   :  { %v1722_v47 = vadd.f32 %v1721_v45, %v1720_v43  ;;  %v1737_v48 = vadd.f32 %v1736_v46, %v1735_v44  ;;  %v8753_v42 = vpack.c.bf16 %v1950_v21, %v1948_v41  ;;  %v1955_v41 = vld [vmem:[%s13125_s5 + $0x40] sm:$0xff]  ;;  %v1957_v21 = vld [vmem:[%s13125_s5 + $0x50] sm:$0xff] }
 0x1d0   :  { %v1723_v22 = vrot.slane %v1722_v47, 4  ;;  %v1739_v24 = vadd.f32 %v1738_v49, %v1737_v48 }
 0x1d2   :  { %v1724_v50 = vadd.f32 %v1723_v22, %v1722_v47  ;;  %v1740_v51 = vrot.slane %v1739_v24, 4 }
 0x1d4   :  { %v1725_v52 = vrot.slane %v1724_v50, 2  ;;  %v1741_v53 = vadd.f32 %v1740_v51, %v1739_v24 }
 0x1d6   :  { %v1726_v54 = vadd.f32 %v1725_v52, %v1724_v50  ;;  %v1742_v55 = vrot.slane %v1741_v53, 2  ;;  %v1918_v50 = vlaneseq  ;;  %v1910_v52 = vld [vmem:[%s13123_s3] sm:$0x1]  ;;  %s10314_s3 = smov 112  }
 0x1d8   :  { %v1727_v56 = vrot.slane %v1726_v54, 1  ;;  %v1743_v57 = vadd.f32 %v1742_v55, %v1741_v53  ;;  %v10897_v51 = vshrl.u32 %v1918_v50, 7 }
 0x1da   :  { %v1728_v58 = vadd.f32 %v1727_v56, %v1726_v54  ;;  %v1744_v59 = vrot.slane %v1743_v57, 1  ;;  %v10903_v53 = vsub.s32 0, %v10897_v51  ;;  %v1914_v56 = vld [vmem:[%s13124_s4] sm:$0x1] }
 0x1dc   :  { %8438 = vmatmul.mubr.msk.f32.vlgmr.msra.gmra.mrb[2].mxu0 %vm36_vm0, %v1728_v58  ;;  %v1745_v60 = vadd.f32 %v1744_v59, %v1743_v57 }
 0x1dd   :  { %2071 = vmatprep.mubr.f32.mxu0 %v10311_v25  ;;  %8732 = vmatpush1.bf16.msra.mxu0 %v8731_v4 }
 0x1de   :  { %8469 = vmatmul.mubr.msk.f32.vlgmr.msra.gmra.mrb[2].mxu1 %vm36_vm0, %v1745_v60 }
 0x1df   :  { %3092 = vmatprep.mubr.f32.mxu1 %v10311_v25  ;;  %v6942_v25 = vld [vmem:[%s13125_s5 + $0xe8] sm:$0xff]  ;;  %8948 = vmatpush1.bf16.msra.mxu1 %v8731_v4 }
 0x1e0   :  { %v8733_v5 = vpack.c.bf16 %v6944_v2, %v6942_v25 }
 0x1e2   :  { %8734 = vmatprep.subr.bf16.mxu0 %v8733_v5  ;;  %8950 = vmatprep.subr.bf16.mxu1 %v8733_v5 }
 0x1e3   :  { %8736 = vmatpush1.bf16.msra.mxu0 %v8735_v10  ;;  %8952 = vmatpush1.bf16.msra.mxu1 %v8735_v10 }
 0x1e4   :  { %8738 = vmatprep.subr.bf16.mxu0 %v8737_v11  ;;  %8954 = vmatprep.subr.bf16.mxu1 %v8737_v11 }
 0x1e7   :  { %8740 = vmatpush1.bf16.msra.mxu0 %v8739_v16  ;;  %8956 = vmatpush1.bf16.msra.mxu1 %v8739_v16 }
 0x1e8   :  { %8742 = vmatprep.subr.bf16.mxu0 %v8741_v17  ;;  %8958 = vmatprep.subr.bf16.mxu1 %v8741_v17  ;;  %v1947_v17 = vld [vmem:[%s13125_s5] sm:$0xff] }
 0x1e9   :  { %v8755_v26 = vpack.c.bf16 %v1949_v18, %v1947_v17  ;;  %v7184_v17 = vld [vmem:[%s13125_s5 + $0x1c8] sm:$0xff]  ;;  %v7186_v18 = vld [vmem:[%s13125_s5 + $0x1d8] sm:$0xff] }
 0x1eb   :  { %8744 = vmatpush1.bf16.msra.mxu0 %v8743_v27  ;;  %8960 = vmatpush1.bf16.msra.mxu1 %v8743_v27  ;;  %v8973_v27 = vpack.c.bf16 %v2977_v20, %v2975_v19  ;;  %v9001_v20 = vpack.c.bf16 %v7186_v18, %v7184_v17  ;;  %v7008_v17 = vld [vmem:[%s13125_s5 + $0x2c8] sm:$0xff]  ;;  %v7010_v18 = vld [vmem:[%s13125_s5 + $0x2d8] sm:$0xff] }
 0x1ec   :  { %8746 = vmatprep.subr.bf16.mxu0 %v8745_v28  ;;  %8962 = vmatprep.subr.bf16.mxu1 %v8745_v28  ;;  %v1951_v28 = vld [vmem:[%s13125_s5 + $0x20] sm:$0xff] }
 0x1ef   :  { %8748 = vmatpush1.bf16.msra.mxu0 %v8747_v36  ;;  %8964 = vmatpush1.bf16.msra.mxu1 %v8747_v36  ;;  %v2981_v36 = vld [vmem:[%s13125_s5 + $0x58] sm:$0xff] }
 0x1f0   :  { %8750 = vmatprep.subr.bf16.mxu0 %v8749_v37  ;;  %8966 = vmatprep.subr.bf16.mxu1 %v8749_v37  ;;  %v8759_v37 = vpack.c.bf16 %v1953_v29, %v1951_v28  ;;  %v8977_v40 = vpack.c.bf16 %v2981_v36, %v2979_v34 }
 0x1f3   :  { %8752 = vmatpush1.bf16.msra.mxu0 %v8751_v23  ;;  %8968 = vmatpush1.bf16.msra.mxu1 %v8751_v23 }
 0x1f4   :  { %8754 = vmatprep.subr.bf16.mxu0 %v8753_v42  ;;  %8970 = vmatprep.subr.bf16.mxu1 %v8753_v42 }
 0x2af   :  { %v1829_v43 = vpop.f32.mrb[2].mxu0 }
 0x2b0   :  { %v1833_v44 = vmul.f32 0.0025510204, %v1829_v43  ;;  %v8439_v45 = vpop.f32.mrb[3].mxu0  ;;  %v2983_v43 = vld [vmem:[%s13125_s5 + $0x68] sm:$0xff] }
 0x2b1   :  { %v1903_v46 = vpop.f32.mrb[2].mxu1  ;;  %v8763_v45 = vpack.c.bf16 %v1957_v21, %v1955_v41  ;;  %v7196_v41 = vld [vmem:[%s13125_s5 + $0x228] sm:$0xff]  ;;  %v7198_v21 = vld [vmem:[%s13125_s5 + $0x238] sm:$0xff] }
 0x2b2   :  { %v1908_v47 = vmul.f32 %v1833_v44, %v1833_v44  ;;  %v1907_v48 = vmul.f32 0.0025510204, %v1903_v46  ;;  %v8470_v49 = vpop.f32.mrb[3].mxu1 }
 0x2b3   :  { %v2987_v49 = vld [vmem:[%s13125_s5 + $0x88] sm:$0xff] }
 0x2b4   :  { %v1909_v22 = vsub.f32 %v1907_v48, %v1908_v47  ;;  %v1959_v47 = vld [vmem:[%s13125_s5 + $0x60] sm:$0xff]  ;;  %v1961_v48 = vld [vmem:[%s13125_s5 + $0x70] sm:$0xff] }
 0x2b6   :  { %v1911_v24 = vadd.f32 1e-05, %v1909_v22  ;;  %v2989_v22 = vld [vmem:[%s13125_s5 + $0x98] sm:$0xff] }
 0x2b7   :  { %v8985_v50 = vpack.c.bf16 %v2989_v22, %v2987_v49  ;;  %v6991_v49 = vld [vmem:[%s13125_s5 + $0x240] sm:$0xff]  ;;  %v6993_v22 = vld [vmem:[%s13125_s5 + $0x250] sm:$0xff] }
 0x2b8   :  { %10269 = vrsqrt.f32 %v1911_v24  ;;  %v8767_v24 = vpack.c.bf16 %v1961_v48, %v1959_v47 }
 0x2c2   :  { %v10270_v54 = vpop.eup %10269 }
 0x2c3   :  { %v1913_v55 = vmul.f32 %v10270_v54, %v1910_v52  ;;  %v1963_v52 = vld [vmem:[%s13125_s5 + $0x80] sm:$0xff]  ;;  %v1965_v54 = vld [vmem:[%s13125_s5 + $0x90] sm:$0xff] }
 0x2c5   :  { %v1915_v57 = vmul.f32 %v1913_v55, %v1833_v44  ;;  %v1921_v58 = vrot.slane %v1913_v55, %v10903_v53  ;;  %v2985_v44 = vld [vmem:[%s13125_s5 + $0x78] sm:$0xff]  ;;  %v2991_v55 = vld [vmem:[%s13125_s5 + $0xa8] sm:$0xff] }
 0x2c6   :  { %v8981_v46 = vpack.c.bf16 %v2985_v44, %v2983_v43  ;;  %v6985_v43 = vld [vmem:[%s13125_s5 + $0x220] sm:$0xff]  ;;  %v6987_v44 = vld [vmem:[%s13125_s5 + $0x230] sm:$0xff] }
 0x2c7   :  { %v1916_v59 = vsub.f32 %v1914_v56, %v1915_v57  ;;  %v1923_v60 = vmul.f32 %v1921_v58, %v10789_v32  ;;  %v1924_v61 = vmul.f32 %v1921_v58, %v10787_v31  ;;  %v1925_v62 = vmul.f32 %v1921_v58, %v10801_v38  ;;  %v2993_v56 = vld [vmem:[%s13125_s5 + $0xb8] sm:$0xff] }
 0x2c8   :  { %v1926_v63 = vmul.f32 %v1921_v58, %v10795_v35  ;;  %v8771_v57 = vpack.c.bf16 %v1965_v54, %v1963_v52  ;;  %v8989_v58 = vpack.c.bf16 %v2993_v56, %v2991_v55  ;;  %v8799_v47 = vpack.c.bf16 %v6987_v44, %v6985_v43  ;;  %v6995_v56 = vld [vmem:[%s13125_s5 + $0x260] sm:$0xff]  ;;  %v7023_v43 = vld [vmem:[%s13125_s5 + $0x330] sm:$0xff] }
 0x2c9   :  { %v1931_v0 = vrot.slane %v1916_v59, %v10903_v53  ;;  %v1967_v59 = vld [vmem:[%s13125_s5 + $0xa0] sm:$0xff]  ;;  %v8803_v55 = vpack.c.bf16 %v6993_v22, %v6991_v49  ;;  %v7027_v22 = vld [vmem:[%s13125_s5 + $0x350] sm:$0xff] }
 0x2ca   :  { %v7025_v49 = vld [vmem:[%s13125_s5 + $0x340] sm:$0xff] }
 0x2cb   :  { %v1933_v1 = vadd.f32 %v1931_v0, %v1923_v60  ;;  %v1934_v25 = vadd.f32 %v1931_v0, %v1924_v61  ;;  %v1935_v2 = vadd.f32 %v1931_v0, %v1925_v62  ;;  %v1936_v4 = vadd.f32 %v1931_v0, %v1926_v63  ;;  %v1969_v60 = vld [vmem:[%s13125_s5 + $0xb0] sm:$0xff]  ;;  %v7176_v61 = vld [vmem:[%s13125_s5 + $0x188] sm:$0xff]  ;;  %v7178_v62 = vld [vmem:[%s13125_s5 + $0x198] sm:$0xff] }
 0x2cc   :  { %v8775_v63 = vpack.c.bf16 %v1969_v60, %v1967_v59  ;;  %v8993_v0 = vpack.c.bf16 %v7178_v62, %v7176_v61  ;;  %v7000_v59 = vld [vmem:[%s13125_s5 + $0x288] sm:$0xff]  ;;  %v7002_v60 = vld [vmem:[%s13125_s5 + $0x298] sm:$0xff] }
 0x2cd   :  { %v1937_v5 = vmax.f32 %v1933_v1, 0.0  ;;  %v1938_v6 = vmax.f32 %v1934_v25, 0.0  ;;  %v1939_v7 = vmax.f32 %v1935_v2, 0.0  ;;  %v1940_v8 = vmax.f32 %v1936_v4, 0.0  ;;  %v6965_v1 = vld [vmem:[%s13125_s5 + $0x180] sm:$0xff]  ;;  %v6967_v25 = vld [vmem:[%s13125_s5 + $0x190] sm:$0xff] }
 0x2ce   :  { %v7180_v2 = vld [vmem:[%s13125_s5 + $0x1a8] sm:$0xff]  ;;  %v7182_v4 = vld [vmem:[%s13125_s5 + $0x1b8] sm:$0xff]  ;;  %v8809_v62 = vpack.c.bf16 %v7002_v60, %v7000_v59 }
 0x2cf   :  { %1941 = vst.msk [vmem:[#allocation2] sm:$0xff] %vm36_vm0, %v1937_v5  ;;  %1942 = vst.msk [vmem:[#allocation2 + $0x8] sm:$0xff] %vm36_vm0, %v1938_v6  ;;  %v8779_v5 = vpack.c.bf16 %v6967_v25, %v6965_v1  ;;  %v6969_v6 = vld [vmem:[%s13125_s5 + $0x1a0] sm:$0xff]  ;;  %v7038_v59 = vld [vmem:[%s13125_s5 + $0x3a8] sm:$0xff] }
 0x2d0   :  { %1943 = vst.msk [vmem:[#allocation2 + $0x10] sm:$0xff] %vm36_vm0, %v1939_v7  ;;  %1944 = vst.msk [vmem:[#allocation2 + $0x18] sm:$0xff] %vm36_vm0, %v1940_v8  ;;  %v6971_v7 = vld [vmem:[%s13125_s5 + $0x1b0] sm:$0xff]  ;;  %v8997_v8 = vpack.c.bf16 %v7182_v4, %v7180_v2  ;;  %v7004_v2 = vld [vmem:[%s13125_s5 + $0x2a8] sm:$0xff] }
 0x2d1   :  { %v8783_v19 = vpack.c.bf16 %v6971_v7, %v6969_v6  ;;  %v7006_v4 = vld [vmem:[%s13125_s5 + $0x2b8] sm:$0xff]  ;;  %v7003_v7 = vld [vmem:[%s13125_s5 + $0x2a0] sm:$0xff] }
 0x2d2   :  { %v8813_v6 = vpack.c.bf16 %v7006_v4, %v7004_v2  ;;  %v7040_v60 = vld [vmem:[%s13125_s5 + $0x3b8] sm:$0xff] }
 0x2d3   :  { %v7046_v2 = vld [vmem:[%s13125_s5 + $0x3d8] sm:$0xff] }
 0x2d6   :  { %v10920_v32 = vld [vmem:[#allocation2] sm:$0xff]  ;;  %v10928_v38 = vld [vmem:[#allocation2 + $0x8] sm:$0xf] }
 0x2d7   :  { %v10918_v31 = vld [vmem:[#allocation2 + $0x10] sm:$0xff]  ;;  %1998 = vrot.lane.b32.xlu0 %v10920_v32, %s10310_s14  ;;  %v10926_v35 = vld [vmem:[#allocation2 + $0x18] sm:$0xf]  ;;  %v10940_v10 = vld [vmem:[#allocation2 + $0x1] sm:$0xff] }
 0x2d8   :  { %3020 = vrot.lane.b32.xlu1 %v10918_v31, %s10310_s14  ;;  %v10938_v9 = vld [vmem:[#allocation2 + $0x11] sm:$0xff]  ;;  %v10946_v11 = vld [vmem:[#allocation2 + $0x9] sm:$0xf]  ;;  %v10951_v12 = vld [vmem:[#allocation2 + $0x19] sm:$0xf] }
 0x2d9   :  { %v10958_v13 = vld [vmem:[#allocation2 + $0x12] sm:$0xff]  ;;  %v10960_v14 = vld [vmem:[#allocation2 + $0x2] sm:$0xff]  ;;  %v10966_v15 = vld [vmem:[#allocation2 + $0xa] sm:$0xf] }
 0x2da   :  { %v10971_v16 = vld [vmem:[#allocation2 + $0x1a] sm:$0xf] }
 0x2db   :  { %2000 = vrot.lane.b32.xlu0 %v10928_v38, %s10310_s14 }
 0x2dc   :  { %3022 = vrot.lane.b32.xlu1 %v10926_v35, %s10310_s14 }
 0x2df   :  { %2190 = vrot.lane.b32.xlu0 %v10920_v32, %s10314_s3 }
 0x2e0   :  { %3210 = vrot.lane.b32.xlu1 %v10918_v31, %s10314_s3 }
 0x2e3   :  { %2192 = vrot.lane.b32.xlu0 %v10928_v38, %s10314_s3 }
 0x2e4   :  { %3212 = vrot.lane.b32.xlu1 %v10926_v35, %s10314_s3 }
 0x2e7   :  { %2418 = vrot.lane.b32.xlu0 %v10940_v10, %s10310_s14 }
 0x2e8   :  { %3436 = vrot.lane.b32.xlu1 %v10938_v9, %s10310_s14 }
 0x2eb   :  { %2420 = vrot.lane.b32.xlu0 %v10946_v11, %s10310_s14 }
 0x2ec   :  { %2532 = vrot.lane.b32.xlu1 %v10940_v10, %s10314_s3 }
 0x2ef   :  { %3438 = vrot.lane.b32.xlu0 %v10951_v12, %s10310_s14 }
 0x2f0   :  { %3549 = vrot.lane.b32.xlu1 %v10938_v9, %s10314_s3 }
 0x2f3   :  { %2534 = vrot.lane.b32.xlu0 %v10946_v11, %s10314_s3 }
 0x2f4   :  { %3551 = vrot.lane.b32.xlu1 %v10951_v12, %s10314_s3 }
 0x2f7   :  { %2760 = vrot.lane.b32.xlu0 %v10960_v14, %s10310_s14 }
 0x2f8   :  { %3775 = vrot.lane.b32.xlu1 %v10958_v13, %s10310_s14 }
 0x2fb   :  { %2762 = vrot.lane.b32.xlu0 %v10966_v15, %s10310_s14 }
 0x2fc   :  { %2874 = vrot.lane.b32.xlu1 %v10960_v14, %s10314_s3 }
 0x2ff   :  { %3777 = vrot.lane.b32.xlu0 %v10971_v16, %s10310_s14 }
 0x300   :  { %2876 = vrot.lane.b32.xlu1 %v10966_v15, %s10314_s3 }
 0x303   :  { %3888 = vrot.lane.b32.xlu0 %v10958_v13, %s10314_s3 }
 0x304   :  { %3890 = vrot.lane.b32.xlu1 %v10971_v16, %s10314_s3 }
 0x349   :  { %v1999_v33 = vpop.permute.xlu0 %1998 }
 0x34a   :  { %v3021_v30 = vpop.permute.xlu1 %3020  ;;  %6961 = vmatmul.mubr.msk.f32.vlgmr.msra.gmra.mrb[4].mxu0 %vm2002_vm4, %v1999_v33  ;;  %v6979_v33 = vld [vmem:[%s13125_s5 + $0x1f0] sm:$0xff] }
 0x34b   :  { %7171 = vmatmul.mubr.msk.f32.vlgmr.msra.gmra.mrb[4].mxu1 %vm2002_vm4, %v3021_v30  ;;  %8756 = vmatpush1.bf16.msra.mxu0 %v8755_v26  ;;  %v6977_v30 = vld [vmem:[%s13125_s5 + $0x1e0] sm:$0xff] }
 0x34c   :  { %8972 = vmatpush1.bf16.msra.mxu1 %v8755_v26  ;;  %3098 = vmatprep.mubr.f32.mxu1 %v11004_v39  ;;  %v6973_v26 = vld [vmem:[%s13125_s5 + $0x1c0] sm:$0xff]  ;;  %v8791_v34 = vpack.c.bf16 %v6979_v33, %v6977_v30  ;;  %v7013_v33 = vld [vmem:[%s13125_s5 + $0x2f0] sm:$0xff] }
 0x34d   :  { %8974 = vmatprep.subr.bf16.mxu1 %v8973_v27  ;;  %2077 = vmatprep.mubr.f32.mxu0 %v11004_v39  ;;  %v2001_v42 = vpop.permute.xlu0 %2000  ;;  %v7011_v30 = vld [vmem:[%s13125_s5 + $0x2e0] sm:$0xff] }
 0x34e   :  { %v3023_v23 = vpop.permute.xlu1 %3022  ;;  %8758 = vmatprep.subr.bf16.mxu0 %v8973_v27  ;;  %6962 = vmatmul.mubr.msk.f32.gmra.mrb[6].mxu0 %vm2002_vm4, %v2001_v42  ;;  %v6975_v27 = vld [vmem:[%s13125_s5 + $0x1d0] sm:$0xff]  ;;  %v9013_v42 = vpack.c.bf16 %v7198_v21, %v7196_v41  ;;  %v7022_v41 = vld [vmem:[%s13125_s5 + $0x328] sm:$0xff]  ;;  %v7024_v21 = vld [vmem:[%s13125_s5 + $0x338] sm:$0xff] }
 0x34f   :  { %7172 = vmatmul.mubr.msk.f32.gmra.mrb[6].mxu1 %vm2002_vm4, %v3023_v23  ;;  %8760 = vmatpush1.bf16.msra.mxu0 %v8759_v37  ;;  %v8787_v28 = vpack.c.bf16 %v6975_v27, %v6973_v26  ;;  %v7007_v26 = vld [vmem:[%s13125_s5 + $0x2c0] sm:$0xff]  ;;  %v7009_v27 = vld [vmem:[%s13125_s5 + $0x2d0] sm:$0xff]  ;;  %v8829_v44 = vpack.c.bf16 %v7024_v21, %v7022_v41 }
 0x350   :  { %8976 = vmatpush1.bf16.msra.mxu1 %v8759_v37  ;;  %8762 = vmatprep.subr.bf16.mxu0 %v8977_v40  ;;  %v6981_v37 = vld [vmem:[%s13125_s5 + $0x200] sm:$0xff]  ;;  %v7057_v21 = vld [vmem:[%s13125_s5 + $0x430] sm:$0xff] }
 0x351   :  { %8978 = vmatprep.subr.bf16.mxu1 %v8977_v40  ;;  %2152 = vmatprep.mubr.f32.mxu0 %v11004_v39  ;;  %v6983_v40 = vld [vmem:[%s13125_s5 + $0x210] sm:$0xff]  ;;  %v2191_v54 = vpop.permute.xlu0 %2190  ;;  %v7055_v41 = vld [vmem:[%s13125_s5 + $0x420] sm:$0xff] }
 0x352   :  { %3173 = vmatprep.mubr.f32.mxu1 %v11004_v39  ;;  %v8795_v23 = vpack.c.bf16 %v6983_v40, %v6981_v37  ;;  %v3211_v52 = vpop.permute.xlu1 %3210  ;;  %v7017_v37 = vld [vmem:[%s13125_s5 + $0x300] sm:$0xff]  ;;  %v7019_v40 = vld [vmem:[%s13125_s5 + $0x310] sm:$0xff] }
 0x353   :  { %8764 = vmatpush1.bf16.msra.mxu0 %v8763_v45 }
 0x354   :  { %8980 = vmatpush1.bf16.msra.mxu1 %v8763_v45  ;;  %8766 = vmatprep.subr.bf16.mxu0 %v8981_v46  ;;  %v6992_v45 = vld [vmem:[%s13125_s5 + $0x248] sm:$0xff] }
 0x355   :  { %8982 = vmatprep.subr.bf16.mxu1 %v8981_v46  ;;  %v6994_v46 = vld [vmem:[%s13125_s5 + $0x258] sm:$0xff]  ;;  %v2193_v25 = vpop.permute.xlu0 %2192 }
 0x356   :  { %v8801_v48 = vpack.c.bf16 %v6994_v46, %v6992_v45  ;;  %v3213_v1 = vpop.permute.xlu1 %3212  ;;  %v7026_v45 = vld [vmem:[%s13125_s5 + $0x348] sm:$0xff]  ;;  %v7028_v46 = vld [vmem:[%s13125_s5 + $0x358] sm:$0xff] }
 0x357   :  { %8768 = vmatpush1.bf16.msra.mxu0 %v8767_v24 }
 0x358   :  { %8984 = vmatpush1.bf16.msra.mxu1 %v8767_v24  ;;  %8770 = vmatprep.subr.bf16.mxu0 %v8985_v50  ;;  %v6996_v24 = vld [vmem:[%s13125_s5 + $0x268] sm:$0xff] }
 0x359   :  { %8986 = vmatprep.subr.bf16.mxu1 %v8985_v50  ;;  %v6998_v50 = vld [vmem:[%s13125_s5 + $0x278] sm:$0xff] }
 0x35b   :  { %8772 = vmatpush1.bf16.msra.mxu0 %v8771_v57 }
 0x35c   :  { %8988 = vmatpush1.bf16.msra.mxu1 %v8771_v57  ;;  %8774 = vmatprep.subr.bf16.mxu0 %v8989_v58  ;;  %v6997_v57 = vld [vmem:[%s13125_s5 + $0x270] sm:$0xff] }
 0x35d   :  { %8990 = vmatprep.subr.bf16.mxu1 %v8989_v58  ;;  %v8805_v58 = vpack.c.bf16 %v6998_v50, %v6996_v24  ;;  %v8807_v61 = vpack.c.bf16 %v6997_v57, %v6995_v56  ;;  %v8835_v24 = vpack.c.bf16 %v7027_v22, %v7025_v49  ;;  %v7033_v57 = vld [vmem:[%s13125_s5 + $0x380] sm:$0xff] }
 0x35f   :  { %8776 = vmatpush1.bf16.msra.mxu0 %v8775_v63 }
 0x360   :  { %8992 = vmatpush1.bf16.msra.mxu1 %v8775_v63  ;;  %8778 = vmatprep.subr.bf16.mxu0 %v8993_v0  ;;  %v6999_v63 = vld [vmem:[%s13125_s5 + $0x280] sm:$0xff] }
 0x361   :  { %8994 = vmatprep.subr.bf16.mxu1 %v8993_v0  ;;  %v7001_v0 = vld [vmem:[%s13125_s5 + $0x290] sm:$0xff] }
 0x362   :  { %6963 = vmatmul.mubr.msk.f32.vlgmr.msra.gmra.mrb[4].mxu0 %vm2002_vm4, %v10920_v32  ;;  %v7190_v32 = vld [vmem:[%s13125_s5 + $0x1f8] sm:$0xff] }
 0x363   :  { %7173 = vmatmul.mubr.msk.f32.vlgmr.msra.gmra.mrb[4].mxu1 %vm2002_vm4, %v10918_v31  ;;  %8780 = vmatpush1.bf16.msra.mxu0 %v8779_v5  ;;  %v7188_v31 = vld [vmem:[%s13125_s5 + $0x1e8] sm:$0xff] }
 0x364   :  { %8996 = vmatpush1.bf16.msra.mxu1 %v8779_v5  ;;  %2158 = vmatprep.mubr.f32.mxu0 %v11004_v39  ;;  %v9005_v29 = vpack.c.bf16 %v7190_v32, %v7188_v31  ;;  %v8811_v5 = vpack.c.bf16 %v7001_v0, %v6999_v63  ;;  %v7012_v31 = vld [vmem:[%s13125_s5 + $0x2e8] sm:$0xff]  ;;  %v7014_v32 = vld [vmem:[%s13125_s5 + $0x2f8] sm:$0xff]  ;;  %v7037_v63 = vld [vmem:[%s13125_s5 + $0x3a0] sm:$0xff] }
 0x365   :  { %3179 = vmatprep.mubr.f32.mxu1 %v11004_v39  ;;  %8998 = vmatprep.subr.bf16.mxu1 %v8997_v8  ;;  %v7039_v0 = vld [vmem:[%s13125_s5 + $0x3b0] sm:$0xff] }
 0x366   :  { %8782 = vmatprep.subr.bf16.mxu0 %v8997_v8  ;;  %6964 = vmatmul.mubr.msk.f32.gmra.mrb[6].mxu0 %vm2002_vm4, %v10928_v38  ;;  %v7194_v38 = vld [vmem:[%s13125_s5 + $0x218] sm:$0xff]  ;;  %v7005_v8 = vld [vmem:[%s13125_s5 + $0x2b0] sm:$0xff]  ;;  %v8847_v4 = vpack.c.bf16 %v7039_v0, %v7037_v63  ;;  %v7078_v63 = vld [vmem:[%s13125_s5 + $0x4c8] sm:$0xff] }
 0x367   :  { %7174 = vmatmul.mubr.msk.f32.gmra.mrb[6].mxu1 %vm2002_vm4, %v10926_v35  ;;  %8784 = vmatpush1.bf16.msra.mxu0 %v8783_v19  ;;  %v7192_v35 = vld [vmem:[%s13125_s5 + $0x208] sm:$0xff]  ;;  %v7080_v0 = vld [vmem:[%s13125_s5 + $0x4d8] sm:$0xff] }
 0x368   :  { %9000 = vmatpush1.bf16.msra.mxu1 %v8783_v19  ;;  %8786 = vmatprep.subr.bf16.mxu0 %v9001_v20  ;;  %v9009_v36 = vpack.c.bf16 %v7194_v38, %v7192_v35  ;;  %v8815_v19 = vpack.c.bf16 %v7005_v8, %v7003_v7  ;;  %v7018_v35 = vld [vmem:[%s13125_s5 + $0x308] sm:$0xff]  ;;  %v7020_v38 = vld [vmem:[%s13125_s5 + $0x318] sm:$0xff]  ;;  %v7045_v7 = vld [vmem:[%s13125_s5 + $0x3d0] sm:$0xff] }
 0x369   :  { %9002 = vmatprep.subr.bf16.mxu1 %v9001_v20  ;;  %2262 = vmatprep.mubr.f32.mxu0 %v11004_v39  ;;  %v8817_v20 = vpack.c.bf16 %v7010_v18, %v7008_v17  ;;  %v7048_v8 = vld [vmem:[%s13125_s5 + $0x3e8] sm:$0xff]  ;;  %v7050_v17 = vld [vmem:[%s13125_s5 + $0x3f8] sm:$0xff] }
 0x36a   :  { %3282 = vmatprep.mubr.f32.mxu1 %v11004_v39 }
 0x36b   :  { %8788 = vmatpush1.bf16.msra.mxu0 %v8787_v28 }
 0x36c   :  { %9004 = vmatpush1.bf16.msra.mxu1 %v8787_v28  ;;  %8790 = vmatprep.subr.bf16.mxu0 %v9005_v29  ;;  %v8819_v28 = vpack.c.bf16 %v7009_v27, %v7007_v26  ;;  %v7049_v26 = vld [vmem:[%s13125_s5 + $0x3f0] sm:$0xff]  ;;  %v3437_v27 = vpop.permute.xlu1 %3436 }
 0x36d   :  { %9006 = vmatprep.subr.bf16.mxu1 %v9005_v29  ;;  %v8821_v29 = vpack.c.bf16 %v7014_v32, %v7012_v31  ;;  %v8853_v31 = vpack.c.bf16 %v7050_v17, %v7048_v8  ;;  %v7052_v32 = vld [vmem:[%s13125_s5 + $0x408] sm:$0xff]  ;;  %v7084_v8 = vld [vmem:[%s13125_s5 + $0x4f8] sm:$0xff] }
 0x36f   :  { %8792 = vmatpush1.bf16.msra.mxu0 %v8791_v34 }
 0x370   :  { %9008 = vmatpush1.bf16.msra.mxu1 %v8791_v34  ;;  %8794 = vmatprep.subr.bf16.mxu0 %v9009_v36  ;;  %v8823_v34 = vpack.c.bf16 %v7013_v33, %v7011_v30  ;;  %v7051_v33 = vld [vmem:[%s13125_s5 + $0x400] sm:$0xff] }
 0x371   :  { %9010 = vmatprep.subr.bf16.mxu1 %v9009_v36  ;;  %v8825_v36 = vpack.c.bf16 %v7020_v38, %v7018_v35  ;;  %v7053_v35 = vld [vmem:[%s13125_s5 + $0x410] sm:$0xff] }
 0x373   :  { %8796 = vmatpush1.bf16.msra.mxu0 %v8795_v23 }
 0x374   :  { %9012 = vmatpush1.bf16.msra.mxu1 %v8795_v23  ;;  %8798 = vmatprep.subr.bf16.mxu0 %v9013_v42  ;;  %v8827_v23 = vpack.c.bf16 %v7019_v40, %v7017_v37  ;;  %v8859_v37 = vpack.c.bf16 %v7053_v35, %v7051_v33  ;;  %v7092_v33 = vld [vmem:[%s13125_s5 + $0x538] sm:$0xff] }
 0x375   :  { %9014 = vmatprep.subr.bf16.mxu1 %v9013_v42  ;;  %v7021_v42 = vld [vmem:[%s13125_s5 + $0x320] sm:$0xff] }
 0x377   :  { %8800 = vmatpush1.bf16.msra.mxu0 %v8799_v47 }
 0x378   :  { %9016 = vmatpush1.bf16.msra.mxu1 %v8799_v47  ;;  %8802 = vmatprep.subr.bf16.mxu0 %v8801_v48  ;;  %v8831_v47 = vpack.c.bf16 %v7023_v43, %v7021_v42  ;;  %v7062_v42 = vld [vmem:[%s13125_s5 + $0x458] sm:$0xff]  ;;  %v8863_v43 = vpack.c.bf16 %v7057_v21, %v7055_v41 }
 0x379   :  { %9018 = vmatprep.subr.bf16.mxu1 %v8801_v48  ;;  %v8833_v48 = vpack.c.bf16 %v7028_v46, %v7026_v45  ;;  %v7059_v45 = vld [vmem:[%s13125_s5 + $0x440] sm:$0xff]  ;;  %v7061_v46 = vld [vmem:[%s13125_s5 + $0x450] sm:$0xff] }
 0x37a   :  { %6989 = vmatmul.mubr.msk.f32.vlgmr.msra.gmra.mrb[4].mxu0 %vm2002_vm4, %v2191_v54  ;;  %v7031_v54 = vld [vmem:[%s13125_s5 + $0x370] sm:$0xff]  ;;  %v8867_v49 = vpack.c.bf16 %v7061_v46, %v7059_v45  ;;  %v7099_v46 = vld [vmem:[%s13125_s5 + $0x560] sm:$0xff] }
 0x37b   :  { %7199 = vmatmul.mubr.msk.f32.vlgmr.msra.gmra.mrb[4].mxu1 %vm2002_vm4, %v3211_v52  ;;  %8804 = vmatpush1.bf16.msra.mxu0 %v8803_v55  ;;  %v7029_v52 = vld [vmem:[%s13125_s5 + $0x360] sm:$0xff] }
 0x37c   :  { %9020 = vmatpush1.bf16.msra.mxu1 %v8803_v55  ;;  %2268 = vmatprep.mubr.f32.mxu0 %v11004_v39  ;;  %v8839_v55 = vpack.c.bf16 %v7031_v54, %v7029_v52  ;;  %v7072_v52 = vld [vmem:[%s13125_s5 + $0x498] sm:$0xff] }
 0x37d   :  { %3288 = vmatprep.mubr.f32.mxu1 %v11004_v39  ;;  %8806 = vmatprep.subr.bf16.mxu0 %v8805_v58 }
 0x37e   :  { %9022 = vmatprep.subr.bf16.mxu1 %v8805_v58  ;;  %6990 = vmatmul.mubr.msk.f32.gmra.mrb[6].mxu0 %vm2002_vm4, %v2193_v25  ;;  %v7035_v58 = vld [vmem:[%s13125_s5 + $0x390] sm:$0xff]  ;;  %v7044_v25 = vld [vmem:[%s13125_s5 + $0x3c8] sm:$0xff] }
 0x37f   :  { %7200 = vmatmul.mubr.msk.f32.gmra.mrb[6].mxu1 %vm2002_vm4, %v3213_v1  ;;  %8808 = vmatpush1.bf16.msra.mxu0 %v8807_v61  ;;  %v2419_v1 = vpop.permute.xlu0 %2418 }
 0x380   :  { %9024 = vmatpush1.bf16.msra.mxu1 %v8807_v61  ;;  %8810 = vmatprep.subr.bf16.mxu0 %v8809_v62  ;;  %v8843_v61 = vpack.c.bf16 %v7035_v58, %v7033_v57  ;;  %v7076_v57 = vld [vmem:[%s13125_s5 + $0x4b8] sm:$0xff] }
 0x381   :  { %9026 = vmatprep.subr.bf16.mxu1 %v8809_v62  ;;  %2376 = vmatprep.mubr.f32.mxu0 %v11004_v39  ;;  %v8845_v62 = vpack.c.bf16 %v7040_v60, %v7038_v59  ;;  %v7073_v60 = vld [vmem:[%s13125_s5 + $0x4a0] sm:$0xff] }
 0x382   :  { %3395 = vmatprep.mubr.f32.mxu1 %v11004_v39 }
 0x383   :  { %8812 = vmatpush1.bf16.msra.mxu0 %v8811_v5  ;;  %v2421_v18 = vpop.permute.xlu0 %2420 }
 0x384   :  { %9028 = vmatpush1.bf16.msra.mxu1 %v8811_v5  ;;  %8814 = vmatprep.subr.bf16.mxu0 %v8813_v6  ;;  %v8849_v5 = vpack.c.bf16 %v7046_v2, %v7044_v25  ;;  %v8881_v25 = vpack.c.bf16 %v7080_v0, %v7078_v63  ;;  %v7077_v2 = vld [vmem:[%s13125_s5 + $0x4c0] sm:$0xff]  ;;  %v7117_v0 = vld [vmem:[%s13125_s5 + $0x5f0] sm:$0xff] }
 0x385   :  { %9030 = vmatprep.subr.bf16.mxu1 %v8813_v6  ;;  %v7043_v6 = vld [vmem:[%s13125_s5 + $0x3c0] sm:$0xff] }
 0x386   :  { %v7115_v63 = vld [vmem:[%s13125_s5 + $0x5e0] sm:$0xff] }
 0x387   :  { %8816 = vmatpush1.bf16.msra.mxu0 %v8815_v19  ;;  %v3439_v38 = vpop.permute.xlu0 %3438 }
 0x388   :  { %9032 = vmatpush1.bf16.msra.mxu1 %v8815_v19  ;;  %8818 = vmatprep.subr.bf16.mxu0 %v8817_v20  ;;  %v8851_v19 = vpack.c.bf16 %v7045_v7, %v7043_v6  ;;  %v7082_v7 = vld [vmem:[%s13125_s5 + $0x4e8] sm:$0xff] }
 0x389   :  { %9034 = vmatprep.subr.bf16.mxu1 %v8817_v20  ;;  %v7047_v20 = vld [vmem:[%s13125_s5 + $0x3e0] sm:$0xff] }
 0x38b   :  { %8820 = vmatpush1.bf16.msra.mxu0 %v8819_v28  ;;  %v2535_v6 = vpop.permute.xlu0 %2534 }
 0x38c   :  { %9036 = vmatpush1.bf16.msra.mxu1 %v8819_v28  ;;  %8822 = vmatprep.subr.bf16.mxu0 %v8821_v29  ;;  %v7054_v28 = vld [vmem:[%s13125_s5 + $0x418] sm:$0xff] }
 0x38d   :  { %9038 = vmatprep.subr.bf16.mxu1 %v8821_v29  ;;  %v8855_v29 = vpack.c.bf16 %v7049_v26, %v7047_v20  ;;  %v8857_v30 = vpack.c.bf16 %v7054_v28, %v7052_v32  ;;  %v7083_v20 = vld [vmem:[%s13125_s5 + $0x4f0] sm:$0xff]  ;;  %v7086_v26 = vld [vmem:[%s13125_s5 + $0x508] sm:$0xff]  ;;  %v7085_v28 = vld [vmem:[%s13125_s5 + $0x500] sm:$0xff] }
 0x38f   :  { %8824 = vmatpush1.bf16.msra.mxu0 %v8823_v34 }
 0x390   :  { %9040 = vmatpush1.bf16.msra.mxu1 %v8823_v34  ;;  %8826 = vmatprep.subr.bf16.mxu0 %v8825_v36  ;;  %v7056_v34 = vld [vmem:[%s13125_s5 + $0x428] sm:$0xff] }
 0x391   :  { %9042 = vmatprep.subr.bf16.mxu1 %v8825_v36  ;;  %v7058_v36 = vld [vmem:[%s13125_s5 + $0x438] sm:$0xff] }
 0x392   :  { %7015 = vmatmul.mubr.msk.f32.vlgmr.msra.gmra.mrb[4].mxu0 %vm2002_vm4, %v10940_v10  ;;  %v7032_v10 = vld [vmem:[%s13125_s5 + $0x378] sm:$0xff]  ;;  %v8861_v40 = vpack.c.bf16 %v7058_v36, %v7056_v34  ;;  %v7089_v34 = vld [vmem:[%s13125_s5 + $0x520] sm:$0xff]  ;;  %v7091_v36 = vld [vmem:[%s13125_s5 + $0x530] sm:$0xff] }
 0x393   :  { %7225 = vmatmul.mubr.msk.f32.vlgmr.msra.gmra.mrb[4].mxu1 %vm2002_vm4, %v10938_v9  ;;  %8828 = vmatpush1.bf16.msra.mxu0 %v8827_v23  ;;  %v7030_v9 = vld [vmem:[%s13125_s5 + $0x368] sm:$0xff]  ;;  %v8895_v41 = vpack.c.bf16 %v7091_v36, %v7089_v34 }
 0x394   :  { %9044 = vmatpush1.bf16.msra.mxu1 %v8827_v23  ;;  %2382 = vmatprep.mubr.f32.mxu0 %v11004_v39  ;;  %v8837_v50 = vpack.c.bf16 %v7032_v10, %v7030_v9  ;;  %v7060_v23 = vld [vmem:[%s13125_s5 + $0x448] sm:$0xff]  ;;  %v7063_v9 = vld [vmem:[%s13125_s5 + $0x460] sm:$0xff]  ;;  %v7065_v10 = vld [vmem:[%s13125_s5 + $0x470] sm:$0xff] }
 0x395   :  { %3401 = vmatprep.mubr.f32.mxu1 %v11004_v39  ;;  %8830 = vmatprep.subr.bf16.mxu0 %v8829_v44  ;;  %v8871_v54 = vpack.c.bf16 %v7065_v10, %v7063_v9  ;;  %v7134_v34 = vld [vmem:[%s13125_s5 + $0x668] sm:$0xff] }
 0x396   :  { %9046 = vmatprep.subr.bf16.mxu1 %v8829_v44  ;;  %7016 = vmatmul.mubr.msk.f32.gmra.mrb[6].mxu0 %vm2002_vm4, %v10946_v11  ;;  %v7034_v11 = vld [vmem:[%s13125_s5 + $0x388] sm:$0xff]  ;;  %v8865_v44 = vpack.c.bf16 %v7062_v42, %v7060_v23  ;;  %v7095_v23 = vld [vmem:[%s13125_s5 + $0x540] sm:$0xff]  ;;  %v7097_v42 = vld [vmem:[%s13125_s5 + $0x550] sm:$0xff] }
 0x397   :  { %7226 = vmatmul.mubr.msk.f32.gmra.mrb[6].mxu1 %vm2002_vm4, %v10951_v12  ;;  %8832 = vmatpush1.bf16.msra.mxu0 %v8831_v47  ;;  %v7036_v12 = vld [vmem:[%s13125_s5 + $0x398] sm:$0xff]  ;;  %v8899_v45 = vpack.c.bf16 %v7097_v42, %v7095_v23  ;;  %v11606_v42 = vld [vmem:[#allocation3 + $0x10] sm:$0xff] }
 0x398   :  { %9048 = vmatpush1.bf16.msra.mxu1 %v8831_v47  ;;  %8834 = vmatprep.subr.bf16.mxu0 %v8833_v48  ;;  %v8841_v56 = vpack.c.bf16 %v7036_v12, %v7034_v11  ;;  %v7064_v47 = vld [vmem:[%s13125_s5 + $0x468] sm:$0xff]  ;;  %v7069_v12 = vld [vmem:[%s13125_s5 + $0x480] sm:$0xff]  ;;  %v7140_v23 = vld [vmem:[%s13125_s5 + $0x698] sm:$0xff]  ;;  %43 = vst.msk [vmem:[#allocation3 + $0x8] sm:$0xff] %vm42_vm5, %v11606_v42 }
 0x399   :  { %9050 = vmatprep.subr.bf16.mxu1 %v8833_v48  ;;  %2490 = vmatprep.mubr.f32.mxu0 %v11004_v39  ;;  %v7066_v48 = vld [vmem:[%s13125_s5 + $0x478] sm:$0xff]  ;;  %45 = vst.msk [vmem:[#allocation3 + $0x18] sm:$0xff] %vm42_vm5, %v11606_v42  ;;  %47 = vst.msk [vmem:[#allocation3 + $0x28] sm:$0xff] %vm42_vm5, %v11606_v42 }
 0x39a   :  { %3508 = vmatprep.mubr.f32.mxu1 %v11004_v39  ;;  %v8869_v22 = vpack.c.bf16 %v7066_v48, %v7064_v47  ;;  %v7101_v47 = vld [vmem:[%s13125_s5 + $0x570] sm:$0xff]  ;;  %49 = vst.msk [vmem:[#allocation3 + $0x38] sm:$0xff] %vm42_vm5, %v11606_v42 }
 0x39b   :  { %8836 = vmatpush1.bf16.msra.mxu0 %v8835_v24  ;;  %v8903_v9 = vpack.c.bf16 %v7101_v47, %v7099_v46  ;;  %v7139_v46 = vld [vmem:[%s13125_s5 + $0x690] sm:$0xff]  ;;  %v7142_v47 = vld [vmem:[%s13125_s5 + $0x6a8] sm:$0xff] }
 0x39c   :  { %9052 = vmatpush1.bf16.msra.mxu1 %v8835_v24  ;;  %8838 = vmatprep.subr.bf16.mxu0 %v8837_v50  ;;  %v2533_v24 = vpop.permute.xlu1 %2532 }
 0x39d   :  { %9054 = vmatprep.subr.bf16.mxu1 %v8837_v50  ;;  %v7070_v50 = vld [vmem:[%s13125_s5 + $0x488] sm:$0xff] }
 0x39e   :  { %v8873_v11 = vpack.c.bf16 %v7072_v52, %v7070_v50  ;;  %v7105_v50 = vld [vmem:[%s13125_s5 + $0x590] sm:$0xff] }
 0x39f   :  { %8840 = vmatpush1.bf16.msra.mxu0 %v8839_v55 }
 0x3a0   :  { %9056 = vmatpush1.bf16.msra.mxu1 %v8839_v55  ;;  %8842 = vmatprep.subr.bf16.mxu0 %v8841_v56  ;;  %v7071_v55 = vld [vmem:[%s13125_s5 + $0x490] sm:$0xff]  ;;  %v3550_v58 = vpop.permute.xlu1 %3549 }
 0x3a1   :  { %9058 = vmatprep.subr.bf16.mxu1 %v8841_v56  ;;  %v7074_v56 = vld [vmem:[%s13125_s5 + $0x4a8] sm:$0xff]  ;;  %v8875_v59 = vpack.c.bf16 %v7071_v55, %v7069_v12  ;;  %v7109_v12 = vld [vmem:[%s13125_s5 + $0x5b0] sm:$0xff] }
 0x3a3   :  { %8844 = vmatpush1.bf16.msra.mxu0 %v8843_v61 }
 0x3a4   :  { %9060 = vmatpush1.bf16.msra.mxu1 %v8843_v61  ;;  %8846 = vmatprep.subr.bf16.mxu0 %v8845_v62  ;;  %v7075_v61 = vld [vmem:[%s13125_s5 + $0x4b0] sm:$0xff] }
 0x3a5   :  { %9062 = vmatprep.subr.bf16.mxu1 %v8845_v62  ;;  %v8877_v62 = vpack.c.bf16 %v7076_v57, %v7074_v56  ;;  %v7111_v57 = vld [vmem:[%s13125_s5 + $0x5c0] sm:$0xff] }
 0x3a7   :  { %8848 = vmatpush1.bf16.msra.mxu0 %v8847_v4 }
 0x3a8   :  { %9064 = vmatpush1.bf16.msra.mxu1 %v8847_v4  ;;  %8850 = vmatprep.subr.bf16.mxu0 %v8849_v5  ;;  %v7079_v4 = vld [vmem:[%s13125_s5 + $0x4d0] sm:$0xff] }
 0x3a9   :  { %9066 = vmatprep.subr.bf16.mxu1 %v8849_v5  ;;  %v3552_v5 = vpop.permute.xlu1 %3551  ;;  %v8883_v17 = vpack.c.bf16 %v7079_v4, %v7077_v2  ;;  %v7124_v2 = vld [vmem:[%s13125_s5 + $0x618] sm:$0xff]  ;;  %v8919_v4 = vpack.c.bf16 %v7117_v0, %v7115_v63 }
 0x3aa   :  { %7041 = vmatmul.mubr.msk.f32.vlgmr.msra.gmra.mrb[4].mxu0 %vm2002_vm4, %v2419_v1  ;;  %v8879_v1 = vpack.c.bf16 %v7075_v61, %v7073_v60  ;;  %v7118_v60 = vld [vmem:[%s13125_s5 + $0x5f8] sm:$0xff] }
 0x3ab   :  { %7251 = vmatmul.mubr.msk.f32.vlgmr.msra.gmra.mrb[4].mxu1 %vm2002_vm4, %v3437_v27  ;;  %8852 = vmatpush1.bf16.msra.mxu0 %v8851_v19  ;;  %v7088_v27 = vld [vmem:[%s13125_s5 + $0x518] sm:$0xff] }
 0x3ac   :  { %9068 = vmatpush1.bf16.msra.mxu1 %v8851_v19  ;;  %2496 = vmatprep.mubr.f32.mxu0 %v11004_v39  ;;  %v7081_v19 = vld [vmem:[%s13125_s5 + $0x4e0] sm:$0xff]  ;;  %v8889_v32 = vpack.c.bf16 %v7088_v27, %v7086_v26  ;;  %v7127_v26 = vld [vmem:[%s13125_s5 + $0x630] sm:$0xff] }
 0x3ad   :  { %3514 = vmatprep.mubr.f32.mxu1 %v11004_v39  ;;  %8854 = vmatprep.subr.bf16.mxu0 %v8853_v31  ;;  %v3776_v27 = vpop.permute.xlu1 %3775 }
 0x3ae   :  { %9070 = vmatprep.subr.bf16.mxu1 %v8853_v31  ;;  %7042 = vmatmul.mubr.msk.f32.gmra.mrb[6].mxu0 %vm2002_vm4, %v2421_v18  ;;  %v8885_v18 = vpack.c.bf16 %v7084_v8, %v7082_v7  ;;  %v8887_v31 = vpack.c.bf16 %v7083_v20, %v7081_v19  ;;  %v7123_v7 = vld [vmem:[%s13125_s5 + $0x610] sm:$0xff]  ;;  %v7126_v8 = vld [vmem:[%s13125_s5 + $0x628] sm:$0xff]  ;;  %v7125_v20 = vld [vmem:[%s13125_s5 + $0x620] sm:$0xff] }
 0x3af   :  { %7252 = vmatmul.mubr.msk.f32.gmra.mrb[6].mxu1 %vm2002_vm4, %v3439_v38  ;;  %8856 = vmatpush1.bf16.msra.mxu0 %v8855_v29 }
 0x3b0   :  { %9072 = vmatpush1.bf16.msra.mxu1 %v8855_v29  ;;  %8858 = vmatprep.subr.bf16.mxu0 %v8857_v30  ;;  %v7087_v29 = vld [vmem:[%s13125_s5 + $0x510] sm:$0xff] }
 0x3b1   :  { %9074 = vmatprep.subr.bf16.mxu1 %v8857_v30  ;;  %2604 = vmatprep.mubr.f32.mxu0 %v11004_v39  ;;  %v7090_v30 = vld [vmem:[%s13125_s5 + $0x528] sm:$0xff]  ;;  %v8891_v35 = vpack.c.bf16 %v7087_v29, %v7085_v28  ;;  %v7132_v28 = vld [vmem:[%s13125_s5 + $0x658] sm:$0xff]  ;;  %v8927_v29 = vpack.c.bf16 %v7127_v26, %v7125_v20  ;;  %v4057_v26 = vld [vmem:[%s13126_s6 + $0x80] sm:$0xff] }
 0x3b2   :  { %3621 = vmatprep.mubr.f32.mxu1 %v11004_v39  ;;  %v8893_v38 = vpack.c.bf16 %v7092_v33, %v7090_v30  ;;  %v7129_v33 = vld [vmem:[%s13125_s5 + $0x640] sm:$0xff] }
 0x3b3   :  { %8860 = vmatpush1.bf16.msra.mxu0 %v8859_v37 }
 0x3b4   :  { %9076 = vmatpush1.bf16.msra.mxu1 %v8859_v37  ;;  %8862 = vmatprep.subr.bf16.mxu0 %v8861_v40  ;;  %v7096_v37 = vld [vmem:[%s13125_s5 + $0x548] sm:$0xff] }
 0x3b5   :  { %9078 = vmatprep.subr.bf16.mxu1 %v8861_v40  ;;  %v7098_v40 = vld [vmem:[%s13125_s5 + $0x558] sm:$0xff] }
 0x3b6   :  { %v8897_v21 = vpack.c.bf16 %v7098_v40, %v7096_v37  ;;  %v7133_v40 = vld [vmem:[%s13125_s5 + $0x660] sm:$0xff] }
 0x3b7   :  { %8864 = vmatpush1.bf16.msra.mxu0 %v8863_v43 }
 0x3b8   :  { %9080 = vmatpush1.bf16.msra.mxu1 %v8863_v43  ;;  %8866 = vmatprep.subr.bf16.mxu0 %v8865_v44  ;;  %v7100_v43 = vld [vmem:[%s13125_s5 + $0x568] sm:$0xff] }
 0x3b9   :  { %9082 = vmatprep.subr.bf16.mxu1 %v8865_v44  ;;  %v7102_v44 = vld [vmem:[%s13125_s5 + $0x578] sm:$0xff] }
 0x3ba   :  { %v8901_v48 = vpack.c.bf16 %v7102_v44, %v7100_v43 }
 0x3bb   :  { %8868 = vmatpush1.bf16.msra.mxu0 %v8867_v49 }
 0x3bc   :  { %9084 = vmatpush1.bf16.msra.mxu1 %v8867_v49  ;;  %8870 = vmatprep.subr.bf16.mxu0 %v8869_v22  ;;  %v7104_v49 = vld [vmem:[%s13125_s5 + $0x588] sm:$0xff] }
 0x3bd   :  { %9086 = vmatprep.subr.bf16.mxu1 %v8869_v22  ;;  %v7106_v22 = vld [vmem:[%s13125_s5 + $0x598] sm:$0xff] }
 0x3be   :  { %v8905_v10 = vpack.c.bf16 %v7106_v22, %v7104_v49 }
 0x3bf   :  { %8872 = vmatpush1.bf16.msra.mxu0 %v8871_v54 }
 0x3c0   :  { %9088 = vmatpush1.bf16.msra.mxu1 %v8871_v54  ;;  %8874 = vmatprep.subr.bf16.mxu0 %v8873_v11 }
 0x3c1   :  { %9090 = vmatprep.subr.bf16.mxu1 %v8873_v11  ;;  %v7107_v11 = vld [vmem:[%s13125_s5 + $0x5a0] sm:$0xff] }
 0x3c2   :  { %7067 = vmatmul.mubr.msk.f32.vlgmr.msra.gmra.mrb[4].mxu0 %vm2002_vm4, %v2533_v24  ;;  %v7103_v24 = vld [vmem:[%s13125_s5 + $0x580] sm:$0xff]  ;;  %v8911_v55 = vpack.c.bf16 %v7109_v12, %v7107_v11  ;;  %v4043_v11 = vld [vmem:[%s13126_s6 + $0x10] sm:$0xff]  ;;  %v4046_v12 = vld [vmem:[%s13126_s6 + $0x28] sm:$0xff] }
 0x3c3   :  { %7277 = vmatmul.mubr.msk.f32.vlgmr.msra.gmra.mrb[4].mxu1 %vm2002_vm4, %v3550_v58  ;;  %8876 = vmatpush1.bf16.msra.mxu0 %v8875_v59  ;;  %v8907_v52 = vpack.c.bf16 %v7105_v50, %v7103_v24  ;;  %v7113_v58 = vld [vmem:[%s13125_s5 + $0x5d0] sm:$0xff]  ;;  %v2875_v24 = vpop.permute.xlu1 %2874  ;;  %v4042_v50 = vld [vmem:[%s13126_s6 + $0x8] sm:$0xff] }
 0x3c4   :  { %9092 = vmatpush1.bf16.msra.mxu1 %v8875_v59  ;;  %2610 = vmatprep.mubr.f32.mxu0 %v11004_v39  ;;  %v7116_v59 = vld [vmem:[%s13125_s5 + $0x5e8] sm:$0xff]  ;;  %v8915_v61 = vpack.c.bf16 %v7113_v58, %v7111_v57  ;;  %v4045_v58 = vld [vmem:[%s13126_s6 + $0x20] sm:$0xff] }
 0x3c5   :  { %3627 = vmatprep.mubr.f32.mxu1 %v11004_v39  ;;  %8878 = vmatprep.subr.bf16.mxu0 %v8877_v62 }
 0x3c6   :  { %9094 = vmatprep.subr.bf16.mxu1 %v8877_v62  ;;  %7068 = vmatmul.mubr.msk.f32.gmra.mrb[6].mxu0 %vm2002_vm4, %v2535_v6  ;;  %v8917_v62 = vpack.c.bf16 %v7118_v60, %v7116_v59  ;;  %v7121_v6 = vld [vmem:[%s13125_s5 + $0x600] sm:$0xff]  ;;  %v4047_v59 = vld [vmem:[%s13126_s6 + $0x30] sm:$0xff]  ;;  %v4050_v60 = vld [vmem:[%s13126_s6 + $0x48] sm:$0xff] }
 0x3c7   :  { %7278 = vmatmul.mubr.msk.f32.gmra.mrb[6].mxu1 %vm2002_vm4, %v3552_v5  ;;  %8880 = vmatpush1.bf16.msra.mxu0 %v8879_v1  ;;  %v8923_v19 = vpack.c.bf16 %v7123_v7, %v7121_v6  ;;  %v4053_v7 = vld [vmem:[%s13126_s6 + $0x60] sm:$0xff] }
 0x3c8   :  { %9096 = vmatpush1.bf16.msra.mxu1 %v8879_v1  ;;  %8882 = vmatprep.subr.bf16.mxu0 %v8881_v25  ;;  %v2761_v1 = vpop.permute.xlu0 %2760 }
 0x3c9   :  { %9098 = vmatprep.subr.bf16.mxu1 %v8881_v25  ;;  %2718 = vmatprep.mubr.f32.mxu0 %v11004_v39  ;;  %v7122_v25 = vld [vmem:[%s13125_s5 + $0x608] sm:$0xff] }
 0x3ca   :  { %3734 = vmatprep.mubr.f32.mxu1 %v11004_v39  ;;  %v8921_v5 = vpack.c.bf16 %v7124_v2, %v7122_v25  ;;  %v4051_v25 = vld [vmem:[%s13126_s6 + $0x50] sm:$0xff]  ;;  %v4054_v2 = vld [vmem:[%s13126_s6 + $0x68] sm:$0xff] }
 0x3cb   :  { %8884 = vmatpush1.bf16.msra.mxu0 %v8883_v17 }
 0x3cc   :  { %9100 = vmatpush1.bf16.msra.mxu1 %v8883_v17  ;;  %8886 = vmatprep.subr.bf16.mxu0 %v8885_v18  ;;  %v7128_v17 = vld [vmem:[%s13125_s5 + $0x638] sm:$0xff] }
 0x3cd   :  { %9102 = vmatprep.subr.bf16.mxu1 %v8885_v18  ;;  %v2763_v18 = vpop.permute.xlu0 %2762 }
 0x3cf   :  { %8888 = vmatpush1.bf16.msra.mxu0 %v8887_v31 }
 0x3d0   :  { %9104 = vmatpush1.bf16.msra.mxu1 %v8887_v31  ;;  %8890 = vmatprep.subr.bf16.mxu0 %v8889_v32  ;;  %v8925_v31 = vpack.c.bf16 %v7128_v17, %v7126_v8  ;;  %v4055_v8 = vld [vmem:[%s13126_s6 + $0x70] sm:$0xff] }
 0x3d1   :  { %9106 = vmatprep.subr.bf16.mxu1 %v8889_v32  ;;  %v7130_v32 = vld [vmem:[%s13125_s5 + $0x648] sm:$0xff]  ;;  %v9175_v17 = vpack.c.bf16 %v4055_v8, %v4053_v7 }
 0x3d2   :  { %v8929_v30 = vpack.c.bf16 %v7132_v28, %v7130_v32  ;;  %v4062_v32 = vld [vmem:[%s13126_s6 + $0xa8] sm:$0xff]  ;;  %v4064_v28 = vld [vmem:[%s13126_s6 + $0xb8] sm:$0xff] }
 0x3d3   :  { %8892 = vmatpush1.bf16.msra.mxu0 %v8891_v35 }
 0x3d4   :  { %9108 = vmatpush1.bf16.msra.mxu1 %v8891_v35  ;;  %8894 = vmatprep.subr.bf16.mxu0 %v8893_v38  ;;  %v7131_v35 = vld [vmem:[%s13125_s5 + $0x650] sm:$0xff] }
 0x3d5   :  { %9110 = vmatprep.subr.bf16.mxu1 %v8893_v38  ;;  %v3778_v38 = vpop.permute.xlu0 %3777  ;;  %v8931_v36 = vpack.c.bf16 %v7131_v35, %v7129_v33  ;;  %v4063_v33 = vld [vmem:[%s13126_s6 + $0xb0] sm:$0xff]  ;;  %v4066_v35 = vld [vmem:[%s13126_s6 + $0xc8] sm:$0xff] }
 0x3d7   :  { %8896 = vmatpush1.bf16.msra.mxu0 %v8895_v41 }
 0x3d8   :  { %9112 = vmatpush1.bf16.msra.mxu1 %v8895_v41  ;;  %8898 = vmatprep.subr.bf16.mxu0 %v8897_v21  ;;  %v7135_v41 = vld [vmem:[%s13125_s5 + $0x670] sm:$0xff] }
 0x3d9   :  { %9114 = vmatprep.subr.bf16.mxu1 %v8897_v21  ;;  %v7138_v21 = vld [vmem:[%s13125_s5 + $0x688] sm:$0xff]  ;;  %v8935_v43 = vpack.c.bf16 %v7135_v41, %v7133_v40  ;;  %v4072_v41 = vld [vmem:[%s13126_s6 + $0xf8] sm:$0xff] }
 0x3da   :  { %7093 = vmatmul.mubr.msk.f32.vlgmr.msra.gmra.mrb[4].mxu0 %vm2002_vm4, %v10960_v14  ;;  %v7110_v14 = vld [vmem:[%s13125_s5 + $0x5b8] sm:$0xff]  ;;  %v8937_v44 = vpack.c.bf16 %v7140_v23, %v7138_v21  ;;  %v4070_v40 = vld [vmem:[%s13126_s6 + $0xe8] sm:$0xff] }
 0x3db   :  { %7303 = vmatmul.mubr.msk.f32.vlgmr.msra.gmra.mrb[4].mxu1 %vm2002_vm4, %v10958_v13  ;;  %8900 = vmatpush1.bf16.msra.mxu0 %v8899_v45  ;;  %v7108_v13 = vld [vmem:[%s13125_s5 + $0x5a8] sm:$0xff]  ;;  %v9189_v23 = vpack.c.bf16 %v4072_v41, %v4070_v40 }
 0x3dc   :  { %9116 = vmatpush1.bf16.msra.mxu1 %v8899_v45  ;;  %2724 = vmatprep.mubr.f32.mxu0 %v11004_v39  ;;  %v8909_v54 = vpack.c.bf16 %v7110_v14, %v7108_v13  ;;  %v7137_v45 = vld [vmem:[%s13125_s5 + $0x680] sm:$0xff]  ;;  %v4044_v13 = vld [vmem:[%s13126_s6 + $0x18] sm:$0xff] }
 0x3dd   :  { %3740 = vmatprep.mubr.f32.mxu1 %v11004_v39  ;;  %8902 = vmatprep.subr.bf16.mxu0 %v8901_v48  ;;  %v8939_v49 = vpack.c.bf16 %v7139_v46, %v7137_v45  ;;  %v4076_v45 = vld [vmem:[%s13126_s6 + $0x118] sm:$0xff] }
 0x3de   :  { %9118 = vmatprep.subr.bf16.mxu1 %v8901_v48  ;;  %7094 = vmatmul.mubr.msk.f32.gmra.mrb[6].mxu0 %vm2002_vm4, %v10966_v15  ;;  %v7112_v15 = vld [vmem:[%s13125_s5 + $0x5c8] sm:$0xff]  ;;  %v7144_v48 = vld [vmem:[%s13125_s5 + $0x6b8] sm:$0xff] }
 0x3df   :  { %7304 = vmatmul.mubr.msk.f32.gmra.mrb[6].mxu1 %vm2002_vm4, %v10971_v16  ;;  %8904 = vmatpush1.bf16.msra.mxu0 %v8903_v9  ;;  %v7114_v16 = vld [vmem:[%s13125_s5 + $0x5d8] sm:$0xff]  ;;  %v8941_v22 = vpack.c.bf16 %v7144_v48, %v7142_v47  ;;  %v4073_v48 = vld [vmem:[%s13126_s6 + $0x100] sm:$0xff] }
 0x3e0   :  { %9120 = vmatpush1.bf16.msra.mxu1 %v8903_v9  ;;  %8906 = vmatprep.subr.bf16.mxu0 %v8905_v10  ;;  %v8913_v56 = vpack.c.bf16 %v7114_v16, %v7112_v15  ;;  %v7141_v9 = vld [vmem:[%s13125_s5 + $0x6a0] sm:$0xff]  ;;  %v4048_v15 = vld [vmem:[%s13126_s6 + $0x38] sm:$0xff]  ;;  %v2877_v16 = vpop.permute.xlu1 %2876 }
 0x3e1   :  { %9122 = vmatprep.subr.bf16.mxu1 %v8905_v10  ;;  %2832 = vmatprep.mubr.f32.mxu0 %v11004_v39  ;;  %v7143_v10 = vld [vmem:[%s13125_s5 + $0x6b0] sm:$0xff]  ;;  %v9165_v57 = vpack.c.bf16 %v4048_v15, %v4046_v12  ;;  %v4081_v12 = vld [vmem:[%s13126_s6 + $0x140] sm:$0xff] }
 0x3e2   :  { %3847 = vmatprep.mubr.f32.mxu1 %v11004_v39  ;;  %v8943_v14 = vpack.c.bf16 %v7143_v10, %v7141_v9  ;;  %v4080_v9 = vld [vmem:[%s13126_s6 + $0x138] sm:$0xff]  ;;  %v4083_v15 = vld [vmem:[%s13126_s6 + $0x150] sm:$0xff] }
 0x3e3   :  { %8908 = vmatpush1.bf16.msra.mxu0 %v8907_v52 }
 0x3e4   :  { %9124 = vmatpush1.bf16.msra.mxu1 %v8907_v52  ;;  %8910 = vmatprep.subr.bf16.mxu0 %v8909_v54  ;;  %v9161_v52 = vpack.c.bf16 %v4044_v13, %v4042_v50  ;;  %v3891_v63 = vpop.permute.xlu1 %3890  ;;  %v4077_v50 = vld [vmem:[%s13126_s6 + $0x120] sm:$0xff]  ;;  %v4079_v13 = vld [vmem:[%s13126_s6 + $0x130] sm:$0xff] }
 0x3e5   :  { %9126 = vmatprep.subr.bf16.mxu1 %v8909_v54  ;;  %v4041_v54 = vld [vmem:[%s13126_s6] sm:$0xff] }
 0x3e7   :  { %8912 = vmatpush1.bf16.msra.mxu0 %v8911_v55 }
 0x3e8   :  { %9128 = vmatpush1.bf16.msra.mxu1 %v8911_v55  ;;  %8914 = vmatprep.subr.bf16.mxu0 %v8913_v56  ;;  %v9163_v55 = vpack.c.bf16 %v4043_v11, %v4041_v54  ;;  %v9199_v54 = vpack.c.bf16 %v4079_v13, %v4077_v50 }
 0x3e9   :  { %9130 = vmatprep.subr.bf16.mxu1 %v8913_v56  ;;  %v3889_v56 = vpop.permute.xlu0 %3888 }
 0x3eb   :  { %8916 = vmatpush1.bf16.msra.mxu0 %v8915_v61 }
 0x3ec   :  { %9132 = vmatpush1.bf16.msra.mxu1 %v8915_v61  ;;  %8918 = vmatprep.subr.bf16.mxu0 %v8917_v62  ;;  %v4052_v61 = vld [vmem:[%s13126_s6 + $0x58] sm:$0xff] }
 0x3ed   :  { %9134 = vmatprep.subr.bf16.mxu1 %v8917_v62  ;;  %v9167_v62 = vpack.c.bf16 %v4047_v59, %v4045_v58  ;;  %v9169_v0 = vpack.c.bf16 %v4052_v61, %v4050_v60  ;;  %v4085_v58 = vld [vmem:[%s13126_s6 + $0x160] sm:$0xff]  ;;  %v4087_v59 = vld [vmem:[%s13126_s6 + $0x170] sm:$0xff] }
 0x3ee   :  { %v9207_v60 = vpack.c.bf16 %v4087_v59, %v4085_v58 }
 0x3ef   :  { %8920 = vmatpush1.bf16.msra.mxu0 %v8919_v4 }
 0x3f0   :  { %9136 = vmatpush1.bf16.msra.mxu1 %v8919_v4  ;;  %8922 = vmatprep.subr.bf16.mxu0 %v8921_v5  ;;  %v4056_v4 = vld [vmem:[%s13126_s6 + $0x78] sm:$0xff] }
 0x3f1   :  { %9138 = vmatprep.subr.bf16.mxu1 %v8921_v5  ;;  %v9173_v6 = vpack.c.bf16 %v4056_v4, %v4054_v2 }
 0x3f2   :  { %7119 = vmatmul.mubr.msk.f32.vlgmr.msra.gmra.mrb[4].mxu0 %vm2002_vm4, %v2761_v1  ;;  %v4049_v1 = vld [vmem:[%s13126_s6 + $0x40] sm:$0xff] }
 0x3f3   :  { %7329 = vmatmul.mubr.msk.f32.vlgmr.msra.gmra.mrb[4].mxu1 %vm2002_vm4, %v3776_v27  ;;  %8924 = vmatpush1.bf16.msra.mxu0 %v8923_v19  ;;  %v9171_v5 = vpack.c.bf16 %v4051_v25, %v4049_v1  ;;  %v4059_v27 = vld [vmem:[%s13126_s6 + $0x90] sm:$0xff] }
 0x3f4   :  { %9140 = vmatpush1.bf16.msra.mxu1 %v8923_v19  ;;  %2838 = vmatprep.mubr.f32.mxu0 %v11004_v39  ;;  %v4060_v19 = vld [vmem:[%s13126_s6 + $0x98] sm:$0xff] }
 0x3f5   :  { %3853 = vmatprep.mubr.f32.mxu1 %v11004_v39  ;;  %8926 = vmatprep.subr.bf16.mxu0 %v8925_v31  ;;  %v7136_v39 = vld [vmem:[%s13125_s5 + $0x678] sm:$0xff] }
 0x3f6   :  { %9142 = vmatprep.subr.bf16.mxu1 %v8925_v31  ;;  %7120 = vmatmul.mubr.msk.f32.gmra.mrb[6].mxu0 %vm2002_vm4, %v2763_v18  ;;  %v8933_v37 = vpack.c.bf16 %v7136_v39, %v7134_v34  ;;  %v4058_v18 = vld [vmem:[%s13126_s6 + $0x88] sm:$0xff]  ;;  %v9179_v31 = vpack.c.bf16 %v4059_v27, %v4057_v26  ;;  %v4068_v34 = vld [vmem:[%s13126_s6 + $0xd8] sm:$0xff]  ;;  %v4065_v39 = vld [vmem:[%s13126_s6 + $0xc0] sm:$0xff] }
 0x3f7   :  { %7330 = vmatmul.mubr.msk.f32.gmra.mrb[6].mxu1 %vm2002_vm4, %v3778_v38  ;;  %8928 = vmatpush1.bf16.msra.mxu0 %v8927_v29  ;;  %v9177_v20 = vpack.c.bf16 %v4060_v19, %v4058_v18 }
 0x3f8   :  { %9144 = vmatpush1.bf16.msra.mxu1 %v8927_v29  ;;  %8930 = vmatprep.subr.bf16.mxu0 %v8929_v30  ;;  %v9181_v29 = vpack.c.bf16 %v4064_v28, %v4062_v32 }
 0x3f9   :  { %9146 = vmatprep.subr.bf16.mxu1 %v8929_v30  ;;  %2946 = vmatprep.mubr.f32.mxu0 %v11606_v42  ;;  %v4061_v30 = vld [vmem:[%s13126_s6 + $0xa0] sm:$0xff] }
 0x3fa   :  { %3960 = vmatprep.mubr.f32.mxu1 %v11606_v42  ;;  %v9183_v38 = vpack.c.bf16 %v4063_v33, %v4061_v30 }
 0x3fb   :  { %8932 = vmatpush1.bf16.msra.mxu0 %v8931_v36 }
 0x3fc   :  { %9148 = vmatpush1.bf16.msra.mxu1 %v8931_v36  ;;  %8934 = vmatprep.subr.bf16.mxu0 %v8933_v37  ;;  %v4067_v36 = vld [vmem:[%s13126_s6 + $0xd0] sm:$0xff] }
 0x3fd   :  { %9150 = vmatprep.subr.bf16.mxu1 %v8933_v37  ;;  %v9185_v37 = vpack.c.bf16 %v4068_v34, %v4066_v35  ;;  %v9187_v21 = vpack.c.bf16 %v4067_v36, %v4065_v39 }
 0x3ff   :  { %8936 = vmatpush1.bf16.msra.mxu0 %v8935_v43 }
 0x400   :  { %9152 = vmatpush1.bf16.msra.mxu1 %v8935_v43  ;;  %8938 = vmatprep.subr.bf16.mxu0 %v8937_v44  ;;  %v4071_v43 = vld [vmem:[%s13126_s6 + $0xf0] sm:$0xff] }
 0x401   :  { %9154 = vmatprep.subr.bf16.mxu1 %v8937_v44  ;;  %v4074_v44 = vld [vmem:[%s13126_s6 + $0x108] sm:$0xff] }
 0x402   :  { %v9193_v47 = vpack.c.bf16 %v4076_v45, %v4074_v44 }
 0x403   :  { %8940 = vmatpush1.bf16.msra.mxu0 %v8939_v49 }
 0x404   :  { %9156 = vmatpush1.bf16.msra.mxu1 %v8939_v49  ;;  %8942 = vmatprep.subr.bf16.mxu0 %v8941_v22  ;;  %v4075_v49 = vld [vmem:[%s13126_s6 + $0x110] sm:$0xff] }
 0x405   :  { %9158 = vmatprep.subr.bf16.mxu1 %v8941_v22  ;;  %v4078_v22 = vld [vmem:[%s13126_s6 + $0x128] sm:$0xff]  ;;  %v9195_v10 = vpack.c.bf16 %v4075_v49, %v4073_v48 }
 0x407   :  { %8944 = vmatpush1.bf16.msra.mxu0 %v8943_v14 }
 0x408   :  { %9160 = vmatpush1.bf16.msra.mxu1 %v8943_v14  ;;  %9162 = vmatprep.subr.bf16.mxu0 %v9161_v52  ;;  %v4082_v14 = vld [vmem:[%s13126_s6 + $0x148] sm:$0xff] }
 0x409   :  { %9210 = vmatprep.subr.bf16.mxu1 %v9161_v52  ;;  %v4084_v52 = vld [vmem:[%s13126_s6 + $0x158] sm:$0xff] }
 0x40a   :  { %7145 = vmatmul.mubr.msk.f32.vlgmr.msra.gmra.mrb[4].mxu0 %vm2002_vm4, %v2875_v24  ;;  %v9197_v24 = vpack.c.bf16 %v4080_v9, %v4078_v22  ;;  %v9201_v11 = vpack.c.bf16 %v4084_v52, %v4082_v14 }
 0x40b   :  { %7355 = vmatmul.mubr.msk.f32.vlgmr.msra.gmra.mrb[4].mxu1 %vm2002_vm4, %v3889_v56  ;;  %2952 = vmatprep.mubr.f32.mxu0 %v11606_v42  ;;  %v9203_v56 = vpack.c.bf16 %v4083_v15, %v4081_v12 }
 0x40c   :  { %3966 = vmatprep.mubr.f32.mxu1 %v11606_v42  ;;  %9164 = vmatpush1.bf16.msra.mxu0 %v9163_v55  ;;  %v4069_v42 = vld [vmem:[%s13126_s6 + $0xe0] sm:$0xff] }
 0x40d   :  { %9212 = vmatpush1.bf16.msra.mxu1 %v9163_v55  ;;  %9166 = vmatprep.subr.bf16.mxu0 %v9165_v57  ;;  %v9191_v46 = vpack.c.bf16 %v4071_v43, %v4069_v42  ;;  %v4088_v55 = vld [vmem:[%s13126_s6 + $0x178] sm:$0xff] }
 0x40e   :  { %9214 = vmatprep.subr.bf16.mxu1 %v9165_v57  ;;  %7146 = vmatmul.mubr.msk.f32.gmra.mrb[6].mxu0 %vm2002_vm4, %v2877_v16  ;;  %v4086_v16 = vld [vmem:[%s13126_s6 + $0x168] sm:$0xff] }
 0x40f   :  { %7356 = vmatmul.mubr.msk.f32.gmra.mrb[6].mxu1 %vm2002_vm4, %v3891_v63  ;;  %v9205_v57 = vpack.c.bf16 %v4088_v55, %v4086_v16 }
 0x410   :  { %9168 = vmatpush1.bf16.msra.mxu0 %v9167_v62 }
 0x411   :  { %9216 = vmatpush1.bf16.msra.mxu1 %v9167_v62  ;;  %9170 = vmatprep.subr.bf16.mxu0 %v9169_v0 }
 0x412   :  { %9218 = vmatprep.subr.bf16.mxu1 %v9169_v0 }
 0x414   :  { %9172 = vmatpush1.bf16.msra.mxu0 %v9171_v5 }
 0x415   :  { %9220 = vmatpush1.bf16.msra.mxu1 %v9171_v5  ;;  %9174 = vmatprep.subr.bf16.mxu0 %v9173_v6 }
 0x416   :  { %9222 = vmatprep.subr.bf16.mxu1 %v9173_v6 }
 0x418   :  { %9176 = vmatpush1.bf16.msra.mxu0 %v9175_v17 }
 0x419   :  { %9224 = vmatpush1.bf16.msra.mxu1 %v9175_v17  ;;  %9178 = vmatprep.subr.bf16.mxu0 %v9177_v20 }
 0x41a   :  { %9226 = vmatprep.subr.bf16.mxu1 %v9177_v20 }
 0x41c   :  { %9180 = vmatpush1.bf16.msra.mxu0 %v9179_v31 }
 0x41d   :  { %9228 = vmatpush1.bf16.msra.mxu1 %v9179_v31  ;;  %9182 = vmatprep.subr.bf16.mxu0 %v9181_v29 }
 0x41e   :  { %9230 = vmatprep.subr.bf16.mxu1 %v9181_v29 }
 0x420   :  { %9184 = vmatpush1.bf16.msra.mxu0 %v9183_v38 }
 0x421   :  { %9232 = vmatpush1.bf16.msra.mxu1 %v9183_v38  ;;  %9186 = vmatprep.subr.bf16.mxu0 %v9185_v37 }
 0x422   :  { %9234 = vmatprep.subr.bf16.mxu1 %v9185_v37 }
 0x424   :  { %9188 = vmatpush1.bf16.msra.mxu0 %v9187_v21 }
 0x425   :  { %9236 = vmatpush1.bf16.msra.mxu1 %v9187_v21  ;;  %9190 = vmatprep.subr.bf16.mxu0 %v9189_v23 }
 0x426   :  { %9238 = vmatprep.subr.bf16.mxu1 %v9189_v23 }
 0x428   :  { %9192 = vmatpush1.bf16.msra.mxu0 %v9191_v46 }
 0x429   :  { %9240 = vmatpush1.bf16.msra.mxu1 %v9191_v46  ;;  %9194 = vmatprep.subr.bf16.mxu0 %v9193_v47 }
 0x42a   :  { %9242 = vmatprep.subr.bf16.mxu1 %v9193_v47 }
 0x42c   :  { %9196 = vmatpush1.bf16.msra.mxu0 %v9195_v10 }
 0x42d   :  { %9244 = vmatpush1.bf16.msra.mxu1 %v9195_v10  ;;  %9198 = vmatprep.subr.bf16.mxu0 %v9197_v24 }
 0x42e   :  { %9246 = vmatprep.subr.bf16.mxu1 %v9197_v24 }
 0x430   :  { %9200 = vmatpush1.bf16.msra.mxu0 %v9199_v54 }
 0x431   :  { %9248 = vmatpush1.bf16.msra.mxu1 %v9199_v54  ;;  %9202 = vmatprep.subr.bf16.mxu0 %v9201_v11 }
 0x432   :  { %9250 = vmatprep.subr.bf16.mxu1 %v9201_v11 }
 0x434   :  { %9204 = vmatpush1.bf16.msra.mxu0 %v9203_v56 }
 0x435   :  { %9252 = vmatpush1.bf16.msra.mxu1 %v9203_v56  ;;  %9206 = vmatprep.subr.bf16.mxu0 %v9205_v57 }
 0x436   :  { %9254 = vmatprep.subr.bf16.mxu1 %v9205_v57 }
 0x438   :  { %9208 = vmatpush1.bf16.msra.mxu0 %v9207_v60 }
 0x439   :  { %9256 = vmatpush1.bf16.msra.mxu1 %v9207_v60  ;;  %9257 = vmatprep.subr.bf16.mxu0 %v10312_v3 }
 0x43a   :  { %9689 = vmatprep.subr.bf16.mxu1 %v10312_v3 }
 0x4dd   :  { %v11788_v61 = vpop.f32.mrb[4].mxu0 }
 0x4de   :  { %v11790_v62 = vpop.f32.mrb[4].mxu1  ;;  %v2950_v63 = vpop.f32.mrb[5].mxu0  ;;  %v4011_v26 = vmul.f32 %v11788_v61, %v11788_v61 }
 0x4df   :  { %v3964_v0 = vpop.f32.mrb[5].mxu1  ;;  %2964 = vst.msk [vmem:[#allocation3 + $0x8] sm:$0xff] %vm42_vm5, %v2950_v63  ;;  %v4015_v31 = vmul.f32 %v11790_v62, %v11790_v62 }
 0x4e0   :  { %3978 = vst.msk [vmem:[#allocation3 + $0x28] sm:$0xff] %vm42_vm5, %v3964_v0 }
 0x4e1   :  { %v2954_v1 = vpop.f32.mrb[6].mxu0 }
 0x4e2   :  { %v3968_v25 = vpop.f32.mrb[6].mxu1  ;;  %2965 = vst [vmem:[#allocation3 + $0x10] sm:$0xf] %v2954_v1  ;;  %v2956_v2 = vpop.f32.mrb[7].mxu0 }
 0x4e3   :  { %3979 = vst [vmem:[#allocation3 + $0x30] sm:$0xf] %v3968_v25  ;;  %v3970_v4 = vpop.f32.mrb[7].mxu1  ;;  %2967 = vst.msk [vmem:[#allocation3 + $0x18] sm:$0xf] %vm2966_vm6, %v2956_v2 }
 0x4e4   :  { %3980 = vst.msk [vmem:[#allocation3 + $0x38] sm:$0xf] %vm2966_vm6, %v3970_v4  ;;  %v7359_v4 = vld [vmem:[%s13129_s9 + $0xc0] sm:$0xff] }
 0x4e6   :  { %v11794_v5 = vld [vmem:[#allocation3 + $0x8] sm:$0xff] }
 0x4e7   :  { %v11796_v6 = vld [vmem:[#allocation3 + $0x28] sm:$0xff]  ;;  %v4012_v8 = vmul.f32 %v11794_v5, %v11794_v5  ;;  %v3998_v32 = vsel %vm42_vm5, %v11794_v5, 0.0 }
 0x4e8   :  { %v4016_v30 = vmul.f32 %v11796_v6, %v11796_v6  ;;  %v4001_v35 = vsel %vm42_vm5, %v11796_v6, 0.0 }
 0x4e9   :  { %v11798_v7 = vld [vmem:[#allocation3 + $0x10] sm:$0xff]  ;;  %v4028_v36 = vsel %vm42_vm5, %v4012_v8, 0.0  ;;  %v7360_v8 = vld [vmem:[%s13129_s9 + $0xc8] sm:$0xff] }
 0x4ea   :  { %v11802_v17 = vld [vmem:[#allocation3 + $0x18] sm:$0xff]  ;;  %v11806_v19 = vld [vmem:[#allocation3 + $0x30] sm:$0xff]  ;;  %v3989_v20 = vadd.f32 %v11798_v7, %v11788_v61  ;;  %v4013_v27 = vmul.f32 %v11798_v7, %v11798_v7  ;;  %v4031_v44 = vsel %vm42_vm5, %v4016_v30, 0.0 }
 0x4eb   :  { %v11804_v18 = vld [vmem:[#allocation3 + $0x38] sm:$0xff]  ;;  %v3999_v28 = vsel %vm42_vm5, %v11802_v17, 0.0  ;;  %v4014_v29 = vmul.f32 %v11802_v17, %v11802_v17  ;;  %v4017_v40 = vmul.f32 %v11806_v19, %v11806_v19  ;;  %v7365_v30 = vld [vmem:[%s13129_s9 + $0xf0] sm:$0xff] }
 0x4ec   :  { %v4000_v33 = vadd.f32 %v3999_v28, %v3998_v32  ;;  %v3990_v38 = vadd.f32 %v3989_v20, %v11790_v62  ;;  %v4019_v34 = vadd.f32 %v4013_v27, %v4011_v26  ;;  %v4018_v39 = vmul.f32 %v11804_v18, %v11804_v18  ;;  %v7361_v26 = vld [vmem:[%s13129_s9 + $0xd0] sm:$0xff]  ;;  %v7362_v27 = vld [vmem:[%s13129_s9 + $0xd8] sm:$0xff]  ;;  %v7363_v32 = vld [vmem:[%s13129_s9 + $0xe0] sm:$0xff] }
 0x4ed   :  { %v4029_v37 = vsel %vm42_vm5, %v4014_v29, 0.0  ;;  %v4003_v43 = vsel %vm42_vm5, %v11804_v18, 0.0  ;;  %v9258_v20 = vpack.c.bf16 %v7360_v8, %v7359_v4  ;;  %v7364_v28 = vld [vmem:[%s13129_s9 + $0xe8] sm:$0xff] }
 0x4ee   :  { %v4002_v41 = vadd.f32 %v4001_v35, %v4000_v33  ;;  %v3991_v21 = vadd.f32 %v3990_v38, %v11806_v19  ;;  %v4030_v23 = vadd.f32 %v4029_v37, %v4028_v36  ;;  %v4020_v42 = vadd.f32 %v4019_v34, %v4015_v31  ;;  %v7366_v33 = vld [vmem:[%s13129_s9 + $0xf8] sm:$0xff]  ;;  %v7367_v38 = vld [vmem:[%s13129_s9 + $0x100] sm:$0xff]  ;;  %v7368_v34 = vld [vmem:[%s13129_s9 + $0x108] sm:$0xff] }
 0x4ef   :  { %v4033_v49 = vsel %vm42_vm5, %v4018_v39, 0.0  ;;  %v9261_v31 = vpack.c.bf16 %v7362_v27, %v7361_v26  ;;  %v9264_v29 = vpack.c.bf16 %v7364_v28, %v7363_v32  ;;  %v9267_v35 = vpack.c.bf16 %v7366_v33, %v7365_v30  ;;  %v7369_v36 = vld [vmem:[%s13129_s9 + $0x110] sm:$0xff]  ;;  %v7370_v37 = vld [vmem:[%s13129_s9 + $0x118] sm:$0xff] }
 0x4f0   :  { %v4004_v45 = vadd.f32 %v4003_v43, %v4002_v41  ;;  %v3992_v46 = vrot.slane %v3991_v21, 4  ;;  %v4032_v47 = vadd.f32 %v4031_v44, %v4030_v23  ;;  %v4021_v48 = vadd.f32 %v4020_v42, %v4017_v40  ;;  %v7371_v41 = vld [vmem:[%s13129_s9 + $0x120] sm:$0xff]  ;;  %v7373_v42 = vld [vmem:[%s13129_s9 + $0x130] sm:$0xff]  ;;  %v7374_v43 = vld [vmem:[%s13129_s9 + $0x138] sm:$0xff] }
 0x4f1   :  { %v9270_v39 = vpack.c.bf16 %v7368_v34, %v7367_v38  ;;  %v9273_v40 = vpack.c.bf16 %v7370_v37, %v7369_v36  ;;  %v9279_v44 = vpack.c.bf16 %v7374_v43, %v7373_v42  ;;  %v4277_v28 = vsub.s32 1, %v10897_v51 }
 0x4f2   :  { %v4005_v22 = vrot.slane %v4004_v45, 4  ;;  %v3993_v9 = vadd.f32 %v3992_v46, %v3991_v21  ;;  %v4034_v10 = vadd.f32 %v4033_v49, %v4032_v47  ;;  %v4022_v24 = vrot.slane %v4021_v48, 4  ;;  %v7372_v21 = vld [vmem:[%s13129_s9 + $0x128] sm:$0xff]  ;;  %v7378_v49 = vld [vmem:[%s13129_s9 + $0x158] sm:$0xff] }
 0x4f3   :  { %v9276_v23 = vpack.c.bf16 %v7372_v21, %v7371_v41  ;;  %v7376_v46 = vld [vmem:[%s13129_s9 + $0x148] sm:$0xff] }
 0x4f4   :  { %v4006_v50 = vadd.f32 %v4005_v22, %v4004_v45  ;;  %v3994_v13 = vrot.slane %v3993_v9, 2  ;;  %v4035_v14 = vrot.slane %v4034_v10, 4  ;;  %v4023_v52 = vadd.f32 %v4022_v24, %v4021_v48  ;;  %v7375_v45 = vld [vmem:[%s13129_s9 + $0x140] sm:$0xff]  ;;  %v7377_v48 = vld [vmem:[%s13129_s9 + $0x150] sm:$0xff] }
 0x4f5   :  { %v9282_v47 = vpack.c.bf16 %v7376_v46, %v7375_v45  ;;  %v9285_v22 = vpack.c.bf16 %v7378_v49, %v7377_v48 }
 0x4f6   :  { %v4007_v54 = vrot.slane %v4006_v50, 2  ;;  %v3995_v11 = vadd.f32 %v3994_v13, %v3993_v9  ;;  %v4036_v12 = vadd.f32 %v4035_v14, %v4034_v10  ;;  %v4024_v15 = vrot.slane %v4023_v52, 2  ;;  %v7379_v9 = vld [vmem:[%s13129_s9 + $0x160] sm:$0xff]  ;;  %v7380_v10 = vld [vmem:[%s13129_s9 + $0x168] sm:$0xff]  ;;  %v7382_v13 = vld [vmem:[%s13129_s9 + $0x178] sm:$0xff] }
 0x4f7   :  { %v9288_v24 = vpack.c.bf16 %v7380_v10, %v7379_v9 }
 0x4f8   :  { %v4008_v16 = vadd.f32 %v4007_v54, %v4006_v50  ;;  %v4037_v55 = vrot.slane %v4036_v12, 2  ;;  %v4025_v56 = vadd.f32 %v4024_v15, %v4023_v52  ;;  %v3996_v57 = vrot.slane %v3995_v11, 1  ;;  %v7381_v50 = vld [vmem:[%s13129_s9 + $0x170] sm:$0xff] }
 0x4f9   :  { %v9291_v14 = vpack.c.bf16 %v7382_v13, %v7381_v50 }
 0x4fa   :  { %v4009_v58 = vrot.slane %v4008_v16, 1  ;;  %v4038_v59 = vadd.f32 %v4037_v55, %v4036_v12  ;;  %v4026_v60 = vrot.slane %v4025_v56, 1  ;;  %v3997_v1 = vadd.f32 %v3996_v57, %v3995_v11 }
 0x4fc   :  { %v4010_v63 = vadd.f32 %v4009_v58, %v4008_v16  ;;  %v4039_v0 = vrot.slane %v4038_v59, 1  ;;  %v4027_v2 = vadd.f32 %v4026_v60, %v4025_v56 }
 0x4fe   :  { %7357 = vmatprep.mubr.msk.f32.mxu0 %vm42_vm5, %v4010_v63  ;;  %v4040_v25 = vadd.f32 %v4039_v0, %v4038_v59 }
 0x4ff   :  { %4157 = vmatmul.mubr.f32.vlgmr.msra.gmra.mrb[8].mxu0 %v3997_v1  ;;  %v10315_v1 = vmov 1966171168  }
 0x500   :  { %7358 = vmatprep.mubr.msk.f32.mxu1 %vm42_vm5, %v4040_v25  ;;  %9259 = vmatpush1.bf16.msra.mxu0 %v9258_v20  ;;  %v4254_v25 = vunpack.c.l.s4 %v10315_v1  ;;  %v4356_v1 = vld [vmem:[%s13129_s9 + $0x38] sm:$0xff] }
 0x501   :  { %4233 = vmatmul.mubr.f32.vlgmr.msra.gmra.mrb[8].mxu1 %v4027_v2  ;;  %9260 = vmatprep.subr.bf16.mxu0 %v10312_v3 }
 0x502   :  { %9691 = vmatpush1.bf16.msra.mxu1 %v9258_v20  ;;  %v4255_v2 = vunpack.c.0.s8 %v4254_v25 }
 0x503   :  { %9692 = vmatprep.subr.bf16.mxu1 %v10312_v3 }
 0x504   :  { %9262 = vmatpush1.bf16.msra.mxu0 %v9261_v31  ;;  %v4258_v8 = vsub.s32 %v4255_v2, %v10897_v51  ;;  %v4357_v2 = vld [vmem:[%s13129_s9 + $0x40] sm:$0xff] }
 0x505   :  { %9263 = vmatprep.subr.bf16.mxu0 %v10312_v3 }
 0x506   :  { %9694 = vmatpush1.bf16.msra.mxu1 %v9261_v31  ;;  %v4245_v31 = vld [vmem:[%s13127_s7] sm:$0x3] }
 0x507   :  { %9695 = vmatprep.subr.bf16.mxu1 %v10312_v3 }
 0x508   :  { %9265 = vmatpush1.bf16.msra.mxu0 %v9264_v29 }
 0x509   :  { %9266 = vmatprep.subr.bf16.mxu0 %v10312_v3 }
 0x50a   :  { %9697 = vmatpush1.bf16.msra.mxu1 %v9264_v29 }
 0x50b   :  { %9698 = vmatprep.subr.bf16.mxu1 %v10312_v3 }
 0x50c   :  { %9268 = vmatpush1.bf16.msra.mxu0 %v9267_v35 }
 0x50d   :  { %9269 = vmatprep.subr.bf16.mxu0 %v10312_v3 }
 0x50e   :  { %9700 = vmatpush1.bf16.msra.mxu1 %v9267_v35 }
 0x50f   :  { %9701 = vmatprep.subr.bf16.mxu1 %v10312_v3 }
 0x510   :  { %9271 = vmatpush1.bf16.msra.mxu0 %v9270_v39 }
 0x511   :  { %9272 = vmatprep.subr.bf16.mxu0 %v10312_v3 }
 0x512   :  { %9703 = vmatpush1.bf16.msra.mxu1 %v9270_v39 }
 0x513   :  { %9704 = vmatprep.subr.bf16.mxu1 %v10312_v3 }
 0x514   :  { %9274 = vmatpush1.bf16.msra.mxu0 %v9273_v40 }
 0x515   :  { %9275 = vmatprep.subr.bf16.mxu0 %v10312_v3 }
 0x516   :  { %9706 = vmatpush1.bf16.msra.mxu1 %v9273_v40  ;;  %v4269_v40 = vld [vmem:[%s13128_s8] sm:$0x3] }
 0x517   :  { %9707 = vmatprep.subr.bf16.mxu1 %v10312_v3 }
 0x518   :  { %9277 = vmatpush1.bf16.msra.mxu0 %v9276_v23 }
 0x519   :  { %9278 = vmatprep.subr.bf16.mxu0 %v10312_v3 }
 0x51a   :  { %9709 = vmatpush1.bf16.msra.mxu1 %v9276_v23 }
 0x51b   :  { %9710 = vmatprep.subr.bf16.mxu1 %v10312_v3 }
 0x51c   :  { %9280 = vmatpush1.bf16.msra.mxu0 %v9279_v44 }
 0x51d   :  { %9281 = vmatprep.subr.bf16.mxu0 %v10312_v3 }
 0x51e   :  { %9712 = vmatpush1.bf16.msra.mxu1 %v9279_v44 }
 0x51f   :  { %9713 = vmatprep.subr.bf16.mxu1 %v10312_v3 }
 0x520   :  { %9283 = vmatpush1.bf16.msra.mxu0 %v9282_v47 }
 0x521   :  { %9284 = vmatprep.subr.bf16.mxu0 %v10312_v3 }
 0x522   :  { %9715 = vmatpush1.bf16.msra.mxu1 %v9282_v47 }
 0x523   :  { %9716 = vmatprep.subr.bf16.mxu1 %v10312_v3 }
 0x524   :  { %9286 = vmatpush1.bf16.msra.mxu0 %v9285_v22 }
 0x525   :  { %9287 = vmatprep.subr.bf16.mxu0 %v10312_v3 }
 0x526   :  { %9718 = vmatpush1.bf16.msra.mxu1 %v9285_v22 }
 0x527   :  { %9719 = vmatprep.subr.bf16.mxu1 %v10312_v3 }
 0x528   :  { %9289 = vmatpush1.bf16.msra.mxu0 %v9288_v24 }
 0x529   :  { %9290 = vmatprep.subr.bf16.mxu0 %v10312_v3 }
 0x52a   :  { %9721 = vmatpush1.bf16.msra.mxu1 %v9288_v24 }
 0x52b   :  { %9722 = vmatprep.subr.bf16.mxu1 %v10312_v3 }
 0x52c   :  { %9292 = vmatpush1.bf16.msra.mxu0 %v9291_v14 }
 0x52d   :  { %9293 = vmatprep.subr.bf16.mxu0 %v10312_v3 }
 0x52e   :  { %9724 = vmatpush1.bf16.msra.mxu1 %v9291_v14  ;;  %v4350_v14 = vld [vmem:[%s13129_s9 + $0x8] sm:$0xff] }
 0x52f   :  { %9725 = vmatprep.subr.bf16.mxu1 %v10312_v3 }
 0x5d2   :  { %v4158_v52 = vpop.f32.mrb[8].mxu0 }
 0x5d3   :  { %v4163_v54 = vmul.f32 0.0034722222, %v4158_v52  ;;  %v4160_v11 = vpop.f32.mrb[9].mxu0 }
 0x5d4   :  { %v4164_v12 = vmul.f32 0.0034722222, %v4160_v11  ;;  %v4234_v15 = vpop.f32.mrb[8].mxu1 }
 0x5d5   :  { %v4241_v16 = vmul.f32 %v4163_v54, %v4163_v54  ;;  %v4239_v55 = vmul.f32 0.0034722222, %v4234_v15  ;;  %v4236_v56 = vpop.f32.mrb[9].mxu1 }
 0x5d6   :  { %v4242_v57 = vmul.f32 %v4164_v12, %v4164_v12  ;;  %v4240_v58 = vmul.f32 0.0034722222, %v4236_v56  ;;  %v4352_v56 = vld [vmem:[%s13129_s9 + $0x18] sm:$0xff] }
 0x5d7   :  { %v4243_v59 = vsub.f32 %v4239_v55, %v4241_v16  ;;  %v4351_v55 = vld [vmem:[%s13129_s9 + $0x10] sm:$0xff] }
 0x5d8   :  { %v4244_v60 = vsub.f32 %v4240_v58, %v4242_v57  ;;  %v9297_v58 = vpack.c.bf16 %v4352_v56, %v4351_v55  ;;  %v7401_v56 = vld [vmem:[%s13129_s9 + $0x200] sm:$0xff] }
 0x5d9   :  { %v4246_v63 = vadd.f32 1e-05, %v4243_v59  ;;  %v4353_v59 = vld [vmem:[%s13129_s9 + $0x20] sm:$0xff] }
 0x5da   :  { %v4247_v0 = vadd.f32 1e-05, %v4244_v60  ;;  %v4354_v60 = vld [vmem:[%s13129_s9 + $0x28] sm:$0xff] }
 0x5db   :  { %10271 = vrsqrt.f32 %v4246_v63  ;;  %v9300_v63 = vpack.c.bf16 %v4354_v60, %v4353_v59  ;;  %v7403_v59 = vld [vmem:[%s13129_s9 + $0x210] sm:$0xff]  ;;  %v7404_v60 = vld [vmem:[%s13129_s9 + $0x218] sm:$0xff] }
 0x5dc   :  { %10273 = vrsqrt.f32 %v4247_v0  ;;  %v4355_v0 = vld [vmem:[%s13129_s9 + $0x30] sm:$0xff] }
 0x5dd   :  { %v9303_v25 = vpack.c.bf16 %v4356_v1, %v4355_v0  ;;  %v7405_v0 = vld [vmem:[%s13129_s9 + $0x220] sm:$0xff]  ;;  %v7406_v1 = vld [vmem:[%s13129_s9 + $0x228] sm:$0xff] }
 0x5e5   :  { %v10272_v4 = vpop.eup %10271 }
 0x5e6   :  { %v10274_v20 = vpop.eup %10273 }
 0x5e7   :  { %v4252_v26 = vcombine.low %v10272_v4, %v10274_v20  ;;  %v4358_v4 = vld [vmem:[%s13129_s9 + $0x48] sm:$0xff]  ;;  %v4359_v20 = vld [vmem:[%s13129_s9 + $0x50] sm:$0xff] }
 0x5e9   :  { %v4259_v27 = vrot.slane %v4252_v26, %v4258_v8  ;;  %v4360_v26 = vld [vmem:[%s13129_s9 + $0x58] sm:$0xff] }
 0x5eb   :  { %v4266_v32 = vrot.slane %v4259_v27, %v4258_v8  ;;  %v9309_v27 = vpack.c.bf16 %v4360_v26, %v4359_v20  ;;  %v7410_v20 = vld [vmem:[%s13129_s9 + $0x240] sm:$0xff]  ;;  %v7411_v26 = vld [vmem:[%s13129_s9 + $0x248] sm:$0xff] }
 0x5ed   :  { %v4268_v29 = vmul.f32 %v4266_v32, %v4245_v31  ;;  %v4361_v31 = vld [vmem:[%s13129_s9 + $0x60] sm:$0xff]  ;;  %v4362_v32 = vld [vmem:[%s13129_s9 + $0x68] sm:$0xff] }
 0x5ef   :  { %v4274_v30 = vrot.slane %v4268_v29, %v10903_v53  ;;  %v4278_v33 = vrot.slane %v4268_v29, %v4277_v28  ;;  %v4363_v29 = vld [vmem:[%s13129_s9 + $0x70] sm:$0xff] }
 0x5f1   :  { %v4281_v35 = vmul.f32 %v4274_v30, %v4163_v54  ;;  %v4282_v38 = vmul.f32 %v4278_v33, %v4164_v12  ;;  %v4302_v34 = vmul.f32 %v4274_v30, %v11788_v61  ;;  %v4306_v39 = vmul.f32 %v4274_v30, %v11790_v62 }
 0x5f2   :  { %v4303_v51 = vmul.f32 %v4278_v33, %v11794_v5  ;;  %v4304_v23 = vmul.f32 %v4274_v30, %v11798_v7  ;;  %v4305_v42 = vmul.f32 %v4278_v33, %v11802_v17  ;;  %v4307_v61 = vmul.f32 %v4278_v33, %v11796_v6 }
 0x5f3   :  { %v4285_v36 = vcombine.low %v4281_v35, %v4282_v38  ;;  %v4308_v62 = vmul.f32 %v4274_v30, %v11806_v19  ;;  %v4309_v45 = vmul.f32 %v4278_v33, %v11804_v18  ;;  %v4349_v18 = vld [vmem:[%s13129_s9] sm:$0xff]  ;;  %v4364_v30 = vld [vmem:[%s13129_s9 + $0x78] sm:$0xff]  ;;  %v4366_v38 = vld [vmem:[%s13129_s9 + $0x88] sm:$0xff] }
 0x5f4   :  { %v9294_v12 = vpack.c.bf16 %v4350_v14, %v4349_v18  ;;  %v9315_v33 = vpack.c.bf16 %v4364_v30, %v4363_v29  ;;  %v4365_v35 = vld [vmem:[%s13129_s9 + $0x80] sm:$0xff] }
 0x5f5   :  { %v4292_v37 = vrot.slane %v4285_v36, %v4258_v8  ;;  %v4368_v36 = vld [vmem:[%s13129_s9 + $0x98] sm:$0xff]  ;;  %v7397_v14 = vld [vmem:[%s13129_s9 + $0x1e0] sm:$0xff] }
 0x5f7   :  { %v4299_v41 = vrot.slane %v4292_v37, %v4258_v8  ;;  %v9306_v8 = vpack.c.bf16 %v4358_v4, %v4357_v2  ;;  %v7407_v2 = vld [vmem:[%s13129_s9 + $0x230] sm:$0xff]  ;;  %v7408_v4 = vld [vmem:[%s13129_s9 + $0x238] sm:$0xff] }
 0x5f9   :  { %v4301_v21 = vsub.f32 %v4269_v40, %v4299_v41  ;;  %v4369_v40 = vld [vmem:[%s13129_s9 + $0xa0] sm:$0xff]  ;;  %v4370_v41 = vld [vmem:[%s13129_s9 + $0xa8] sm:$0xff] }
 0x5fb   :  { %v4314_v43 = vrot.slane %v4301_v21, %v10903_v53  ;;  %v4318_v44 = vrot.slane %v4301_v21, %v4277_v28  ;;  %v9312_v28 = vpack.c.bf16 %v4362_v32, %v4361_v31  ;;  %v9324_v21 = vpack.c.bf16 %v4370_v41, %v4369_v40  ;;  %v7412_v32 = vld [vmem:[%s13129_s9 + $0x250] sm:$0xff]  ;;  %v7418_v41 = vld [vmem:[%s13129_s9 + $0x280] sm:$0xff] }
 0x5fd   :  { %v4321_v46 = vadd.f32 %v4314_v43, %v4302_v34  ;;  %v4322_v47 = vadd.f32 %v4318_v44, %v4303_v51  ;;  %v4323_v48 = vadd.f32 %v4314_v43, %v4304_v23  ;;  %v4324_v49 = vadd.f32 %v4318_v44, %v4305_v42  ;;  %v4371_v51 = vld [vmem:[%s13129_s9 + $0xb0] sm:$0xff]  ;;  %v4372_v23 = vld [vmem:[%s13129_s9 + $0xb8] sm:$0xff] }
 0x5fe   :  { %v4325_v22 = vadd.f32 %v4314_v43, %v4306_v39  ;;  %v4326_v9 = vadd.f32 %v4318_v44, %v4307_v61  ;;  %v4327_v5 = vadd.f32 %v4314_v43, %v4308_v62  ;;  %v4328_v10 = vadd.f32 %v4318_v44, %v4309_v45  ;;  %v4367_v39 = vld [vmem:[%s13129_s9 + $0x90] sm:$0xff]  ;;  %v7385_v43 = vld [vmem:[%s13129_s9 + $0x180] sm:$0xff]  ;;  %v7386_v44 = vld [vmem:[%s13129_s9 + $0x188] sm:$0xff] }
 0x5ff   :  { %v11954_v7 = vmax.f32 %v4321_v46, 0.0  ;;  %v4330_v17 = vmax.f32 %v4322_v47, 0.0  ;;  %v4331_v24 = vmax.f32 %v4323_v48, 0.0  ;;  %v4332_v53 = vmax.f32 %v4324_v49, 0.0  ;;  %v7387_v62 = vld [vmem:[%s13129_s9 + $0x190] sm:$0xff]  ;;  %v7388_v45 = vld [vmem:[%s13129_s9 + $0x198] sm:$0xff] }
 0x600   :  { %v11956_v50 = vmax.f32 %v4325_v22, 0.0  ;;  %v4334_v6 = vmax.f32 %v4326_v9, 0.0  ;;  %v4335_v13 = vmax.f32 %v4327_v5, 0.0  ;;  %v4336_v19 = vmax.f32 %v4328_v10, 0.0  ;;  %v7389_v49 = vld [vmem:[%s13129_s9 + $0x1a0] sm:$0xff]  ;;  %v7390_v22 = vld [vmem:[%s13129_s9 + $0x1a8] sm:$0xff] }
 0x601   :  { %4337 = vst [vmem:[#allocation3] sm:$0xff] %v11954_v7  ;;  %4338 = vst.msk [vmem:[#allocation3 + $0x8] sm:$0xff] %vm42_vm5, %v4330_v17  ;;  %v4400_v16 = vrot.slane %v11954_v7, 1  ;;  %v9318_v34 = vpack.c.bf16 %v4366_v38, %v4365_v35  ;;  %v9321_v37 = vpack.c.bf16 %v4368_v36, %v4367_v39  ;;  %v9327_v42 = vpack.c.bf16 %v4372_v23, %v4371_v51  ;;  %v7391_v5 = vld [vmem:[%s13129_s9 + $0x1b0] sm:$0xff]  ;;  %v7392_v10 = vld [vmem:[%s13129_s9 + $0x1b8] sm:$0xff] }
 0x602   :  { %4339 = vst [vmem:[#allocation3 + $0x10] sm:$0xff] %v4331_v24  ;;  %4340 = vst.msk [vmem:[#allocation3 + $0x18] sm:$0xff] %vm42_vm5, %v4332_v53  ;;  %v5619_v57 = vrot.slane %v11956_v50, 1  ;;  %v9330_v61 = vpack.c.bf16 %v7386_v44, %v7385_v43  ;;  %v9333_v48 = vpack.c.bf16 %v7388_v45, %v7387_v62  ;;  %v9336_v9 = vpack.c.bf16 %v7390_v22, %v7389_v49  ;;  %v7393_v24 = vld [vmem:[%s13129_s9 + $0x1c0] sm:$0xff]  ;;  %v7394_v53 = vld [vmem:[%s13129_s9 + $0x1c8] sm:$0xff] }
 0x603   :  { %4341 = vst [vmem:[#allocation3 + $0x20] sm:$0xff] %v11956_v50  ;;  %4342 = vst.msk [vmem:[#allocation3 + $0x28] sm:$0xff] %vm42_vm5, %v4334_v6  ;;  %v9339_v17 = vpack.c.bf16 %v7392_v10, %v7391_v5  ;;  %v9342_v6 = vpack.c.bf16 %v7394_v53, %v7393_v24  ;;  %v4572_v31 = vrot.slane %v11954_v7, 2  ;;  %v5790_v29 = vrot.slane %v11956_v50, 2  ;;  %v7414_v38 = vld [vmem:[%s13129_s9 + $0x260] sm:$0xff]  ;;  %v7416_v36 = vld [vmem:[%s13129_s9 + $0x270] sm:$0xff] }
 0x604   :  { %4343 = vst [vmem:[#allocation3 + $0x30] sm:$0xff] %v4335_v13  ;;  %4344 = vst.msk [vmem:[#allocation3 + $0x38] sm:$0xff] %vm42_vm5, %v4336_v19  ;;  %v7395_v13 = vld [vmem:[%s13129_s9 + $0x1d0] sm:$0xff]  ;;  %v7396_v19 = vld [vmem:[%s13129_s9 + $0x1d8] sm:$0xff] }
 0x605   :  { %v9345_v18 = vpack.c.bf16 %v7396_v19, %v7395_v13  ;;  %v7420_v23 = vld [vmem:[%s13129_s9 + $0x290] sm:$0xff]  ;;  %v7422_v44 = vld [vmem:[%s13129_s9 + $0x2a0] sm:$0xff]  ;;  %v7427_v49 = vld [vmem:[%s13129_s9 + $0x2c8] sm:$0xff] }
 0x606   :  { %v7424_v45 = vld [vmem:[%s13129_s9 + $0x2b0] sm:$0xff]  ;;  %v7429_v5 = vld [vmem:[%s13129_s9 + $0x2d8] sm:$0xff]  ;;  %v7431_v24 = vld [vmem:[%s13129_s9 + $0x2e8] sm:$0xff] }
 0x607   :  { %v7433_v13 = vld [vmem:[%s13129_s9 + $0x2f8] sm:$0xff] }
 0x608   :  { %v11970_v52 = vld [vmem:[#allocation3 + $0x8] sm:$0xff] }
 0x609   :  { %v4401_v54 = vrot.slane %v11970_v52, 1  ;;  %v4573_v46 = vrot.slane %v11970_v52, 2  ;;  %v4674_v30 = vrot.slane %v11970_v52, 3 }
 0x60a   :  { %v11973_v11 = vld [vmem:[#allocation3 + $0x28] sm:$0xff] }
 0x60b   :  { %v5620_v15 = vrot.slane %v11973_v11, 1  ;;  %7383 = vmatprep.mubr.msk.f32.mxu0 %vm42_vm5, %v4401_v54  ;;  %v5791_v47 = vrot.slane %v11973_v11, 2  ;;  %v7398_v54 = vld [vmem:[%s13129_s9 + $0x1e8] sm:$0xff] }
 0x60c   :  { %4470 = vmatmul.mubr.f32.vlgmr.msra.gmra.mrb[10].mxu0 %v4400_v16  ;;  %v7400_v16 = vld [vmem:[%s13129_s9 + $0x1f8] sm:$0xff] }
 0x60d   :  { %7659 = vmatprep.mubr.msk.f32.mxu1 %vm42_vm5, %v5620_v15  ;;  %9295 = vmatpush1.bf16.msra.mxu0 %v9294_v12  ;;  %v7399_v15 = vld [vmem:[%s13129_s9 + $0x1f0] sm:$0xff] }
 0x60e   :  { %5689 = vmatmul.mubr.f32.vlgmr.msra.gmra.mrb[10].mxu1 %v5619_v57  ;;  %7384 = vmatprep.mubr.msk.f32.mxu0 %vm42_vm5, %v11970_v52  ;;  %v9351_v55 = vpack.c.bf16 %v7400_v16, %v7399_v15  ;;  %v7402_v57 = vld [vmem:[%s13129_s9 + $0x208] sm:$0xff]  ;;  %v7437_v15 = vld [vmem:[%s13129_s9 + $0x310] sm:$0xff]  ;;  %v7438_v16 = vld [vmem:[%s13129_s9 + $0x318] sm:$0xff] }
 0x60f   :  { %9727 = vmatpush1.bf16.msra.mxu1 %v9294_v12  ;;  %7660 = vmatprep.mubr.msk.f32.mxu1 %vm42_vm5, %v11973_v11  ;;  %v9348_v12 = vpack.c.bf16 %v7398_v54, %v7397_v14  ;;  %v7436_v14 = vld [vmem:[%s13129_s9 + $0x308] sm:$0xff] }
 0x610   :  { %9296 = vmatprep.subr.bf16.mxu0 %v10312_v3  ;;  %9728 = vmatprep.subr.bf16.mxu1 %v10312_v3 }
 0x611   :  { %9298 = vmatpush1.bf16.msra.mxu0 %v9297_v58 }
 0x612   :  { %9299 = vmatprep.subr.bf16.mxu0 %v10312_v3 }
 0x613   :  { %9730 = vmatpush1.bf16.msra.mxu1 %v9297_v58  ;;  %v9354_v58 = vpack.c.bf16 %v7402_v57, %v7401_v56  ;;  %v4775_v56 = vrot.slane %v11970_v52, 4  ;;  %v5991_v57 = vrot.slane %v11973_v11, 4 }
 0x614   :  { %9731 = vmatprep.subr.bf16.mxu1 %v10312_v3 }
 0x615   :  { %9301 = vmatpush1.bf16.msra.mxu0 %v9300_v63 }
 0x616   :  { %9302 = vmatprep.subr.bf16.mxu0 %v10312_v3 }
 0x617   :  { %9733 = vmatpush1.bf16.msra.mxu1 %v9300_v63  ;;  %v9357_v63 = vpack.c.bf16 %v7404_v60, %v7403_v59  ;;  %v7439_v59 = vld [vmem:[%s13129_s9 + $0x320] sm:$0xff]  ;;  %v7440_v60 = vld [vmem:[%s13129_s9 + $0x328] sm:$0xff] }
 0x618   :  { %9734 = vmatprep.subr.bf16.mxu1 %v10312_v3 }
 0x619   :  { %9304 = vmatpush1.bf16.msra.mxu0 %v9303_v25 }
 0x61a   :  { %9305 = vmatprep.subr.bf16.mxu0 %v10312_v3 }
 0x61b   :  { %9736 = vmatpush1.bf16.msra.mxu1 %v9303_v25  ;;  %v9360_v25 = vpack.c.bf16 %v7406_v1, %v7405_v0  ;;  %v7441_v0 = vld [vmem:[%s13129_s9 + $0x330] sm:$0xff]  ;;  %v7442_v1 = vld [vmem:[%s13129_s9 + $0x338] sm:$0xff] }
 0x61c   :  { %9737 = vmatprep.subr.bf16.mxu1 %v10312_v3 }
 0x61d   :  { %9307 = vmatpush1.bf16.msra.mxu0 %v9306_v8 }
 0x61e   :  { %9308 = vmatprep.subr.bf16.mxu0 %v10312_v3 }
 0x61f   :  { %9739 = vmatpush1.bf16.msra.mxu1 %v9306_v8  ;;  %v9363_v8 = vpack.c.bf16 %v7408_v4, %v7407_v2  ;;  %v7443_v2 = vld [vmem:[%s13129_s9 + $0x340] sm:$0xff]  ;;  %v7444_v4 = vld [vmem:[%s13129_s9 + $0x348] sm:$0xff] }
 0x620   :  { %9740 = vmatprep.subr.bf16.mxu1 %v10312_v3 }
 0x621   :  { %9310 = vmatpush1.bf16.msra.mxu0 %v9309_v27 }
 0x622   :  { %9311 = vmatprep.subr.bf16.mxu0 %v10312_v3 }
 0x623   :  { %9742 = vmatpush1.bf16.msra.mxu1 %v9309_v27  ;;  %v9366_v27 = vpack.c.bf16 %v7411_v26, %v7410_v20  ;;  %v7445_v20 = vld [vmem:[%s13129_s9 + $0x350] sm:$0xff]  ;;  %v7446_v26 = vld [vmem:[%s13129_s9 + $0x358] sm:$0xff] }
 0x624   :  { %9743 = vmatprep.subr.bf16.mxu1 %v10312_v3 }
 0x625   :  { %9313 = vmatpush1.bf16.msra.mxu0 %v9312_v28 }
 0x626   :  { %9314 = vmatprep.subr.bf16.mxu0 %v10312_v3 }
 0x627   :  { %9745 = vmatpush1.bf16.msra.mxu1 %v9312_v28  ;;  %v7413_v28 = vld [vmem:[%s13129_s9 + $0x258] sm:$0xff] }
 0x628   :  { %9746 = vmatprep.subr.bf16.mxu1 %v10312_v3  ;;  %v9369_v35 = vpack.c.bf16 %v7413_v28, %v7412_v32  ;;  %v7448_v32 = vld [vmem:[%s13129_s9 + $0x368] sm:$0xff] }
 0x629   :  { %9316 = vmatpush1.bf16.msra.mxu0 %v9315_v33 }
 0x62a   :  { %9317 = vmatprep.subr.bf16.mxu0 %v10312_v3 }
 0x62b   :  { %9748 = vmatpush1.bf16.msra.mxu1 %v9315_v33  ;;  %v5891_v33 = vrot.slane %v11973_v11, 3 }
 0x62c   :  { %9749 = vmatprep.subr.bf16.mxu1 %v10312_v3 }
 0x62d   :  { %9319 = vmatpush1.bf16.msra.mxu0 %v9318_v34 }
 0x62e   :  { %9320 = vmatprep.subr.bf16.mxu0 %v10312_v3 }
 0x62f   :  { %9751 = vmatpush1.bf16.msra.mxu1 %v9318_v34  ;;  %v7415_v34 = vld [vmem:[%s13129_s9 + $0x268] sm:$0xff] }
 0x630   :  { %9752 = vmatprep.subr.bf16.mxu1 %v10312_v3  ;;  %v9372_v39 = vpack.c.bf16 %v7415_v34, %v7414_v38  ;;  %v7452_v38 = vld [vmem:[%s13129_s9 + $0x388] sm:$0xff] }
 0x631   :  { %9322 = vmatpush1.bf16.msra.mxu0 %v9321_v37 }
 0x632   :  { %9323 = vmatprep.subr.bf16.mxu0 %v10312_v3 }
 0x633   :  { %9754 = vmatpush1.bf16.msra.mxu1 %v9321_v37  ;;  %v7417_v37 = vld [vmem:[%s13129_s9 + $0x278] sm:$0xff] }
 0x634   :  { %9755 = vmatprep.subr.bf16.mxu1 %v10312_v3  ;;  %v9375_v40 = vpack.c.bf16 %v7417_v37, %v7416_v36  ;;  %v7454_v36 = vld [vmem:[%s13129_s9 + $0x398] sm:$0xff] }
 0x635   :  { %9325 = vmatpush1.bf16.msra.mxu0 %v9324_v21 }
 0x636   :  { %9326 = vmatprep.subr.bf16.mxu0 %v10312_v3 }
 0x637   :  { %9757 = vmatpush1.bf16.msra.mxu1 %v9324_v21  ;;  %v7419_v21 = vld [vmem:[%s13129_s9 + $0x288] sm:$0xff] }
 0x638   :  { %9758 = vmatprep.subr.bf16.mxu1 %v10312_v3  ;;  %v9378_v51 = vpack.c.bf16 %v7419_v21, %v7418_v41  ;;  %v7456_v41 = vld [vmem:[%s13129_s9 + $0x3a8] sm:$0xff] }
 0x639   :  { %9328 = vmatpush1.bf16.msra.mxu0 %v9327_v42 }
 0x63a   :  { %9329 = vmatprep.subr.bf16.mxu0 %v10312_v3 }
 0x63b   :  { %9760 = vmatpush1.bf16.msra.mxu1 %v9327_v42  ;;  %v7421_v42 = vld [vmem:[%s13129_s9 + $0x298] sm:$0xff] }
 0x63c   :  { %9761 = vmatprep.subr.bf16.mxu1 %v10312_v3  ;;  %4542 = vmatmul.mubr.f32.vlgmr.msra.gmra.mrb[10].mxu0 %v11954_v7  ;;  %v9381_v43 = vpack.c.bf16 %v7421_v42, %v7420_v23  ;;  %v7458_v23 = vld [vmem:[%s13129_s9 + $0x3b8] sm:$0xff] }
 0x63d   :  { %9331 = vmatpush1.bf16.msra.mxu0 %v9330_v61  ;;  %7409 = vmatprep.mubr.msk.f32.mxu0 %vm42_vm5, %v4573_v46  ;;  %v7425_v46 = vld [vmem:[%s13129_s9 + $0x2b8] sm:$0xff] }
 0x63e   :  { %5761 = vmatmul.mubr.f32.vlgmr.msra.gmra.mrb[10].mxu1 %v11956_v50  ;;  %9332 = vmatprep.subr.bf16.mxu0 %v10312_v3 }
 0x63f   :  { %9763 = vmatpush1.bf16.msra.mxu1 %v9330_v61  ;;  %7685 = vmatprep.mubr.msk.f32.mxu1 %vm42_vm5, %v5791_v47  ;;  %v7423_v61 = vld [vmem:[%s13129_s9 + $0x2a8] sm:$0xff]  ;;  %v9387_v47 = vpack.c.bf16 %v7425_v46, %v7424_v45  ;;  %v7462_v45 = vld [vmem:[%s13129_s9 + $0x3d0] sm:$0xff]  ;;  %v7463_v46 = vld [vmem:[%s13129_s9 + $0x3d8] sm:$0xff] }
 0x640   :  { %9764 = vmatprep.subr.bf16.mxu1 %v10312_v3  ;;  %v9384_v62 = vpack.c.bf16 %v7423_v61, %v7422_v44  ;;  %v7461_v44 = vld [vmem:[%s13129_s9 + $0x3c8] sm:$0xff] }
 0x641   :  { %9334 = vmatpush1.bf16.msra.mxu0 %v9333_v48 }
 0x642   :  { %9335 = vmatprep.subr.bf16.mxu0 %v10312_v3 }
 0x643   :  { %9766 = vmatpush1.bf16.msra.mxu1 %v9333_v48  ;;  %v7426_v48 = vld [vmem:[%s13129_s9 + $0x2c0] sm:$0xff] }
 0x644   :  { %9767 = vmatprep.subr.bf16.mxu1 %v10312_v3  ;;  %v9390_v22 = vpack.c.bf16 %v7427_v49, %v7426_v48  ;;  %v4876_v48 = vrot.slane %v11970_v52, 5  ;;  %v6091_v49 = vrot.slane %v11973_v11, 5 }
 0x645   :  { %9337 = vmatpush1.bf16.msra.mxu0 %v9336_v9 }
 0x646   :  { %9338 = vmatprep.subr.bf16.mxu0 %v10312_v3 }
 0x647   :  { %9769 = vmatpush1.bf16.msra.mxu1 %v9336_v9  ;;  %v7428_v9 = vld [vmem:[%s13129_s9 + $0x2d0] sm:$0xff] }
 0x648   :  { %9770 = vmatprep.subr.bf16.mxu1 %v10312_v3  ;;  %v9393_v10 = vpack.c.bf16 %v7429_v5, %v7428_v9  ;;  %v7464_v9 = vld [vmem:[%s13129_s9 + $0x3e0] sm:$0xff]  ;;  %v7465_v5 = vld [vmem:[%s13129_s9 + $0x3e8] sm:$0xff] }
 0x649   :  { %9340 = vmatpush1.bf16.msra.mxu0 %v9339_v17 }
 0x64a   :  { %9341 = vmatprep.subr.bf16.mxu0 %v10312_v3 }
 0x64b   :  { %9772 = vmatpush1.bf16.msra.mxu1 %v9339_v17  ;;  %v7430_v17 = vld [vmem:[%s13129_s9 + $0x2e0] sm:$0xff] }
 0x64c   :  { %9773 = vmatprep.subr.bf16.mxu1 %v10312_v3  ;;  %v9396_v53 = vpack.c.bf16 %v7431_v24, %v7430_v17  ;;  %v7466_v17 = vld [vmem:[%s13129_s9 + $0x3f0] sm:$0xff]  ;;  %v7467_v24 = vld [vmem:[%s13129_s9 + $0x3f8] sm:$0xff] }
 0x64d   :  { %9343 = vmatpush1.bf16.msra.mxu0 %v9342_v6 }
 0x64e   :  { %9344 = vmatprep.subr.bf16.mxu0 %v10312_v3 }
 0x64f   :  { %9775 = vmatpush1.bf16.msra.mxu1 %v9342_v6  ;;  %v7432_v6 = vld [vmem:[%s13129_s9 + $0x2f0] sm:$0xff] }
 0x650   :  { %9776 = vmatprep.subr.bf16.mxu1 %v10312_v3  ;;  %v9399_v19 = vpack.c.bf16 %v7433_v13, %v7432_v6  ;;  %v7468_v6 = vld [vmem:[%s13129_s9 + $0x400] sm:$0xff]  ;;  %v7469_v13 = vld [vmem:[%s13129_s9 + $0x408] sm:$0xff] }
 0x651   :  { %9346 = vmatpush1.bf16.msra.mxu0 %v9345_v18 }
 0x652   :  { %9347 = vmatprep.subr.bf16.mxu0 %v10312_v3 }
 0x653   :  { %9778 = vmatpush1.bf16.msra.mxu1 %v9345_v18  ;;  %v7435_v18 = vld [vmem:[%s13129_s9 + $0x300] sm:$0xff] }
 0x654   :  { %9779 = vmatprep.subr.bf16.mxu1 %v10312_v3  ;;  %v9402_v54 = vpack.c.bf16 %v7436_v14, %v7435_v18  ;;  %v7470_v18 = vld [vmem:[%s13129_s9 + $0x410] sm:$0xff]  ;;  %v7471_v14 = vld [vmem:[%s13129_s9 + $0x418] sm:$0xff] }
 0x655   :  { %9349 = vmatpush1.bf16.msra.mxu0 %v9348_v12 }
 0x656   :  { %9350 = vmatprep.subr.bf16.mxu0 %v10312_v3 }
 0x657   :  { %9781 = vmatpush1.bf16.msra.mxu1 %v9348_v12  ;;  %v4673_v12 = vrot.slane %v11954_v7, 3 }
 0x658   :  { %9782 = vmatprep.subr.bf16.mxu1 %v10312_v3 }
 0x659   :  { %9352 = vmatpush1.bf16.msra.mxu0 %v9351_v55 }
 0x65a   :  { %9353 = vmatprep.subr.bf16.mxu0 %v10312_v3 }
 0x65b   :  { %9784 = vmatpush1.bf16.msra.mxu1 %v9351_v55  ;;  %v5890_v55 = vrot.slane %v11956_v50, 3 }
 0x65c   :  { %9785 = vmatprep.subr.bf16.mxu1 %v10312_v3 }
 0x65d   :  { %9355 = vmatpush1.bf16.msra.mxu0 %v9354_v58 }
 0x65e   :  { %9356 = vmatprep.subr.bf16.mxu0 %v10312_v3 }
 0x65f   :  { %9787 = vmatpush1.bf16.msra.mxu1 %v9354_v58  ;;  %v9405_v58 = vpack.c.bf16 %v7438_v16, %v7437_v15  ;;  %v7473_v15 = vld [vmem:[%s13129_s9 + $0x428] sm:$0xff] }
 0x660   :  { %9788 = vmatprep.subr.bf16.mxu1 %v10312_v3 }
 0x661   :  { %9358 = vmatpush1.bf16.msra.mxu0 %v9357_v63 }
 0x662   :  { %9359 = vmatprep.subr.bf16.mxu0 %v10312_v3 }
 0x663   :  { %9790 = vmatpush1.bf16.msra.mxu1 %v9357_v63  ;;  %v9408_v63 = vpack.c.bf16 %v7440_v60, %v7439_v59  ;;  %v7477_v59 = vld [vmem:[%s13129_s9 + $0x448] sm:$0xff] }
 0x664   :  { %9791 = vmatprep.subr.bf16.mxu1 %v10312_v3 }
 0x665   :  { %9361 = vmatpush1.bf16.msra.mxu0 %v9360_v25 }
 0x666   :  { %9362 = vmatprep.subr.bf16.mxu0 %v10312_v3 }
 0x667   :  { %9793 = vmatpush1.bf16.msra.mxu1 %v9360_v25  ;;  %v9411_v25 = vpack.c.bf16 %v7442_v1, %v7441_v0  ;;  %v7479_v0 = vld [vmem:[%s13129_s9 + $0x458] sm:$0xff] }
 0x668   :  { %9794 = vmatprep.subr.bf16.mxu1 %v10312_v3 }
 0x669   :  { %9364 = vmatpush1.bf16.msra.mxu0 %v9363_v8 }
 0x66a   :  { %9365 = vmatprep.subr.bf16.mxu0 %v10312_v3 }
 0x66b   :  { %9796 = vmatpush1.bf16.msra.mxu1 %v9363_v8  ;;  %v9414_v8 = vpack.c.bf16 %v7444_v4, %v7443_v2  ;;  %v7481_v2 = vld [vmem:[%s13129_s9 + $0x468] sm:$0xff] }
 0x66c   :  { %9797 = vmatprep.subr.bf16.mxu1 %v10312_v3  ;;  %4642 = vmatmul.mubr.f32.vlgmr.msra.gmra.mrb[10].mxu0 %v4572_v31  ;;  %v7447_v31 = vld [vmem:[%s13129_s9 + $0x360] sm:$0xff] }
 0x66d   :  { %9367 = vmatpush1.bf16.msra.mxu0 %v9366_v27  ;;  %7434 = vmatprep.mubr.msk.f32.mxu0 %vm42_vm5, %v4674_v30  ;;  %v9420_v28 = vpack.c.bf16 %v7448_v32, %v7447_v31  ;;  %v7450_v30 = vld [vmem:[%s13129_s9 + $0x378] sm:$0xff]  ;;  %v7486_v31 = vld [vmem:[%s13129_s9 + $0x488] sm:$0xff] }
 0x66e   :  { %5860 = vmatmul.mubr.f32.vlgmr.msra.gmra.mrb[10].mxu1 %v5790_v29  ;;  %9368 = vmatprep.subr.bf16.mxu0 %v10312_v3  ;;  %v7449_v29 = vld [vmem:[%s13129_s9 + $0x370] sm:$0xff] }
 0x66f   :  { %9799 = vmatpush1.bf16.msra.mxu1 %v9366_v27  ;;  %7710 = vmatprep.mubr.msk.f32.mxu1 %vm42_vm5, %v5891_v33  ;;  %v9417_v27 = vpack.c.bf16 %v7446_v26, %v7445_v20  ;;  %v9423_v33 = vpack.c.bf16 %v7450_v30, %v7449_v29  ;;  %v7483_v20 = vld [vmem:[%s13129_s9 + $0x478] sm:$0xff]  ;;  %v7487_v29 = vld [vmem:[%s13129_s9 + $0x490] sm:$0xff] }
 0x670   :  { %9800 = vmatprep.subr.bf16.mxu1 %v10312_v3  ;;  %v7488_v30 = vld [vmem:[%s13129_s9 + $0x498] sm:$0xff] }
 0x671   :  { %9370 = vmatpush1.bf16.msra.mxu0 %v9369_v35 }
 0x672   :  { %9371 = vmatprep.subr.bf16.mxu0 %v10312_v3 }
 0x673   :  { %9802 = vmatpush1.bf16.msra.mxu1 %v9369_v35  ;;  %v7451_v35 = vld [vmem:[%s13129_s9 + $0x380] sm:$0xff] }
 0x674   :  { %9803 = vmatprep.subr.bf16.mxu1 %v10312_v3  ;;  %v9426_v34 = vpack.c.bf16 %v7452_v38, %v7451_v35  ;;  %v4977_v35 = vrot.slane %v11970_v52, 6  ;;  %v9477_v38 = vpack.c.bf16 %v7488_v30, %v7487_v29  ;;  %v7523_v29 = vld [vmem:[%s13129_s9 + $0x5a8] sm:$0xff] }
 0x675   :  { %9373 = vmatpush1.bf16.msra.mxu0 %v9372_v39 }
 0x676   :  { %9374 = vmatprep.subr.bf16.mxu0 %v10312_v3 }
 0x677   :  { %9805 = vmatpush1.bf16.msra.mxu1 %v9372_v39  ;;  %v7453_v39 = vld [vmem:[%s13129_s9 + $0x390] sm:$0xff] }
 0x678   :  { %9806 = vmatprep.subr.bf16.mxu1 %v10312_v3  ;;  %v9429_v37 = vpack.c.bf16 %v7454_v36, %v7453_v39  ;;  %v7492_v39 = vld [vmem:[%s13129_s9 + $0x4b8] sm:$0xff] }
 0x679   :  { %9376 = vmatpush1.bf16.msra.mxu0 %v9375_v40 }
 0x67a   :  { %9377 = vmatprep.subr.bf16.mxu0 %v10312_v3 }
 0x67b   :  { %9808 = vmatpush1.bf16.msra.mxu1 %v9375_v40  ;;  %v7455_v40 = vld [vmem:[%s13129_s9 + $0x3a0] sm:$0xff] }
 0x67c   :  { %9809 = vmatprep.subr.bf16.mxu1 %v10312_v3  ;;  %v9432_v21 = vpack.c.bf16 %v7456_v41, %v7455_v40  ;;  %v7494_v40 = vld [vmem:[%s13129_s9 + $0x4c8] sm:$0xff] }
 0x67d   :  { %9379 = vmatpush1.bf16.msra.mxu0 %v9378_v51 }
 0x67e   :  { %9380 = vmatprep.subr.bf16.mxu0 %v10312_v3 }
 0x67f   :  { %9811 = vmatpush1.bf16.msra.mxu1 %v9378_v51  ;;  %v7457_v51 = vld [vmem:[%s13129_s9 + $0x3b0] sm:$0xff] }
 0x680   :  { %9812 = vmatprep.subr.bf16.mxu1 %v10312_v3  ;;  %v9435_v42 = vpack.c.bf16 %v7458_v23, %v7457_v51  ;;  %v7496_v51 = vld [vmem:[%s13129_s9 + $0x4d8] sm:$0xff] }
 0x681   :  { %9382 = vmatpush1.bf16.msra.mxu0 %v9381_v43 }
 0x682   :  { %9383 = vmatprep.subr.bf16.mxu0 %v10312_v3 }
 0x683   :  { %9814 = vmatpush1.bf16.msra.mxu1 %v9381_v43  ;;  %v7460_v43 = vld [vmem:[%s13129_s9 + $0x3c0] sm:$0xff] }
 0x684   :  { %9815 = vmatprep.subr.bf16.mxu1 %v10312_v3  ;;  %v9438_v61 = vpack.c.bf16 %v7461_v44, %v7460_v43  ;;  %v7498_v43 = vld [vmem:[%s13129_s9 + $0x4e8] sm:$0xff] }
 0x685   :  { %9385 = vmatpush1.bf16.msra.mxu0 %v9384_v62 }
 0x686   :  { %9386 = vmatprep.subr.bf16.mxu0 %v10312_v3 }
 0x687   :  { %9817 = vmatpush1.bf16.msra.mxu1 %v9384_v62  ;;  %v4774_v62 = vrot.slane %v11954_v7, 4 }
 0x688   :  { %9818 = vmatprep.subr.bf16.mxu1 %v10312_v3 }
 0x689   :  { %9388 = vmatpush1.bf16.msra.mxu0 %v9387_v47 }
 0x68a   :  { %9389 = vmatprep.subr.bf16.mxu0 %v10312_v3 }
 0x68b   :  { %9820 = vmatpush1.bf16.msra.mxu1 %v9387_v47  ;;  %v5990_v47 = vrot.slane %v11956_v50, 4 }
 0x68c   :  { %9821 = vmatprep.subr.bf16.mxu1 %v10312_v3 }
 0x68d   :  { %9391 = vmatpush1.bf16.msra.mxu0 %v9390_v22 }
 0x68e   :  { %9392 = vmatprep.subr.bf16.mxu0 %v10312_v3 }
 0x68f   :  { %9823 = vmatpush1.bf16.msra.mxu1 %v9390_v22  ;;  %v9441_v22 = vpack.c.bf16 %v7463_v46, %v7462_v45  ;;  %v7501_v46 = vld [vmem:[%s13129_s9 + $0x500] sm:$0xff] }
 0x690   :  { %9824 = vmatprep.subr.bf16.mxu1 %v10312_v3 }
 0x691   :  { %9394 = vmatpush1.bf16.msra.mxu0 %v9393_v10 }
 0x692   :  { %9395 = vmatprep.subr.bf16.mxu0 %v10312_v3 }
 0x693   :  { %9826 = vmatpush1.bf16.msra.mxu1 %v9393_v10  ;;  %v9444_v10 = vpack.c.bf16 %v7465_v5, %v7464_v9  ;;  %v7505_v5 = vld [vmem:[%s13129_s9 + $0x520] sm:$0xff] }
 0x694   :  { %9827 = vmatprep.subr.bf16.mxu1 %v10312_v3 }
 0x695   :  { %9397 = vmatpush1.bf16.msra.mxu0 %v9396_v53 }
 0x696   :  { %9398 = vmatprep.subr.bf16.mxu0 %v10312_v3 }
 0x697   :  { %9829 = vmatpush1.bf16.msra.mxu1 %v9396_v53  ;;  %v9447_v53 = vpack.c.bf16 %v7467_v24, %v7466_v17  ;;  %v7507_v24 = vld [vmem:[%s13129_s9 + $0x530] sm:$0xff] }
 0x698   :  { %9830 = vmatprep.subr.bf16.mxu1 %v10312_v3 }
 0x699   :  { %9400 = vmatpush1.bf16.msra.mxu0 %v9399_v19 }
 0x69a   :  { %9401 = vmatprep.subr.bf16.mxu0 %v10312_v3 }
 0x69b   :  { %9832 = vmatpush1.bf16.msra.mxu1 %v9399_v19  ;;  %v9450_v19 = vpack.c.bf16 %v7469_v13, %v7468_v6  ;;  %v7510_v13 = vld [vmem:[%s13129_s9 + $0x540] sm:$0xff] }
 0x69c   :  { %9833 = vmatprep.subr.bf16.mxu1 %v10312_v3  ;;  %4743 = vmatmul.mubr.f32.vlgmr.msra.gmra.mrb[10].mxu0 %v4673_v12  ;;  %v7472_v12 = vld [vmem:[%s13129_s9 + $0x420] sm:$0xff] }
 0x69d   :  { %9403 = vmatpush1.bf16.msra.mxu0 %v9402_v54  ;;  %7459 = vmatprep.mubr.msk.f32.mxu0 %vm42_vm5, %v4775_v56  ;;  %v9456_v16 = vpack.c.bf16 %v7473_v15, %v7472_v12  ;;  %v7475_v56 = vld [vmem:[%s13129_s9 + $0x438] sm:$0xff]  ;;  %v7512_v12 = vld [vmem:[%s13129_s9 + $0x550] sm:$0xff] }
 0x69e   :  { %5960 = vmatmul.mubr.f32.vlgmr.msra.gmra.mrb[10].mxu1 %v5890_v55  ;;  %9404 = vmatprep.subr.bf16.mxu0 %v10312_v3  ;;  %v7474_v55 = vld [vmem:[%s13129_s9 + $0x430] sm:$0xff]  ;;  %v7513_v15 = vld [vmem:[%s13129_s9 + $0x558] sm:$0xff] }
 0x69f   :  { %9835 = vmatpush1.bf16.msra.mxu1 %v9402_v54  ;;  %7735 = vmatprep.mubr.msk.f32.mxu1 %vm42_vm5, %v5991_v57  ;;  %v9453_v54 = vpack.c.bf16 %v7471_v14, %v7470_v18  ;;  %v9459_v57 = vpack.c.bf16 %v7475_v56, %v7474_v55  ;;  %v12588_v14 = vld [vmem:[#allocation3] sm:$0xff]  ;;  %v10283_v56 = vld [vmem:[#allocation3 + $0x8] sm:$0xff] }
 0x6a0   :  { %9836 = vmatprep.subr.bf16.mxu1 %v10312_v3 }
 0x6a1   :  { %9406 = vmatpush1.bf16.msra.mxu0 %v9405_v58 }
 0x6a2   :  { %9407 = vmatprep.subr.bf16.mxu0 %v10312_v3 }
 0x6a3   :  { %9838 = vmatpush1.bf16.msra.mxu1 %v9405_v58  ;;  %v7476_v58 = vld [vmem:[%s13129_s9 + $0x440] sm:$0xff] }
 0x6a4   :  { %9839 = vmatprep.subr.bf16.mxu1 %v10312_v3  ;;  %v9462_v60 = vpack.c.bf16 %v7477_v59, %v7476_v58  ;;  %v10284_v58 = vld [vmem:[#allocation3 + $0x28] sm:$0xff] }
 0x6a5   :  { %9409 = vmatpush1.bf16.msra.mxu0 %v9408_v63  ;;  %v6291_v59 = vrot.slane %v10284_v58, 7 }
 0x6a6   :  { %9410 = vmatprep.subr.bf16.mxu0 %v10312_v3 }
 0x6a7   :  { %9841 = vmatpush1.bf16.msra.mxu1 %v9408_v63  ;;  %v7478_v63 = vld [vmem:[%s13129_s9 + $0x450] sm:$0xff] }
 0x6a8   :  { %9842 = vmatprep.subr.bf16.mxu1 %v10312_v3  ;;  %v9465_v1 = vpack.c.bf16 %v7479_v0, %v7478_v63  ;;  %v7514_v63 = vld [vmem:[%s13129_s9 + $0x560] sm:$0xff]  ;;  %v7515_v0 = vld [vmem:[%s13129_s9 + $0x568] sm:$0xff] }
 0x6a9   :  { %9412 = vmatpush1.bf16.msra.mxu0 %v9411_v25 }
 0x6aa   :  { %9413 = vmatprep.subr.bf16.mxu0 %v10312_v3 }
 0x6ab   :  { %9844 = vmatpush1.bf16.msra.mxu1 %v9411_v25  ;;  %v7480_v25 = vld [vmem:[%s13129_s9 + $0x460] sm:$0xff] }
 0x6ac   :  { %9845 = vmatprep.subr.bf16.mxu1 %v10312_v3  ;;  %v9468_v4 = vpack.c.bf16 %v7481_v2, %v7480_v25  ;;  %v7516_v25 = vld [vmem:[%s13129_s9 + $0x570] sm:$0xff]  ;;  %v7517_v2 = vld [vmem:[%s13129_s9 + $0x578] sm:$0xff] }
 0x6ad   :  { %9415 = vmatpush1.bf16.msra.mxu0 %v9414_v8 }
 0x6ae   :  { %9416 = vmatprep.subr.bf16.mxu0 %v10312_v3 }
 0x6af   :  { %9847 = vmatpush1.bf16.msra.mxu1 %v9414_v8  ;;  %v7482_v8 = vld [vmem:[%s13129_s9 + $0x470] sm:$0xff] }
 0x6b0   :  { %9848 = vmatprep.subr.bf16.mxu1 %v10312_v3  ;;  %v9471_v26 = vpack.c.bf16 %v7483_v20, %v7482_v8  ;;  %v7518_v8 = vld [vmem:[%s13129_s9 + $0x580] sm:$0xff]  ;;  %v7519_v20 = vld [vmem:[%s13129_s9 + $0x588] sm:$0xff] }
 0x6b1   :  { %9418 = vmatpush1.bf16.msra.mxu0 %v9417_v27 }
 0x6b2   :  { %9419 = vmatprep.subr.bf16.mxu0 %v10312_v3 }
 0x6b3   :  { %9850 = vmatpush1.bf16.msra.mxu1 %v9417_v27  ;;  %v7485_v27 = vld [vmem:[%s13129_s9 + $0x480] sm:$0xff] }
 0x6b4   :  { %9851 = vmatprep.subr.bf16.mxu1 %v10312_v3  ;;  %v9474_v32 = vpack.c.bf16 %v7486_v31, %v7485_v27  ;;  %v7520_v27 = vld [vmem:[%s13129_s9 + $0x590] sm:$0xff]  ;;  %v7521_v31 = vld [vmem:[%s13129_s9 + $0x598] sm:$0xff] }
 0x6b5   :  { %9421 = vmatpush1.bf16.msra.mxu0 %v9420_v28 }
 0x6b6   :  { %9422 = vmatprep.subr.bf16.mxu0 %v10312_v3 }
 0x6b7   :  { %9853 = vmatpush1.bf16.msra.mxu1 %v9420_v28  ;;  %v4875_v28 = vrot.slane %v11954_v7, 5  ;;  %v6191_v7 = vrot.slane %v11973_v11, 6  ;;  %v7491_v11 = vld [vmem:[%s13129_s9 + $0x4b0] sm:$0xff] }
 0x6b8   :  { %9854 = vmatprep.subr.bf16.mxu1 %v10312_v3  ;;  %v9483_v36 = vpack.c.bf16 %v7492_v39, %v7491_v11  ;;  %v7529_v11 = vld [vmem:[%s13129_s9 + $0x5d8] sm:$0xff] }
 0x6b9   :  { %9424 = vmatpush1.bf16.msra.mxu0 %v9423_v33 }
 0x6ba   :  { %9425 = vmatprep.subr.bf16.mxu0 %v10312_v3 }
 0x6bb   :  { %9856 = vmatpush1.bf16.msra.mxu1 %v9423_v33  ;;  %v6090_v33 = vrot.slane %v11956_v50, 5  ;;  %v7490_v50 = vld [vmem:[%s13129_s9 + $0x4a8] sm:$0xff] }
 0x6bc   :  { %9857 = vmatprep.subr.bf16.mxu1 %v10312_v3 }
 0x6bd   :  { %9427 = vmatpush1.bf16.msra.mxu0 %v9426_v34 }
 0x6be   :  { %9428 = vmatprep.subr.bf16.mxu0 %v10312_v3 }
 0x6bf   :  { %9859 = vmatpush1.bf16.msra.mxu1 %v9426_v34  ;;  %v7489_v34 = vld [vmem:[%s13129_s9 + $0x4a0] sm:$0xff] }
 0x6c0   :  { %9860 = vmatprep.subr.bf16.mxu1 %v10312_v3  ;;  %v9480_v52 = vpack.c.bf16 %v7490_v50, %v7489_v34  ;;  %v7527_v34 = vld [vmem:[%s13129_s9 + $0x5c8] sm:$0xff] }
 0x6c1   :  { %9430 = vmatpush1.bf16.msra.mxu0 %v9429_v37 }
 0x6c2   :  { %9431 = vmatprep.subr.bf16.mxu0 %v10312_v3 }
 0x6c3   :  { %9862 = vmatpush1.bf16.msra.mxu1 %v9429_v37  ;;  %v7493_v37 = vld [vmem:[%s13129_s9 + $0x4c0] sm:$0xff] }
 0x6c4   :  { %9863 = vmatprep.subr.bf16.mxu1 %v10312_v3  ;;  %v9486_v41 = vpack.c.bf16 %v7494_v40, %v7493_v37  ;;  %v7531_v37 = vld [vmem:[%s13129_s9 + $0x5e8] sm:$0xff] }
 0x6c5   :  { %9433 = vmatpush1.bf16.msra.mxu0 %v9432_v21 }
 0x6c6   :  { %9434 = vmatprep.subr.bf16.mxu0 %v10312_v3 }
 0x6c7   :  { %9865 = vmatpush1.bf16.msra.mxu1 %v9432_v21  ;;  %v7495_v21 = vld [vmem:[%s13129_s9 + $0x4d0] sm:$0xff] }
 0x6c8   :  { %9866 = vmatprep.subr.bf16.mxu1 %v10312_v3  ;;  %v9489_v23 = vpack.c.bf16 %v7496_v51, %v7495_v21  ;;  %v7533_v21 = vld [vmem:[%s13129_s9 + $0x5f8] sm:$0xff] }
 0x6c9   :  { %9436 = vmatpush1.bf16.msra.mxu0 %v9435_v42 }
 0x6ca   :  { %9437 = vmatprep.subr.bf16.mxu0 %v10312_v3 }
 0x6cb   :  { %9868 = vmatpush1.bf16.msra.mxu1 %v9435_v42  ;;  %v7497_v42 = vld [vmem:[%s13129_s9 + $0x4e0] sm:$0xff] }
 0x6cc   :  { %9869 = vmatprep.subr.bf16.mxu1 %v10312_v3  ;;  %4844 = vmatmul.mubr.f32.vlgmr.msra.gmra.mrb[10].mxu0 %v4774_v62  ;;  %v9492_v44 = vpack.c.bf16 %v7498_v43, %v7497_v42  ;;  %v7500_v62 = vld [vmem:[%s13129_s9 + $0x4f8] sm:$0xff]  ;;  %v7536_v42 = vld [vmem:[%s13129_s9 + $0x608] sm:$0xff] }
 0x6cd   :  { %9439 = vmatpush1.bf16.msra.mxu0 %v9438_v61  ;;  %7484 = vmatprep.mubr.msk.f32.mxu0 %vm42_vm5, %v4876_v48 }
 0x6ce   :  { %6060 = vmatmul.mubr.f32.vlgmr.msra.gmra.mrb[10].mxu1 %v5990_v47  ;;  %9440 = vmatprep.subr.bf16.mxu0 %v10312_v3  ;;  %v7502_v47 = vld [vmem:[%s13129_s9 + $0x508] sm:$0xff] }
 0x6cf   :  { %9871 = vmatpush1.bf16.msra.mxu1 %v9438_v61  ;;  %7760 = vmatprep.mubr.msk.f32.mxu1 %vm42_vm5, %v6091_v49  ;;  %v7499_v61 = vld [vmem:[%s13129_s9 + $0x4f0] sm:$0xff]  ;;  %v9498_v48 = vpack.c.bf16 %v7502_v47, %v7501_v46  ;;  %v12702_v46 = vld [vmem:[#allocation3 + $0x18] sm:$0xf] }
 0x6d0   :  { %9872 = vmatprep.subr.bf16.mxu1 %v10312_v3  ;;  %v9495_v45 = vpack.c.bf16 %v7500_v62, %v7499_v61  ;;  %v7503_v49 = vld [vmem:[%s13129_s9 + $0x510] sm:$0xff]  ;;  %v7538_v62 = vld [vmem:[%s13129_s9 + $0x618] sm:$0xff] }
 0x6d1   :  { %9442 = vmatpush1.bf16.msra.mxu0 %v9441_v22  ;;  %v7537_v61 = vld [vmem:[%s13129_s9 + $0x610] sm:$0xff] }
 0x6d2   :  { %9443 = vmatprep.subr.bf16.mxu0 %v10312_v3  ;;  %v9549_v47 = vpack.c.bf16 %v7538_v62, %v7537_v61  ;;  %v7576_v62 = vld [vmem:[%s13129_s9 + $0x740] sm:$0xff] }
 0x6d3   :  { %9874 = vmatpush1.bf16.msra.mxu1 %v9441_v22  ;;  %v7504_v22 = vld [vmem:[%s13129_s9 + $0x518] sm:$0xff] }
 0x6d4   :  { %9875 = vmatprep.subr.bf16.mxu1 %v10312_v3  ;;  %v9501_v9 = vpack.c.bf16 %v7504_v22, %v7503_v49  ;;  %v7539_v49 = vld [vmem:[%s13129_s9 + $0x620] sm:$0xff]  ;;  %v7540_v22 = vld [vmem:[%s13129_s9 + $0x628] sm:$0xff] }
 0x6d5   :  { %9445 = vmatpush1.bf16.msra.mxu0 %v9444_v10 }
 0x6d6   :  { %9446 = vmatprep.subr.bf16.mxu0 %v10312_v3 }
 0x6d7   :  { %9877 = vmatpush1.bf16.msra.mxu1 %v9444_v10  ;;  %v7506_v10 = vld [vmem:[%s13129_s9 + $0x528] sm:$0xff] }
 0x6d8   :  { %9878 = vmatprep.subr.bf16.mxu1 %v10312_v3  ;;  %v9504_v17 = vpack.c.bf16 %v7506_v10, %v7505_v5  ;;  %v7541_v5 = vld [vmem:[%s13129_s9 + $0x630] sm:$0xff]  ;;  %v7542_v10 = vld [vmem:[%s13129_s9 + $0x638] sm:$0xff] }
 0x6d9   :  { %9448 = vmatpush1.bf16.msra.mxu0 %v9447_v53 }
 0x6da   :  { %9449 = vmatprep.subr.bf16.mxu0 %v10312_v3 }
 0x6db   :  { %9880 = vmatpush1.bf16.msra.mxu1 %v9447_v53  ;;  %v7508_v53 = vld [vmem:[%s13129_s9 + $0x538] sm:$0xff] }
 0x6dc   :  { %9881 = vmatprep.subr.bf16.mxu1 %v10312_v3  ;;  %v9507_v6 = vpack.c.bf16 %v7508_v53, %v7507_v24  ;;  %v7543_v24 = vld [vmem:[%s13129_s9 + $0x640] sm:$0xff]  ;;  %v7544_v53 = vld [vmem:[%s13129_s9 + $0x648] sm:$0xff] }
 0x6dd   :  { %9451 = vmatpush1.bf16.msra.mxu0 %v9450_v19 }
 0x6de   :  { %9452 = vmatprep.subr.bf16.mxu0 %v10312_v3 }
 0x6df   :  { %9883 = vmatpush1.bf16.msra.mxu1 %v9450_v19  ;;  %v7511_v19 = vld [vmem:[%s13129_s9 + $0x548] sm:$0xff] }
 0x6e0   :  { %9884 = vmatprep.subr.bf16.mxu1 %v10312_v3  ;;  %v9510_v18 = vpack.c.bf16 %v7511_v19, %v7510_v13  ;;  %v7545_v13 = vld [vmem:[%s13129_s9 + $0x650] sm:$0xff]  ;;  %v7546_v19 = vld [vmem:[%s13129_s9 + $0x658] sm:$0xff] }
 0x6e1   :  { %9454 = vmatpush1.bf16.msra.mxu0 %v9453_v54 }
 0x6e2   :  { %9455 = vmatprep.subr.bf16.mxu0 %v10312_v3 }
 0x6e3   :  { %9886 = vmatpush1.bf16.msra.mxu1 %v9453_v54  ;;  %v4976_v54 = vrot.slane %v12588_v14, 6 }
 0x6e4   :  { %9887 = vmatprep.subr.bf16.mxu1 %v10312_v3 }
 0x6e5   :  { %9457 = vmatpush1.bf16.msra.mxu0 %v9456_v16 }
 0x6e6   :  { %9458 = vmatprep.subr.bf16.mxu0 %v10312_v3 }
 0x6e7   :  { %9889 = vmatpush1.bf16.msra.mxu1 %v9456_v16  ;;  %v12598_v16 = vld [vmem:[#allocation3 + $0x20] sm:$0xff] }
 0x6e8   :  { %9890 = vmatprep.subr.bf16.mxu1 %v10312_v3  ;;  %v6190_v55 = vrot.slane %v12598_v16, 6 }
 0x6e9   :  { %9460 = vmatpush1.bf16.msra.mxu0 %v9459_v57 }
 0x6ea   :  { %9461 = vmatprep.subr.bf16.mxu0 %v10312_v3 }
 0x6eb   :  { %9892 = vmatpush1.bf16.msra.mxu1 %v9459_v57  ;;  %v5078_v57 = vrot.slane %v10283_v56, 7  ;;  %v7551_v56 = vld [vmem:[%s13129_s9 + $0x680] sm:$0xff] }
 0x6ec   :  { %9893 = vmatprep.subr.bf16.mxu1 %v10312_v3 }
 0x6ed   :  { %9463 = vmatpush1.bf16.msra.mxu0 %v9462_v60 }
 0x6ee   :  { %9464 = vmatprep.subr.bf16.mxu0 %v10312_v3 }
 0x6ef   :  { %9895 = vmatpush1.bf16.msra.mxu1 %v9462_v60  ;;  %v9513_v60 = vpack.c.bf16 %v7513_v15, %v7512_v12  ;;  %v7549_v15 = vld [vmem:[%s13129_s9 + $0x670] sm:$0xff] }
 0x6f0   :  { %9896 = vmatprep.subr.bf16.mxu1 %v10312_v3 }
 0x6f1   :  { %9466 = vmatpush1.bf16.msra.mxu0 %v9465_v1 }
 0x6f2   :  { %9467 = vmatprep.subr.bf16.mxu0 %v10312_v3 }
 0x6f3   :  { %9898 = vmatpush1.bf16.msra.mxu1 %v9465_v1  ;;  %v9516_v1 = vpack.c.bf16 %v7515_v0, %v7514_v63  ;;  %v7555_v0 = vld [vmem:[%s13129_s9 + $0x6a0] sm:$0xff] }
 0x6f4   :  { %9899 = vmatprep.subr.bf16.mxu1 %v10312_v3 }
 0x6f5   :  { %9469 = vmatpush1.bf16.msra.mxu0 %v9468_v4 }
 0x6f6   :  { %9470 = vmatprep.subr.bf16.mxu0 %v10312_v3 }
 0x6f7   :  { %9901 = vmatpush1.bf16.msra.mxu1 %v9468_v4  ;;  %v9519_v4 = vpack.c.bf16 %v7517_v2, %v7516_v25  ;;  %v7557_v2 = vld [vmem:[%s13129_s9 + $0x6b0] sm:$0xff] }
 0x6f8   :  { %9902 = vmatprep.subr.bf16.mxu1 %v10312_v3 }
 0x6f9   :  { %9472 = vmatpush1.bf16.msra.mxu0 %v9471_v26 }
 0x6fa   :  { %9473 = vmatprep.subr.bf16.mxu0 %v10312_v3 }
 0x6fb   :  { %9904 = vmatpush1.bf16.msra.mxu1 %v9471_v26  ;;  %v9522_v26 = vpack.c.bf16 %v7519_v20, %v7518_v8  ;;  %v7560_v20 = vld [vmem:[%s13129_s9 + $0x6c0] sm:$0xff] }
 0x6fc   :  { %9905 = vmatprep.subr.bf16.mxu1 %v10312_v3  ;;  %4945 = vmatmul.mubr.f32.vlgmr.msra.gmra.mrb[10].mxu0 %v4875_v28  ;;  %v7522_v28 = vld [vmem:[%s13129_s9 + $0x5a0] sm:$0xff] }
 0x6fd   :  { %9475 = vmatpush1.bf16.msra.mxu0 %v9474_v32  ;;  %7509 = vmatprep.mubr.msk.f32.mxu0 %vm42_vm5, %v4977_v35  ;;  %v9528_v30 = vpack.c.bf16 %v7523_v29, %v7522_v28  ;;  %v7525_v35 = vld [vmem:[%s13129_s9 + $0x5b8] sm:$0xff]  ;;  %v12805_v28 = vld [vmem:[#allocation3 + $0x10] sm:$0xf] }
 0x6fe   :  { %6160 = vmatmul.mubr.f32.vlgmr.msra.gmra.mrb[10].mxu1 %v6090_v33  ;;  %9476 = vmatprep.subr.bf16.mxu0 %v10312_v3  ;;  %v7524_v33 = vld [vmem:[%s13129_s9 + $0x5b0] sm:$0xff] }
 0x6ff   :  { %9907 = vmatpush1.bf16.msra.mxu1 %v9474_v32  ;;  %7785 = vmatprep.mubr.msk.f32.mxu1 %vm42_vm5, %v6191_v7  ;;  %v9525_v32 = vpack.c.bf16 %v7521_v31, %v7520_v27  ;;  %v9531_v7 = vpack.c.bf16 %v7525_v35, %v7524_v33  ;;  %v7562_v31 = vld [vmem:[%s13129_s9 + $0x6d0] sm:$0xff] }
 0x700   :  { %9908 = vmatprep.subr.bf16.mxu1 %v10312_v3  ;;  %v12809_v29 = vld [vmem:[#allocation3 + $0x30] sm:$0xf] }
 0x701   :  { %9478 = vmatpush1.bf16.msra.mxu0 %v9477_v38 }
 0x702   :  { %9479 = vmatprep.subr.bf16.mxu0 %v10312_v3 }
 0x703   :  { %9910 = vmatpush1.bf16.msra.mxu1 %v9477_v38  ;;  %v7526_v38 = vld [vmem:[%s13129_s9 + $0x5c0] sm:$0xff] }
 0x704   :  { %9911 = vmatprep.subr.bf16.mxu1 %v10312_v3  ;;  %v9534_v50 = vpack.c.bf16 %v7527_v34, %v7526_v38  ;;  %v7565_v38 = vld [vmem:[%s13129_s9 + $0x6e8] sm:$0xff] }
 0x705   :  { %9481 = vmatpush1.bf16.msra.mxu0 %v9480_v52 }
 0x706   :  { %9482 = vmatprep.subr.bf16.mxu0 %v10312_v3 }
 0x707   :  { %9913 = vmatpush1.bf16.msra.mxu1 %v9480_v52  ;;  %v7528_v52 = vld [vmem:[%s13129_s9 + $0x5d0] sm:$0xff] }
 0x708   :  { %9914 = vmatprep.subr.bf16.mxu1 %v10312_v3  ;;  %v9537_v39 = vpack.c.bf16 %v7529_v11, %v7528_v52  ;;  %v7567_v52 = vld [vmem:[%s13129_s9 + $0x6f8] sm:$0xff] }
 0x709   :  { %9484 = vmatpush1.bf16.msra.mxu0 %v9483_v36 }
 0x70a   :  { %9485 = vmatprep.subr.bf16.mxu0 %v10312_v3 }
 0x70b   :  { %9916 = vmatpush1.bf16.msra.mxu1 %v9483_v36  ;;  %v7530_v36 = vld [vmem:[%s13129_s9 + $0x5e0] sm:$0xff] }
 0x70c   :  { %9917 = vmatprep.subr.bf16.mxu1 %v10312_v3  ;;  %v9540_v40 = vpack.c.bf16 %v7531_v37, %v7530_v36  ;;  %v7569_v36 = vld [vmem:[%s13129_s9 + $0x708] sm:$0xff] }
 0x70d   :  { %9487 = vmatpush1.bf16.msra.mxu0 %v9486_v41 }
 0x70e   :  { %9488 = vmatprep.subr.bf16.mxu0 %v10312_v3 }
 0x70f   :  { %9919 = vmatpush1.bf16.msra.mxu1 %v9486_v41  ;;  %v7532_v41 = vld [vmem:[%s13129_s9 + $0x5f0] sm:$0xff] }
 0x710   :  { %9920 = vmatprep.subr.bf16.mxu1 %v10312_v3  ;;  %v9543_v51 = vpack.c.bf16 %v7533_v21, %v7532_v41  ;;  %v7571_v41 = vld [vmem:[%s13129_s9 + $0x718] sm:$0xff] }
 0x711   :  { %9490 = vmatpush1.bf16.msra.mxu0 %v9489_v23 }
 0x712   :  { %9491 = vmatprep.subr.bf16.mxu0 %v10312_v3 }
 0x713   :  { %9922 = vmatpush1.bf16.msra.mxu1 %v9489_v23  ;;  %v7535_v23 = vld [vmem:[%s13129_s9 + $0x600] sm:$0xff] }
 0x714   :  { %9923 = vmatprep.subr.bf16.mxu1 %v10312_v3  ;;  %v9546_v43 = vpack.c.bf16 %v7536_v42, %v7535_v23  ;;  %v7573_v23 = vld [vmem:[%s13129_s9 + $0x728] sm:$0xff] }
 0x715   :  { %9493 = vmatpush1.bf16.msra.mxu0 %v9492_v44 }
 0x716   :  { %9494 = vmatprep.subr.bf16.mxu0 %v10312_v3 }
 0x717   :  { %9925 = vmatpush1.bf16.msra.mxu1 %v9492_v44  ;;  %v5077_v44 = vrot.slane %v12588_v14, 7  ;;  %v7547_v14 = vld [vmem:[%s13129_s9 + $0x660] sm:$0xff] }
 0x718   :  { %9926 = vmatprep.subr.bf16.mxu1 %v10312_v3 }
 0x719   :  { %9496 = vmatpush1.bf16.msra.mxu0 %v9495_v45 }
 0x71a   :  { %9497 = vmatprep.subr.bf16.mxu0 %v10312_v3 }
 0x71b   :  { %9928 = vmatpush1.bf16.msra.mxu1 %v9495_v45  ;;  %v6290_v45 = vrot.slane %v12598_v16, 7  ;;  %v7550_v16 = vld [vmem:[%s13129_s9 + $0x678] sm:$0xff] }
 0x71c   :  { %9929 = vmatprep.subr.bf16.mxu1 %v10312_v3 }
 0x71d   :  { %9499 = vmatpush1.bf16.msra.mxu0 %v9498_v48 }
 0x71e   :  { %9500 = vmatprep.subr.bf16.mxu0 %v10312_v3 }
 0x71f   :  { %9931 = vmatpush1.bf16.msra.mxu1 %v9498_v48  ;;  %v12706_v48 = vld [vmem:[#allocation3 + $0x38] sm:$0xf] }
 0x720   :  { %9932 = vmatprep.subr.bf16.mxu1 %v10312_v3  ;;  %v6490_v33 = vrot.slane %v12706_v48, 1 }
 0x721   :  { %9502 = vmatpush1.bf16.msra.mxu0 %v9501_v9 }
 0x722   :  { %9503 = vmatprep.subr.bf16.mxu0 %v10312_v3 }
 0x723   :  { %9934 = vmatpush1.bf16.msra.mxu1 %v9501_v9  ;;  %v9552_v9 = vpack.c.bf16 %v7540_v22, %v7539_v49  ;;  %v7578_v49 = vld [vmem:[%s13129_s9 + $0x750] sm:$0xff]  ;;  %v7579_v22 = vld [vmem:[%s13129_s9 + $0x758] sm:$0xff] }
 0x724   :  { %9935 = vmatprep.subr.bf16.mxu1 %v10312_v3 }
 0x725   :  { %9505 = vmatpush1.bf16.msra.mxu0 %v9504_v17 }
 0x726   :  { %9506 = vmatprep.subr.bf16.mxu0 %v10312_v3 }
 0x727   :  { %9937 = vmatpush1.bf16.msra.mxu1 %v9504_v17  ;;  %v9555_v17 = vpack.c.bf16 %v7542_v10, %v7541_v5  ;;  %v7580_v5 = vld [vmem:[%s13129_s9 + $0x760] sm:$0xff]  ;;  %v7581_v10 = vld [vmem:[%s13129_s9 + $0x768] sm:$0xff] }
 0x728   :  { %9938 = vmatprep.subr.bf16.mxu1 %v10312_v3 }
 0x729   :  { %9508 = vmatpush1.bf16.msra.mxu0 %v9507_v6 }
 0x72a   :  { %9509 = vmatprep.subr.bf16.mxu0 %v10312_v3 }
 0x72b   :  { %9940 = vmatpush1.bf16.msra.mxu1 %v9507_v6  ;;  %v9558_v6 = vpack.c.bf16 %v7544_v53, %v7543_v24  ;;  %v7582_v24 = vld [vmem:[%s13129_s9 + $0x770] sm:$0xff]  ;;  %v7583_v53 = vld [vmem:[%s13129_s9 + $0x778] sm:$0xff] }
 0x72c   :  { %9941 = vmatprep.subr.bf16.mxu1 %v10312_v3  ;;  %5046 = vmatmul.mubr.f32.vlgmr.msra.gmra.mrb[10].mxu0 %v4976_v54  ;;  %v7548_v54 = vld [vmem:[%s13129_s9 + $0x668] sm:$0xff] }
 0x72d   :  { %9511 = vmatpush1.bf16.msra.mxu0 %v9510_v18  ;;  %7534 = vmatprep.mubr.msk.f32.mxu0 %vm42_vm5, %v5078_v57  ;;  %v9564_v12 = vpack.c.bf16 %v7548_v54, %v7547_v14  ;;  %v7552_v57 = vld [vmem:[%s13129_s9 + $0x688] sm:$0xff]  ;;  %v5278_v14 = vrot.slane %v12805_v28, 1  ;;  %v7587_v54 = vld [vmem:[%s13129_s9 + $0x790] sm:$0xff] }
 0x72e   :  { %6260 = vmatmul.mubr.f32.vlgmr.msra.gmra.mrb[10].mxu1 %v6190_v55  ;;  %9512 = vmatprep.subr.bf16.mxu0 %v10312_v3  ;;  %v9567_v55 = vpack.c.bf16 %v7550_v16, %v7549_v15  ;;  %v9570_v58 = vpack.c.bf16 %v7552_v57, %v7551_v56  ;;  %v6489_v15 = vrot.slane %v12809_v29, 1  ;;  %v5380_v16 = vrot.slane %v12702_v46, 2  ;;  %v7589_v57 = vld [vmem:[%s13129_s9 + $0x7a0] sm:$0xff] }
 0x72f   :  { %9943 = vmatpush1.bf16.msra.mxu1 %v9510_v18  ;;  %7810 = vmatprep.mubr.msk.f32.mxu1 %vm42_vm5, %v6291_v59  ;;  %v9561_v18 = vpack.c.bf16 %v7546_v19, %v7545_v13  ;;  %v7553_v59 = vld [vmem:[%s13129_s9 + $0x690] sm:$0xff]  ;;  %v7585_v13 = vld [vmem:[%s13129_s9 + $0x780] sm:$0xff]  ;;  %v7586_v19 = vld [vmem:[%s13129_s9 + $0x788] sm:$0xff] }
 0x730   :  { %9944 = vmatprep.subr.bf16.mxu1 %v10312_v3 }
 0x731   :  { %9514 = vmatpush1.bf16.msra.mxu0 %v9513_v60 }
 0x732   :  { %9515 = vmatprep.subr.bf16.mxu0 %v10312_v3 }
 0x733   :  { %9946 = vmatpush1.bf16.msra.mxu1 %v9513_v60  ;;  %v7554_v60 = vld [vmem:[%s13129_s9 + $0x698] sm:$0xff] }
 0x734   :  { %9947 = vmatprep.subr.bf16.mxu1 %v10312_v3  ;;  %v9573_v63 = vpack.c.bf16 %v7554_v60, %v7553_v59  ;;  %v7591_v60 = vld [vmem:[%s13129_s9 + $0x7b0] sm:$0xff] }
 0x735   :  { %9517 = vmatpush1.bf16.msra.mxu0 %v9516_v1 }
 0x736   :  { %9518 = vmatprep.subr.bf16.mxu0 %v10312_v3 }
 0x737   :  { %9949 = vmatpush1.bf16.msra.mxu1 %v9516_v1  ;;  %v7556_v1 = vld [vmem:[%s13129_s9 + $0x6a8] sm:$0xff] }
 0x738   :  { %9950 = vmatprep.subr.bf16.mxu1 %v10312_v3  ;;  %v9576_v25 = vpack.c.bf16 %v7556_v1, %v7555_v0  ;;  %v7593_v1 = vld [vmem:[%s13129_s9 + $0x7c0] sm:$0xff] }
 0x739   :  { %9520 = vmatpush1.bf16.msra.mxu0 %v9519_v4 }
 0x73a   :  { %9521 = vmatprep.subr.bf16.mxu0 %v10312_v3 }
 0x73b   :  { %9952 = vmatpush1.bf16.msra.mxu1 %v9519_v4  ;;  %v7558_v4 = vld [vmem:[%s13129_s9 + $0x6b8] sm:$0xff] }
 0x73c   :  { %9953 = vmatprep.subr.bf16.mxu1 %v10312_v3  ;;  %v9579_v8 = vpack.c.bf16 %v7558_v4, %v7557_v2  ;;  %v7595_v4 = vld [vmem:[%s13129_s9 + $0x7d0] sm:$0xff] }
 0x73d   :  { %9523 = vmatpush1.bf16.msra.mxu0 %v9522_v26 }
 0x73e   :  { %9524 = vmatprep.subr.bf16.mxu0 %v10312_v3 }
 0x73f   :  { %9955 = vmatpush1.bf16.msra.mxu1 %v9522_v26  ;;  %v7561_v26 = vld [vmem:[%s13129_s9 + $0x6c8] sm:$0xff] }
 0x740   :  { %9956 = vmatprep.subr.bf16.mxu1 %v10312_v3  ;;  %v9582_v27 = vpack.c.bf16 %v7561_v26, %v7560_v20  ;;  %v7597_v26 = vld [vmem:[%s13129_s9 + $0x7e0] sm:$0xff] }
 0x741   :  { %9526 = vmatpush1.bf16.msra.mxu0 %v9525_v32 }
 0x742   :  { %9527 = vmatprep.subr.bf16.mxu0 %v10312_v3 }
 0x743   :  { %9958 = vmatpush1.bf16.msra.mxu1 %v9525_v32  ;;  %v7563_v32 = vld [vmem:[%s13129_s9 + $0x6d8] sm:$0xff] }
 0x744   :  { %9959 = vmatprep.subr.bf16.mxu1 %v10312_v3  ;;  %v9585_v35 = vpack.c.bf16 %v7563_v32, %v7562_v31  ;;  %v7599_v32 = vld [vmem:[%s13129_s9 + $0x7f0] sm:$0xff] }
 0x745   :  { %9529 = vmatpush1.bf16.msra.mxu0 %v9528_v30 }
 0x746   :  { %9530 = vmatprep.subr.bf16.mxu0 %v10312_v3 }
 0x747   :  { %9961 = vmatpush1.bf16.msra.mxu1 %v9528_v30  ;;  %v5279_v30 = vrot.slane %v12702_v46, 1 }
 0x748   :  { %9962 = vmatprep.subr.bf16.mxu1 %v10312_v3 }
 0x749   :  { %9532 = vmatpush1.bf16.msra.mxu0 %v9531_v7 }
 0x74a   :  { %9533 = vmatprep.subr.bf16.mxu0 %v10312_v3 }
 0x74b   :  { %9964 = vmatpush1.bf16.msra.mxu1 %v9531_v7  ;;  %v7564_v7 = vld [vmem:[%s13129_s9 + $0x6e0] sm:$0xff] }
 0x74c   :  { %9965 = vmatprep.subr.bf16.mxu1 %v10312_v3  ;;  %v9588_v34 = vpack.c.bf16 %v7565_v38, %v7564_v7  ;;  %v7602_v7 = vld [vmem:[%s13129_s9 + $0x808] sm:$0xff] }
 0x74d   :  { %9535 = vmatpush1.bf16.msra.mxu0 %v9534_v50 }
 0x74e   :  { %9536 = vmatprep.subr.bf16.mxu0 %v10312_v3 }
 0x74f   :  { %9967 = vmatpush1.bf16.msra.mxu1 %v9534_v50  ;;  %v7566_v50 = vld [vmem:[%s13129_s9 + $0x6f0] sm:$0xff] }
 0x750   :  { %9968 = vmatprep.subr.bf16.mxu1 %v10312_v3  ;;  %v9591_v11 = vpack.c.bf16 %v7567_v52, %v7566_v50  ;;  %v7604_v50 = vld [vmem:[%s13129_s9 + $0x818] sm:$0xff] }
 0x751   :  { %9538 = vmatpush1.bf16.msra.mxu0 %v9537_v39 }
 0x752   :  { %9539 = vmatprep.subr.bf16.mxu0 %v10312_v3 }
 0x753   :  { %9970 = vmatpush1.bf16.msra.mxu1 %v9537_v39  ;;  %v7568_v39 = vld [vmem:[%s13129_s9 + $0x700] sm:$0xff] }
 0x754   :  { %9971 = vmatprep.subr.bf16.mxu1 %v10312_v3  ;;  %v9594_v37 = vpack.c.bf16 %v7569_v36, %v7568_v39  ;;  %v7606_v39 = vld [vmem:[%s13129_s9 + $0x828] sm:$0xff] }
 0x755   :  { %9541 = vmatpush1.bf16.msra.mxu0 %v9540_v40 }
 0x756   :  { %9542 = vmatprep.subr.bf16.mxu0 %v10312_v3 }
 0x757   :  { %9973 = vmatpush1.bf16.msra.mxu1 %v9540_v40  ;;  %v7570_v40 = vld [vmem:[%s13129_s9 + $0x710] sm:$0xff] }
 0x758   :  { %9974 = vmatprep.subr.bf16.mxu1 %v10312_v3  ;;  %v9597_v21 = vpack.c.bf16 %v7571_v41, %v7570_v40  ;;  %v7608_v40 = vld [vmem:[%s13129_s9 + $0x838] sm:$0xff] }
 0x759   :  { %9544 = vmatpush1.bf16.msra.mxu0 %v9543_v51 }
 0x75a   :  { %9545 = vmatprep.subr.bf16.mxu0 %v10312_v3 }
 0x75b   :  { %9976 = vmatpush1.bf16.msra.mxu1 %v9543_v51  ;;  %v7572_v51 = vld [vmem:[%s13129_s9 + $0x720] sm:$0xff] }
 0x75c   :  { %9977 = vmatprep.subr.bf16.mxu1 %v10312_v3  ;;  %5147 = vmatmul.mubr.f32.vlgmr.msra.gmra.mrb[10].mxu0 %v5077_v44  ;;  %v9600_v42 = vpack.c.bf16 %v7573_v23, %v7572_v51  ;;  %v7575_v44 = vld [vmem:[%s13129_s9 + $0x738] sm:$0xff]  ;;  %v7611_v51 = vld [vmem:[%s13129_s9 + $0x848] sm:$0xff] }
 0x75d   :  { %9547 = vmatpush1.bf16.msra.mxu0 %v9546_v43  ;;  %7559 = vmatprep.mubr.msk.f32.mxu0 %vm42_vm5, %v12702_v46 }
 0x75e   :  { %6360 = vmatmul.mubr.f32.vlgmr.msra.gmra.mrb[10].mxu1 %v6290_v45  ;;  %9548 = vmatprep.subr.bf16.mxu0 %v10312_v3  ;;  %v7577_v45 = vld [vmem:[%s13129_s9 + $0x748] sm:$0xff] }
 0x75f   :  { %9979 = vmatpush1.bf16.msra.mxu1 %v9546_v43  ;;  %7835 = vmatprep.mubr.msk.f32.mxu1 %vm42_vm5, %v12706_v48  ;;  %v7574_v43 = vld [vmem:[%s13129_s9 + $0x730] sm:$0xff] }
 0x760   :  { %9980 = vmatprep.subr.bf16.mxu1 %v10312_v3  ;;  %v9603_v61 = vpack.c.bf16 %v7575_v44, %v7574_v43  ;;  %v7612_v43 = vld [vmem:[%s13129_s9 + $0x850] sm:$0xff]  ;;  %v7613_v44 = vld [vmem:[%s13129_s9 + $0x858] sm:$0xff] }
 0x761   :  { %9550 = vmatpush1.bf16.msra.mxu0 %v9549_v47 }
 0x762   :  { %9551 = vmatprep.subr.bf16.mxu0 %v10312_v3 }
 0x763   :  { %9982 = vmatpush1.bf16.msra.mxu1 %v9549_v47  ;;  %v9606_v47 = vpack.c.bf16 %v7577_v45, %v7576_v62  ;;  %v5481_v62 = vrot.slane %v12702_v46, 3  ;;  %v6690_v45 = vrot.slane %v12706_v48, 3 }
 0x764   :  { %9983 = vmatprep.subr.bf16.mxu1 %v10312_v3 }
 0x765   :  { %9553 = vmatpush1.bf16.msra.mxu0 %v9552_v9 }
 0x766   :  { %9554 = vmatprep.subr.bf16.mxu0 %v10312_v3 }
 0x767   :  { %9985 = vmatpush1.bf16.msra.mxu1 %v9552_v9  ;;  %v9609_v9 = vpack.c.bf16 %v7579_v22, %v7578_v49  ;;  %v7614_v49 = vld [vmem:[%s13129_s9 + $0x860] sm:$0xff]  ;;  %v7615_v22 = vld [vmem:[%s13129_s9 + $0x868] sm:$0xff] }
 0x768   :  { %9986 = vmatprep.subr.bf16.mxu1 %v10312_v3  ;;  %v9660_v46 = vpack.c.bf16 %v7615_v22, %v7614_v49 }
 0x769   :  { %9556 = vmatpush1.bf16.msra.mxu0 %v9555_v17 }
 0x76a   :  { %9557 = vmatprep.subr.bf16.mxu0 %v10312_v3 }
 0x76b   :  { %9988 = vmatpush1.bf16.msra.mxu1 %v9555_v17  ;;  %v9612_v17 = vpack.c.bf16 %v7581_v10, %v7580_v5  ;;  %v7618_v10 = vld [vmem:[%s13129_s9 + $0x880] sm:$0xff] }
 0x76c   :  { %9989 = vmatprep.subr.bf16.mxu1 %v10312_v3 }
 0x76d   :  { %9559 = vmatpush1.bf16.msra.mxu0 %v9558_v6 }
 0x76e   :  { %9560 = vmatprep.subr.bf16.mxu0 %v10312_v3 }
 0x76f   :  { %9991 = vmatpush1.bf16.msra.mxu1 %v9558_v6  ;;  %v9615_v6 = vpack.c.bf16 %v7583_v53, %v7582_v24  ;;  %v7620_v53 = vld [vmem:[%s13129_s9 + $0x890] sm:$0xff] }
 0x770   :  { %9992 = vmatprep.subr.bf16.mxu1 %v10312_v3 }
 0x771   :  { %9562 = vmatpush1.bf16.msra.mxu0 %v9561_v18 }
 0x772   :  { %9563 = vmatprep.subr.bf16.mxu0 %v10312_v3 }
 0x773   :  { %9994 = vmatpush1.bf16.msra.mxu1 %v9561_v18  ;;  %v9618_v18 = vpack.c.bf16 %v7586_v19, %v7585_v13  ;;  %v7622_v19 = vld [vmem:[%s13129_s9 + $0x8a0] sm:$0xff] }
 0x774   :  { %9995 = vmatprep.subr.bf16.mxu1 %v10312_v3 }
 0x775   :  { %9565 = vmatpush1.bf16.msra.mxu0 %v9564_v12 }
 0x776   :  { %9566 = vmatprep.subr.bf16.mxu0 %v10312_v3 }
 0x777   :  { %9997 = vmatpush1.bf16.msra.mxu1 %v9564_v12  ;;  %v7588_v12 = vld [vmem:[%s13129_s9 + $0x798] sm:$0xff] }
 0x778   :  { %9998 = vmatprep.subr.bf16.mxu1 %v10312_v3  ;;  %v9621_v56 = vpack.c.bf16 %v7588_v12, %v7587_v54  ;;  %v7624_v54 = vld [vmem:[%s13129_s9 + $0x8b0] sm:$0xff]  ;;  %v7625_v12 = vld [vmem:[%s13129_s9 + $0x8b8] sm:$0xff] }
 0x779   :  { %9568 = vmatpush1.bf16.msra.mxu0 %v9567_v55 }
 0x77a   :  { %9569 = vmatprep.subr.bf16.mxu0 %v10312_v3 }
 0x77b   :  { %10000 = vmatpush1.bf16.msra.mxu1 %v9567_v55  ;;  %v6590_v55 = vrot.slane %v12706_v48, 2  ;;  %v7616_v48 = vld [vmem:[%s13129_s9 + $0x870] sm:$0xff] }
 0x77c   :  { %10001 = vmatprep.subr.bf16.mxu1 %v10312_v3 }
 0x77d   :  { %9571 = vmatpush1.bf16.msra.mxu0 %v9570_v58 }
 0x77e   :  { %9572 = vmatprep.subr.bf16.mxu0 %v10312_v3 }
 0x77f   :  { %10003 = vmatpush1.bf16.msra.mxu1 %v9570_v58  ;;  %v7590_v58 = vld [vmem:[%s13129_s9 + $0x7a8] sm:$0xff] }
 0x780   :  { %10004 = vmatprep.subr.bf16.mxu1 %v10312_v3  ;;  %v9624_v59 = vpack.c.bf16 %v7590_v58, %v7589_v57  ;;  %v7628_v57 = vld [vmem:[%s13129_s9 + $0x8d0] sm:$0xff]  ;;  %v7629_v58 = vld [vmem:[%s13129_s9 + $0x8d8] sm:$0xff] }
 0x781   :  { %9574 = vmatpush1.bf16.msra.mxu0 %v9573_v63 }
 0x782   :  { %9575 = vmatprep.subr.bf16.mxu0 %v10312_v3 }
 0x783   :  { %10006 = vmatpush1.bf16.msra.mxu1 %v9573_v63  ;;  %v7592_v63 = vld [vmem:[%s13129_s9 + $0x7b8] sm:$0xff] }
 0x784   :  { %10007 = vmatprep.subr.bf16.mxu1 %v10312_v3  ;;  %v9627_v0 = vpack.c.bf16 %v7592_v63, %v7591_v60  ;;  %v7630_v60 = vld [vmem:[%s13129_s9 + $0x8e0] sm:$0xff]  ;;  %v7631_v63 = vld [vmem:[%s13129_s9 + $0x8e8] sm:$0xff] }
 0x785   :  { %9577 = vmatpush1.bf16.msra.mxu0 %v9576_v25 }
 0x786   :  { %9578 = vmatprep.subr.bf16.mxu0 %v10312_v3 }
 0x787   :  { %10009 = vmatpush1.bf16.msra.mxu1 %v9576_v25  ;;  %v7594_v25 = vld [vmem:[%s13129_s9 + $0x7c8] sm:$0xff] }
 0x788   :  { %10010 = vmatprep.subr.bf16.mxu1 %v10312_v3  ;;  %v9630_v2 = vpack.c.bf16 %v7594_v25, %v7593_v1  ;;  %v7632_v1 = vld [vmem:[%s13129_s9 + $0x8f0] sm:$0xff]  ;;  %v7633_v25 = vld [vmem:[%s13129_s9 + $0x8f8] sm:$0xff] }
 0x789   :  { %9580 = vmatpush1.bf16.msra.mxu0 %v9579_v8 }
 0x78a   :  { %9581 = vmatprep.subr.bf16.mxu0 %v10312_v3 }
 0x78b   :  { %10012 = vmatpush1.bf16.msra.mxu1 %v9579_v8  ;;  %v7596_v8 = vld [vmem:[%s13129_s9 + $0x7d8] sm:$0xff] }
 0x78c   :  { %10013 = vmatprep.subr.bf16.mxu1 %v10312_v3  ;;  %5246 = vmatmul.mubr.f32.vlgmr.msra.gmra.mrb[10].mxu0 %v12805_v28  ;;  %v9633_v20 = vpack.c.bf16 %v7596_v8, %v7595_v4  ;;  %v5480_v4 = vrot.slane %v12805_v28, 3  ;;  %v6689_v8 = vrot.slane %v12809_v29, 3 }
 0x78d   :  { %9583 = vmatpush1.bf16.msra.mxu0 %v9582_v27  ;;  %7584 = vmatprep.mubr.msk.f32.mxu0 %vm42_vm5, %v5279_v30  ;;  %v7600_v30 = vld [vmem:[%s13129_s9 + $0x7f8] sm:$0xff] }
 0x78e   :  { %6458 = vmatmul.mubr.f32.vlgmr.msra.gmra.mrb[10].mxu1 %v12809_v29  ;;  %9584 = vmatprep.subr.bf16.mxu0 %v10312_v3 }
 0x78f   :  { %10015 = vmatpush1.bf16.msra.mxu1 %v9582_v27  ;;  %7860 = vmatprep.mubr.msk.f32.mxu1 %vm42_vm5, %v6490_v33  ;;  %v7598_v27 = vld [vmem:[%s13129_s9 + $0x7e8] sm:$0xff]  ;;  %v9639_v33 = vpack.c.bf16 %v7600_v30, %v7599_v32 }
 0x790   :  { %10016 = vmatprep.subr.bf16.mxu1 %v10312_v3  ;;  %v9636_v31 = vpack.c.bf16 %v7598_v27, %v7597_v26 }
 0x791   :  { %9586 = vmatpush1.bf16.msra.mxu0 %v9585_v35 }
 0x792   :  { %9587 = vmatprep.subr.bf16.mxu0 %v10312_v3 }
 0x793   :  { %10018 = vmatpush1.bf16.msra.mxu1 %v9585_v35  ;;  %v7601_v35 = vld [vmem:[%s13129_s9 + $0x800] sm:$0xff] }
 0x794   :  { %10019 = vmatprep.subr.bf16.mxu1 %v10312_v3  ;;  %v9642_v38 = vpack.c.bf16 %v7602_v7, %v7601_v35 }
 0x795   :  { %9589 = vmatpush1.bf16.msra.mxu0 %v9588_v34 }
 0x796   :  { %9590 = vmatprep.subr.bf16.mxu0 %v10312_v3 }
 0x797   :  { %10021 = vmatpush1.bf16.msra.mxu1 %v9588_v34  ;;  %v7603_v34 = vld [vmem:[%s13129_s9 + $0x810] sm:$0xff] }
 0x798   :  { %10022 = vmatprep.subr.bf16.mxu1 %v10312_v3  ;;  %v9645_v52 = vpack.c.bf16 %v7604_v50, %v7603_v34 }
 0x799   :  { %9592 = vmatpush1.bf16.msra.mxu0 %v9591_v11 }
 0x79a   :  { %9593 = vmatprep.subr.bf16.mxu0 %v10312_v3 }
 0x79b   :  { %10024 = vmatpush1.bf16.msra.mxu1 %v9591_v11  ;;  %v7605_v11 = vld [vmem:[%s13129_s9 + $0x820] sm:$0xff] }
 0x79c   :  { %10025 = vmatprep.subr.bf16.mxu1 %v10312_v3  ;;  %v9648_v36 = vpack.c.bf16 %v7606_v39, %v7605_v11 }
 0x79d   :  { %9595 = vmatpush1.bf16.msra.mxu0 %v9594_v37 }
 0x79e   :  { %9596 = vmatprep.subr.bf16.mxu0 %v10312_v3 }
 0x79f   :  { %10027 = vmatpush1.bf16.msra.mxu1 %v9594_v37  ;;  %v7607_v37 = vld [vmem:[%s13129_s9 + $0x830] sm:$0xff] }
 0x7a0   :  { %10028 = vmatprep.subr.bf16.mxu1 %v10312_v3  ;;  %v9651_v41 = vpack.c.bf16 %v7608_v40, %v7607_v37 }
 0x7a1   :  { %9598 = vmatpush1.bf16.msra.mxu0 %v9597_v21 }
 0x7a2   :  { %9599 = vmatprep.subr.bf16.mxu0 %v10312_v3 }
 0x7a3   :  { %10030 = vmatpush1.bf16.msra.mxu1 %v9597_v21  ;;  %v7610_v21 = vld [vmem:[%s13129_s9 + $0x840] sm:$0xff] }
 0x7a4   :  { %10031 = vmatprep.subr.bf16.mxu1 %v10312_v3  ;;  %v9654_v23 = vpack.c.bf16 %v7611_v51, %v7610_v21 }
 0x7a5   :  { %9601 = vmatpush1.bf16.msra.mxu0 %v9600_v42 }
 0x7a6   :  { %9602 = vmatprep.subr.bf16.mxu0 %v10312_v3 }
 0x7a7   :  { %10033 = vmatpush1.bf16.msra.mxu1 %v9600_v42  ;;  %v5379_v42 = vrot.slane %v12805_v28, 2 }
 0x7a8   :  { %10034 = vmatprep.subr.bf16.mxu1 %v10312_v3 }
 0x7a9   :  { %9604 = vmatpush1.bf16.msra.mxu0 %v9603_v61 }
 0x7aa   :  { %9605 = vmatprep.subr.bf16.mxu0 %v10312_v3 }
 0x7ab   :  { %10036 = vmatpush1.bf16.msra.mxu1 %v9603_v61  ;;  %v6589_v61 = vrot.slane %v12809_v29, 2 }
 0x7ac   :  { %10037 = vmatprep.subr.bf16.mxu1 %v10312_v3 }
 0x7ad   :  { %9607 = vmatpush1.bf16.msra.mxu0 %v9606_v47 }
 0x7ae   :  { %9608 = vmatprep.subr.bf16.mxu0 %v10312_v3 }
 0x7af   :  { %10039 = vmatpush1.bf16.msra.mxu1 %v9606_v47  ;;  %v9657_v47 = vpack.c.bf16 %v7613_v44, %v7612_v43 }
 0x7b0   :  { %10040 = vmatprep.subr.bf16.mxu1 %v10312_v3 }
 0x7b1   :  { %9610 = vmatpush1.bf16.msra.mxu0 %v9609_v9 }
 0x7b2   :  { %9611 = vmatprep.subr.bf16.mxu0 %v10312_v3 }
 0x7b3   :  { %10042 = vmatpush1.bf16.msra.mxu1 %v9609_v9  ;;  %v7617_v9 = vld [vmem:[%s13129_s9 + $0x878] sm:$0xff] }
 0x7b4   :  { %10043 = vmatprep.subr.bf16.mxu1 %v10312_v3  ;;  %v9663_v5 = vpack.c.bf16 %v7617_v9, %v7616_v48 }
 0x7b5   :  { %9613 = vmatpush1.bf16.msra.mxu0 %v9612_v17 }
 0x7b6   :  { %9614 = vmatprep.subr.bf16.mxu0 %v10312_v3 }
 0x7b7   :  { %10045 = vmatpush1.bf16.msra.mxu1 %v9612_v17  ;;  %v7619_v17 = vld [vmem:[%s13129_s9 + $0x888] sm:$0xff] }
 0x7b8   :  { %10046 = vmatprep.subr.bf16.mxu1 %v10312_v3  ;;  %v9666_v24 = vpack.c.bf16 %v7619_v17, %v7618_v10 }
 0x7b9   :  { %9616 = vmatpush1.bf16.msra.mxu0 %v9615_v6 }
 0x7ba   :  { %9617 = vmatprep.subr.bf16.mxu0 %v10312_v3 }
 0x7bb   :  { %10048 = vmatpush1.bf16.msra.mxu1 %v9615_v6  ;;  %v7621_v6 = vld [vmem:[%s13129_s9 + $0x898] sm:$0xff] }
 0x7bc   :  { %10049 = vmatprep.subr.bf16.mxu1 %v10312_v3  ;;  %5348 = vmatmul.mubr.f32.vlgmr.msra.gmra.mrb[10].mxu0 %v5278_v14  ;;  %v9669_v13 = vpack.c.bf16 %v7621_v6, %v7620_v53 }
 0x7bd   :  { %9619 = vmatpush1.bf16.msra.mxu0 %v9618_v18  ;;  %7609 = vmatprep.mubr.msk.f32.mxu0 %vm42_vm5, %v5380_v16  ;;  %v7626_v16 = vld [vmem:[%s13129_s9 + $0x8c0] sm:$0xff] }
 0x7be   :  { %6559 = vmatmul.mubr.f32.vlgmr.msra.gmra.mrb[10].mxu1 %v6489_v15  ;;  %9620 = vmatprep.subr.bf16.mxu0 %v10312_v3  ;;  %v9675_v15 = vpack.c.bf16 %v7625_v12, %v7624_v54 }
 0x7bf   :  { %10051 = vmatpush1.bf16.msra.mxu1 %v9618_v18  ;;  %7885 = vmatprep.mubr.msk.f32.mxu1 %vm42_vm5, %v6590_v55  ;;  %v7623_v18 = vld [vmem:[%s13129_s9 + $0x8a8] sm:$0xff] }
 0x7c0   :  { %10052 = vmatprep.subr.bf16.mxu1 %v10312_v3  ;;  %v9672_v14 = vpack.c.bf16 %v7623_v18, %v7622_v19  ;;  %v7627_v55 = vld [vmem:[%s13129_s9 + $0x8c8] sm:$0xff]  ;;  %s10316_s9 = smov [#allocation4]  }
 0x7c1   :  { %9622 = vmatpush1.bf16.msra.mxu0 %v9621_v56  ;;  %s6779_s22 = sshll.u32 %s10316_s9, 4  ;;  %s6780_s22 = int_to_ptr.vmem [resolvable:$true] %s6779_s22 }
 0x7c2   :  { %9623 = vmatprep.subr.bf16.mxu0 %v10312_v3  ;;  %s10285_s3 = scalar_lea.vmem %s6780_s22, 32  ;;  %p10290_p1 = scmp.lt.s32.totalorder %s6780_s22, %s6780_s22 }
 0x7c3   :  { %10054 = vmatpush1.bf16.msra.mxu1 %v9621_v56  ;;  %v9678_v56 = vpack.c.bf16 %v7627_v55, %v7626_v16  ;;  %p10286_p0 = scmp.ne.s32.totalorder %s6780_s22, %s10285_s3  ;;  %p10291_p2 = scmp.lt.s32.totalorder %s10285_s3, %s10285_s3 }
 0x7c4   :  { %10055 = vmatprep.subr.bf16.mxu1 %v10312_v3 }
 0x7c5   :  { %9625 = vmatpush1.bf16.msra.mxu0 %v9624_v59  ;;  %p10292_p3 = por %p10291_p2, %p10290_p1 }
 0x7c6   :  { %9626 = vmatprep.subr.bf16.mxu0 %v10312_v3 }
 0x7c7   :  { %10057 = vmatpush1.bf16.msra.mxu1 %v9624_v59  ;;  %v9681_v59 = vpack.c.bf16 %v7629_v58, %v7628_v57  ;;  %p10293_p4 = pnand %p10292_p3, %p10286_p0 }
 0x7c8   :  { %10058 = vmatprep.subr.bf16.mxu1 %v10312_v3 }
 0x7c9   :  { %9628 = vmatpush1.bf16.msra.mxu0 %v9627_v0 }
 0x7ca   :  { %9629 = vmatprep.subr.bf16.mxu0 %v10312_v3 }
 0x7cb   :  { %10060 = vmatpush1.bf16.msra.mxu1 %v9627_v0  ;;  %v9684_v0 = vpack.c.bf16 %v7631_v63, %v7630_v60 }
 0x7cc   :  { %10061 = vmatprep.subr.bf16.mxu1 %v10312_v3 }
 0x7cd   :  { %9631 = vmatpush1.bf16.msra.mxu0 %v9630_v2 }
 0x7ce   :  { %9632 = vmatprep.subr.bf16.mxu0 %v10312_v3 }
 0x7cf   :  { %10063 = vmatpush1.bf16.msra.mxu1 %v9630_v2  ;;  %v9687_v2 = vpack.c.bf16 %v7633_v25, %v7632_v1 }
 0x7d0   :  { %10064 = vmatprep.subr.bf16.mxu1 %v10312_v3 }
 0x7d1   :  { %9634 = vmatpush1.bf16.msra.mxu0 %v9633_v20 }
 0x7d2   :  { %9635 = vmatprep.subr.bf16.mxu0 %v10312_v3 }
 0x7d3   :  { %10066 = vmatpush1.bf16.msra.mxu1 %v9633_v20 }
 0x7d4   :  { %10067 = vmatprep.subr.bf16.mxu1 %v10312_v3 }
 0x7d5   :  { %9637 = vmatpush1.bf16.msra.mxu0 %v9636_v31 }
 0x7d6   :  { %9638 = vmatprep.subr.bf16.mxu0 %v10312_v3 }
 0x7d7   :  { %10069 = vmatpush1.bf16.msra.mxu1 %v9636_v31 }
 0x7d8   :  { %10070 = vmatprep.subr.bf16.mxu1 %v10312_v3 }
 0x7d9   :  { %9640 = vmatpush1.bf16.msra.mxu0 %v9639_v33 }
 0x7da   :  { %9641 = vmatprep.subr.bf16.mxu0 %v10312_v3 }
 0x7db   :  { %10072 = vmatpush1.bf16.msra.mxu1 %v9639_v33 }
 0x7dc   :  { %10073 = vmatprep.subr.bf16.mxu1 %v10312_v3 }
 0x7dd   :  { %9643 = vmatpush1.bf16.msra.mxu0 %v9642_v38 }
 0x7de   :  { %9644 = vmatprep.subr.bf16.mxu0 %v10312_v3 }
 0x7df   :  { %10075 = vmatpush1.bf16.msra.mxu1 %v9642_v38 }
 0x7e0   :  { %10076 = vmatprep.subr.bf16.mxu1 %v10312_v3 }
 0x7e1   :  { %9646 = vmatpush1.bf16.msra.mxu0 %v9645_v52 }
 0x7e2   :  { %9647 = vmatprep.subr.bf16.mxu0 %v10312_v3 }
 0x7e3   :  { %10078 = vmatpush1.bf16.msra.mxu1 %v9645_v52 }
 0x7e4   :  { %10079 = vmatprep.subr.bf16.mxu1 %v10312_v3 }
 0x7e5   :  { %9649 = vmatpush1.bf16.msra.mxu0 %v9648_v36 }
 0x7e6   :  { %9650 = vmatprep.subr.bf16.mxu0 %v10312_v3 }
 0x7e7   :  { %10081 = vmatpush1.bf16.msra.mxu1 %v9648_v36 }
 0x7e8   :  { %10082 = vmatprep.subr.bf16.mxu1 %v10312_v3 }
 0x7e9   :  { %9652 = vmatpush1.bf16.msra.mxu0 %v9651_v41 }
 0x7ea   :  { %9653 = vmatprep.subr.bf16.mxu0 %v10312_v3 }
 0x7eb   :  { %10084 = vmatpush1.bf16.msra.mxu1 %v9651_v41 }
 0x7ec   :  { %10085 = vmatprep.subr.bf16.mxu1 %v10312_v3  ;;  %5449 = vmatmul.mubr.f32.vlgmr.msra.gmra.mrb[10].mxu0 %v5379_v42 }
 0x7ed   :  { %9655 = vmatpush1.bf16.msra.mxu0 %v9654_v23  ;;  %7634 = vmatprep.mubr.msk.f32.mxu0 %vm42_vm5, %v5481_v62 }
 0x7ee   :  { %6659 = vmatmul.mubr.f32.vlgmr.msra.gmra.mrb[10].mxu1 %v6589_v61  ;;  %9656 = vmatprep.subr.bf16.mxu0 %v10312_v3 }
 0x7ef   :  { %10087 = vmatpush1.bf16.msra.mxu1 %v9654_v23  ;;  %7910 = vmatprep.mubr.msk.f32.mxu1 %vm42_vm5, %v6690_v45 }
 0x7f0   :  { %10088 = vmatprep.subr.bf16.mxu1 %v10312_v3 }
 0x7f1   :  { %9658 = vmatpush1.bf16.msra.mxu0 %v9657_v47 }
 0x7f2   :  { %9659 = vmatprep.subr.bf16.mxu0 %v10312_v3 }
 0x7f3   :  { %10090 = vmatpush1.bf16.msra.mxu1 %v9657_v47 }
 0x7f4   :  { %10091 = vmatprep.subr.bf16.mxu1 %v10312_v3 }
 0x7f5   :  { %9661 = vmatpush1.bf16.msra.mxu0 %v9660_v46 }
 0x7f6   :  { %9662 = vmatprep.subr.bf16.mxu0 %v10312_v3 }
 0x7f7   :  { %10093 = vmatpush1.bf16.msra.mxu1 %v9660_v46 }
 0x7f8   :  { %10094 = vmatprep.subr.bf16.mxu1 %v10312_v3 }
 0x7f9   :  { %9664 = vmatpush1.bf16.msra.mxu0 %v9663_v5 }
 0x7fa   :  { %9665 = vmatprep.subr.bf16.mxu0 %v10312_v3 }
 0x7fb   :  { %10096 = vmatpush1.bf16.msra.mxu1 %v9663_v5 }
 0x7fc   :  { %10097 = vmatprep.subr.bf16.mxu1 %v10312_v3 }
 0x7fd   :  { %9667 = vmatpush1.bf16.msra.mxu0 %v9666_v24 }
 0x7fe   :  { %9668 = vmatprep.subr.bf16.mxu0 %v10312_v3 }
 0x7ff   :  { %10099 = vmatpush1.bf16.msra.mxu1 %v9666_v24 }
 0x800   :  { %10100 = vmatprep.subr.bf16.mxu1 %v10312_v3 }
 0x801   :  { %9670 = vmatpush1.bf16.msra.mxu0 %v9669_v13 }
 0x802   :  { %9671 = vmatprep.subr.bf16.mxu0 %v10312_v3 }
 0x803   :  { %10102 = vmatpush1.bf16.msra.mxu1 %v9669_v13 }
 0x804   :  { %10103 = vmatprep.subr.bf16.mxu1 %v10312_v3 }
 0x805   :  { %9673 = vmatpush1.bf16.msra.mxu0 %v9672_v14 }
 0x806   :  { %9674 = vmatprep.subr.bf16.mxu0 %v10312_v3 }
 0x807   :  { %10105 = vmatpush1.bf16.msra.mxu1 %v9672_v14 }
 0x808   :  { %10106 = vmatprep.subr.bf16.mxu1 %v10312_v3 }
 0x809   :  { %9676 = vmatpush1.bf16.msra.mxu0 %v9675_v15 }
 0x80a   :  { %9677 = vmatprep.subr.bf16.mxu0 %v10312_v3 }
 0x80b   :  { %10108 = vmatpush1.bf16.msra.mxu1 %v9675_v15 }
 0x80c   :  { %10109 = vmatprep.subr.bf16.mxu1 %v10312_v3 }
 0x80d   :  { %9679 = vmatpush1.bf16.msra.mxu0 %v9678_v56 }
 0x80e   :  { %9680 = vmatprep.subr.bf16.mxu0 %v10312_v3 }
 0x80f   :  { %10111 = vmatpush1.bf16.msra.mxu1 %v9678_v56 }
 0x810   :  { %10112 = vmatprep.subr.bf16.mxu1 %v10312_v3 }
 0x811   :  { %9682 = vmatpush1.bf16.msra.mxu0 %v9681_v59 }
 0x812   :  { %9683 = vmatprep.subr.bf16.mxu0 %v10312_v3 }
 0x813   :  { %10114 = vmatpush1.bf16.msra.mxu1 %v9681_v59 }
 0x814   :  { %10115 = vmatprep.subr.bf16.mxu1 %v10312_v3 }
 0x815   :  { %9685 = vmatpush1.bf16.msra.mxu0 %v9684_v0 }
 0x816   :  { %9686 = vmatprep.subr.bf16.mxu0 %v10312_v3 }
 0x817   :  { %10117 = vmatpush1.bf16.msra.mxu1 %v9684_v0 }
 0x818   :  { %10118 = vmatprep.subr.bf16.mxu1 %v10312_v3 }
 0x819   :  { %9688 = vmatpush1.bf16.msra.mxu0 %v9687_v2 }
 0x81b   :  { %10120 = vmatpush1.bf16.msra.mxu1 %v9687_v2 }
 0x81c   :  { %5550 = vmatmul.mubr.f32.vlgmr.msra.gmra.mrb[10].mxu0 %v5480_v4 }
 0x81e   :  { %6759 = vmatmul.mubr.f32.vlgmr.msra.gmra.mrb[10].mxu1 %v6689_v8 }
 0x8ef   :  { %v5551_v20 = vpop.f32.mrb[10].mxu0 }
 0x8f0   :  { %v5556_v26 = vmul.f32 %v5551_v20, %v5551_v20  ;;  %v5553_v31 = vpop.f32.mrb[11].mxu0 }
 0x8f1   :  { %v6760_v27 = vpop.f32.mrb[10].mxu1 }
 0x8f2   :  { %v6765_v32 = vmul.f32 %v6760_v27, %v6760_v27  ;;  %v6762_v30 = vpop.f32.mrb[11].mxu1  ;;  %v5558_v33 = vsel %vm5557_vm7, %v5556_v26, 0.0 }
 0x8f3   :  { %5559 = vadd.xlane.f32.xlu0 %v5558_v33 }
 0x8f4   :  { %v6766_v35 = vsel %vm5557_vm7, %v6765_v32, 0.0 }
 0x8f5   :  { %6767 = vadd.xlane.f32.xlu1 %v6766_v35 }
 0x980   :  { %v5560_v3 = vpop.xlane.xlu0 %5559 }
 0x981   :  { %v5561_v28 = vmax.f32 %v5560_v3, 1e-24 }
 0x982   :  { %v6768_v7 = vpop.xlane.xlu1 %6767 }
 0x983   :  { %v6769_v38 = vmax.f32 %v6768_v7, 1e-24  ;;  %10275 = vrsqrt.f32 %v5561_v28 }
 0x985   :  { %10277 = vrsqrt.f32 %v6769_v38 }
 0x98d   :  { %v10276_v29 = vpop.eup %10275 }
 0x98e   :  { %v5563_v50 = vmul.f32 %v10276_v29, %v5551_v20 }
 0x98f   :  { %v10278_v34 = vpop.eup %10277 }
 0x990   :  { %v6771_v52 = vmul.f32 %v10278_v34, %v6760_v27  ;;  %5564 = vst.msk [vmem:[#allocation4] sm:$0x1] %vm5557_vm7, %v5563_v50 }
 0x992   :  { %6772 = vst.msk [vmem:[#allocation4 + $0x1] sm:$0x1] %vm5557_vm7, %v6771_v52 }
 0x993   :  { %10296 = shalt.err (!%p10293_p4)
}
 0x994   :  { %s10297_s24 = scalar_lea.hbm %s13130_s10, 32 }
 0x995   :  { %p10298_p5 = scmp.ne.s32.totalorder %s13130_s10, %s10297_s24  ;;  %p10301_p6 = scmp.lt.u32.totalorder %s10297_s24, %s13130_s10 }
 0x997   :  { %p10303_p7 = pnand %p10301_p6, %p10298_p5 }
 0x999   :  { %10306 = shalt.err (!%p10303_p7)
}
 0x99a   :  { %6782 = dma.vmem_to_hbm [thread:$0]  %s6780_s22, 32, %s13130_s10, [#allocation5]  }
 0x99b   :  { %10307 = dma.done.wait [#allocation5], 32  }
 0x99c   :  { %10308 = vsyncadd [#allocation5], 4294967264 }
 0x99d   :  { %6786 = vsyncpa [#allocation5], 1 }

</bundles_post_ra>
